<compile_context>
chip_gen: v7x
topology: tpu7x:2x2x1
jax: 0.10.0
libtpu: 0.0.40
codegen_flags: <defaults>
</compile_context>

<pallas_src>
import functools
import math

import jax
import jax.numpy as jnp
from jax.experimental import pallas as pl
from jax.experimental.pallas import tpu as pltpu

CPAD = 128  # 3 classes padded to one full lane tile -> unmasked log-softmax writeback


def _sigmoid(x):
    # Exactly the logistic sigmoid, but a single EUP tanh instead of exp + divide.
    return 0.5 * jnp.tanh(0.5 * x) + 0.5


def _log_softmax_rows(x):
    m = jnp.max(x, axis=-1, keepdims=True)
    s = x - m
    return s - jnp.log(jnp.sum(jnp.exp(s), axis=-1, keepdims=True))


def _two_phase_kernel(T, B, H,
                      emb_ref,
                      wih_ref, bih_ref,            # fused (sub | stance-embedded) input proj
                      whh_s_ref,
                      whs_ref, bhs_ref,            # fused [sub head(pad 128) | K | V]
                      wq_ref, bq_ref, wo_ref, bo_ref,
                      wih_ta_ref, whh_t_ref,
                      wlt_ref, blt_ref,            # stance head (padded to 128)
                      y_sub_ref, y_stance_ref,
                      hs_ref, pre_ref):
    f32 = jnp.float32
    bf16 = jnp.bfloat16
    H4 = 4 * H

    def lstm_cell(gates, c_prev):
        # PyTorch gate order: i, f, g, o
        i = _sigmoid(gates[:, 0 * H:1 * H])
        f = _sigmoid(gates[:, 1 * H:2 * H])
        g = jnp.tanh(gates[:, 2 * H:3 * H])
        o = _sigmoid(gates[:, 3 * H:4 * H])
        c_new = f * c_prev + i * g
        h_new = o * jnp.tanh(c_new)
        return h_new, c_new

    # ---- fused input projections: one (T*B, E) @ (E, 8H) bf16 MXU matmul ----
    # Columns [0, 4H) feed the sub LSTM, [4H, 8H) feed the stance LSTM (embedded part),
    # so the stance projection is ready before the serial loops and nothing reuses the
    # buffer (no WAR hazard).
    emb = emb_ref[...]                                                   # (T*B, E) bf16
    pre_ref[...] = jnp.dot(emb, wih_ref[...],
                           preferred_element_type=f32) + bih_ref[...]

    # ---------------- Phase 1: subjectivity LSTM (serial, latency-bound) ----------------
    whh_s = whh_s_ref[...]                                               # hoisted (H, 4H) bf16

    def sub_step(t, carry):
        h, c = carry
        row = t * B                                                      # B is a multiple of 8
        gates = pre_ref[pl.ds(row, B), pl.ds(0, H4)] + jnp.dot(
            h.astype(bf16), whh_s, preferred_element_type=f32)
        h_new, c_new = lstm_cell(gates, c)
        hs_ref[pl.ds(row, B), :] = h_new
        return h_new, c_new

    h0 = jnp.zeros((B, H), f32)
    h_T, c_T = jax.lax.fori_loop(0, T, sub_step, (h0, h0), unroll=min(T, 8))

    # ---- fused hs_sub consumers: [sub head | K | V] in one (T*B,H)@(H,128+2H) matmul ----
    hs_sub = hs_ref[...].astype(bf16)                                    # (T*B, H)
    hs_proj = jnp.dot(hs_sub, whs_ref[...],
                      preferred_element_type=f32) + bhs_ref[...]         # (T*B, 128+2H)
    y_sub_ref[...] = _log_softmax_rows(hs_proj[:, 0:CPAD])               # lane-dense store
    kp = hs_proj[:, CPAD:CPAD + H]                                       # (T*B, H)
    vp = hs_proj[:, CPAD + H:CPAD + 2 * H]                               # (T*B, H)

    # ---------------- single-head attention (diagonal pairs only, no mask) ----------------
    # query = final sub hidden state; keys/values = sub hidden sequence of the SAME batch
    # column, so only sum_h(qp[b] * kp[t, b]) is needed (no dense (B, T*B) scores).
    scale = 1.0 / math.sqrt(H)
    qp = (jnp.dot(h_T.astype(bf16), wq_ref[...],
                  preferred_element_type=f32) + bq_ref[...]) * scale     # (B, H)
    kp3 = kp.reshape(T, B, H)
    vp3 = vp.reshape(T, B, H)
    scores = jnp.sum(kp3 * qp[None, :, :], axis=-1, keepdims=True)       # (T, B, 1)
    s_max = jnp.max(scores, axis=0, keepdims=True)                       # (1, B, 1)
    e = jnp.exp(scores - s_max)
    w = e * pl.reciprocal(jnp.sum(e, axis=0, keepdims=True), approx=True)
    attn = jnp.sum(w * vp3, axis=0)                                      # (B, H)
    a = jnp.dot(attn.astype(bf16), wo_ref[...],
                preferred_element_type=f32) + bo_ref[...]                # (B, H)

    # ---------------- Phase 2: stance LSTM ----------------
    # concat(embedded, a) @ W_ih == embedded @ W_ih[:E]  (already in pre_ref[:, 4H:8H])
    #                               + a @ W_ih[E:]        (time-invariant, added once here).
    pre_a = jnp.dot(a.astype(bf16), wih_ta_ref[...],
                    preferred_element_type=f32)                          # (B, 4H)
    pre_st = pre_ref[:, pl.ds(H4, H4)].reshape(T, B, H4) + pre_a[None, :, :]
    pre_ref[:, pl.ds(H4, H4)] = pre_st.reshape(T * B, H4)

    whh_t = whh_t_ref[...]                                               # hoisted (H, 4H) bf16

    def stance_step(t, carry):
        h, c = carry
        row = t * B
        gates = pre_ref[pl.ds(row, B), pl.ds(H4, H4)] + jnp.dot(
            h.astype(bf16), whh_t, preferred_element_type=f32)
        h_new, c_new = lstm_cell(gates, c)
        hs_ref[pl.ds(row, B), :] = h_new
        return h_new, c_new

    # Stance LSTM is initialised with the sub phase's final (h, c) ("context").
    _ = jax.lax.fori_loop(0, T, stance_step, (h_T, c_T), unroll=min(T, 8))

    logits_st = jnp.dot(hs_ref[...].astype(bf16), wlt_ref[...],
                        preferred_element_type=f32) + blt_ref[...]       # (T*B, 128)
    y_stance_ref[...] = _log_softmax_rows(logits_st)


def two_phase_lstm_forward(x_ids, params):
    """x_ids: (seq_len, batch) int32 token ids. Returns (y_stance, y_sub), each (T, B, 3)."""
    T, B = x_ids.shape
    E = params["embedding"].shape[1]
    H = params["w_hh_s"].shape[0]
    f32, bf16 = jnp.float32, jnp.bfloat16

    # Sublane-align the batch (pad to a multiple of 8); padded columns are independent
    # per-batch everywhere (incl. the diagonal attention) and are sliced off at the end.
    B_pad = max(8, -(-B // 8) * 8)
    if B_pad != B:
        x_ids = jnp.pad(x_ids, ((0, 0), (0, B_pad - B)))

    # Embedding gather stays as JAX glue; MXU operands enter the kernel in bf16.
    emb_flat = params["embedding"][x_ids].reshape(T * B_pad, E).astype(bf16)

    def w(name):
        return params[name].astype(bf16)

    NEG = jnp.float32(-1e9)  # bias padding: padded class lanes vanish under log-softmax

    # Fused (sub | stance-embedded) input projection: (E, 8H).
    w_ih = jnp.concatenate([w("w_ih_s"), w("w_ih_t_e")], axis=1)
    b_ih = jnp.concatenate([params["b_s"], params["b_t"]], axis=1)

    # Fused hs_sub consumer: [sub head padded to 128 | K | V] -> (H, 128 + 2H).
    w_lin_s_pad = jnp.zeros((H, CPAD), f32).at[:, :3].set(params["w_lin_s"]).astype(bf16)
    b_lin_s_pad = jnp.full((1, CPAD), NEG, f32).at[:, :3].set(params["b_lin_s"])
    w_hs = jnp.concatenate([w_lin_s_pad, w("w_k"), w("w_v")], axis=1)
    b_hs = jnp.concatenate([b_lin_s_pad, params["b_k"], params["b_v"]], axis=1)

    # Stance head padded to 128 classes for an unmasked writeback.
    w_lin_t_pad = jnp.zeros((H, CPAD), f32).at[:, :3].set(params["w_lin_t"]).astype(bf16)
    b_lin_t_pad = jnp.full((1, CPAD), NEG, f32).at[:, :3].set(params["b_lin_t"])

    inputs = (
        emb_flat,
        w_ih, b_ih,
        w("w_hh_s"),
        w_hs, b_hs,
        w("w_q"), params["b_q"], w("w_o"), params["b_o"],
        w("w_ih_t_a"), w("w_hh_t"),
        w_lin_t_pad, b_lin_t_pad,
    )

    kernel = functools.partial(_two_phase_kernel, T, B_pad, H)

    y_sub_flat, y_st_flat = pl.pallas_call(
        kernel,
        out_shape=(jax.ShapeDtypeStruct((T * B_pad, CPAD), f32),
                   jax.ShapeDtypeStruct((T * B_pad, CPAD), f32)),
        grid_spec=pltpu.PrefetchScalarGridSpec(
            num_scalar_prefetch=0,
            grid=(1,),                       # whole problem in one kernel invocation
            in_specs=[pl.BlockSpec(a.shape, lambda i: (0, 0)) for a in inputs],
            out_specs=(pl.BlockSpec((T * B_pad, CPAD), lambda i: (0, 0)),
                       pl.BlockSpec((T * B_pad, CPAD), lambda i: (0, 0))),
            scratch_shapes=[
                pltpu.VMEM((T * B_pad, H), f32),        # hidden-state sequence (reused sub/stance)
                pltpu.VMEM((T * B_pad, 8 * H), f32),    # fused pre-activations (sub | stance)
            ],
        ),
        compiler_params=pltpu.CompilerParams(
            dimension_semantics=("arbitrary",),
            vmem_limit_bytes=32 * 1024 * 1024),
    )(*inputs)

    y_sub = y_sub_flat.reshape(T, B_pad, CPAD)[:, :B, :3]
    y_stance = y_st_flat.reshape(T, B_pad, CPAD)[:, :B, :3]
    return y_stance, y_sub


def make_params(key, vocab_dim, embedding_dim, h_dim):
    """Deterministic init; LSTM/attention/linear weights stored pre-transposed,
    LSTM b_ih + b_hh pre-combined, stance W_ih pre-split into (embedded | attention) rows."""
    E, H = embedding_dim, h_dim
    ks = jax.random.split(key, 21)
    bd = 1.0 / math.sqrt(H)

    def u(k, shape):
        return jax.random.uniform(k, shape, jnp.float32, -bd, bd)

    return {
        "embedding": jax.random.normal(ks[0], (vocab_dim, E), jnp.float32),
        # subjectivity LSTM
        "w_ih_s": u(ks[1], (E, 4 * H)),
        "w_hh_s": u(ks[2], (H, 4 * H)),
        "b_s": u(ks[3], (1, 4 * H)) + u(ks[4], (1, 4 * H)),
        "w_lin_s": u(ks[5], (H, 3)),
        "b_lin_s": u(ks[6], (1, 3)),
        # single-head attention (in_proj q/k/v + out_proj)
        "w_q": u(ks[7], (H, H)), "w_k": u(ks[8], (H, H)), "w_v": u(ks[9], (H, H)),
        "b_q": u(ks[10], (1, H)), "b_k": u(ks[11], (1, H)), "b_v": u(ks[12], (1, H)),
        "w_o": u(ks[13], (H, H)), "b_o": u(ks[14], (1, H)),
        # stance LSTM (input = concat(embedded, attention))
        "w_ih_t_e": u(ks[15], (E, 4 * H)),
        "w_ih_t_a": u(ks[16], (H, 4 * H)),
        "w_hh_t": u(ks[17], (H, 4 * H)),
        "b_t": u(ks[18], (1, 4 * H)),
        "w_lin_t": u(ks[19], (H, 3)),
        "b_lin_t": u(ks[20], (1, 3)),
    }


def reference_forward(x_ids, params):
    """Pure-JAX reference mirroring PyTorch TwoPhaseLSTM.forward (eval mode, n_layers=1)."""
    T, B = x_ids.shape
    H = params["w_hh_s"].shape[0]
    emb = params["embedding"][x_ids]                     # (T, B, E)

    def sigmoid(x):
        return 1.0 / (1.0 + jnp.exp(-x))

    def run_lstm(pre_seq, w_hh, h0, c0):
        def step(carry, pre_t):
            h, c = carry
            g = pre_t + h @ w_hh
            i = sigmoid(g[:, :H])
            f = sigmoid(g[:, H:2 * H])
            gg = jnp.tanh(g[:, 2 * H:3 * H])
            o = sigmoid(g[:, 3 * H:])
            c = f * c + i * gg
            h = o * jnp.tanh(c)
            return (h, c), h
        (hT, cT), hs = jax.lax.scan(step, (h0, c0), pre_seq)
        return hs, hT, cT

    zeros = jnp.zeros((B, H), jnp.float32)
    pre_sub = jnp.einsum("tbe,ef->tbf", emb, params["w_ih_s"]) + params["b_s"]
    hs_sub, hT, cT = run_lstm(pre_sub, params["w_hh_s"], zeros, zeros)
    y_sub = jax.nn.log_softmax(
        jnp.einsum("tbh,hc->tbc", hs_sub, params["w_lin_s"]) + params["b_lin_s"], axis=-1)

    qp = (hT @ params["w_q"] + params["b_q"]) / math.sqrt(H)
    kp = jnp.einsum("tbh,hk->tbk", hs_sub, params["w_k"]) + params["b_k"]
    vp = jnp.einsum("tbh,hk->tbk", hs_sub, params["w_v"]) + params["b_v"]
    scores = jnp.einsum("bk,tbk->tb", qp, kp)
    w = jax.nn.softmax(scores, axis=0)
    attn = jnp.einsum("tb,tbk->bk", w, vp)
    a = attn @ params["w_o"] + params["b_o"]             # (B, H)

    pre_st = (jnp.einsum("tbe,ef->tbf", emb, params["w_ih_t_e"])
              + (a @ params["w_ih_t_a"])[None, :, :] + params["b_t"])
    hs_st, _, _ = run_lstm(pre_st, params["w_hh_t"], hT, cT)
    y_stance = jax.nn.log_softmax(
        jnp.einsum("tbh,hc->tbc", hs_st, params["w_lin_t"]) + params["b_lin_t"], axis=-1)
    return y_stance, y_sub


if __name__ == "__main__":
    vocab_dim, embedding_dim, h_dim = 32, 16, 32
    seq_len, batch = 8, 4

    key = jax.random.PRNGKey(0)
    k_params, k_x = jax.random.split(key)
    params = make_params(k_params, vocab_dim, embedding_dim, h_dim)
    x_ids = jax.random.randint(k_x, (seq_len, batch), 0, vocab_dim, dtype=jnp.int32)

    y_stance, y_sub = two_phase_lstm_forward(x_ids, params)
    y_stance = jax.block_until_ready(y_stance)
    y_sub = jax.block_until_ready(y_sub)

    ref_stance, ref_sub = reference_forward(x_ids, params)
    ref_stance = jax.block_until_ready(ref_stance)
    ref_sub = jax.block_until_ready(ref_sub)

    assert y_stance.shape == (seq_len, batch, 3)
    assert y_sub.shape == (seq_len, batch, 3)

    err_st = float(jnp.max(jnp.abs(y_stance - ref_stance)))
    err_sub = float(jnp.max(jnp.abs(y_sub - ref_sub)))
    # bf16 MXU operands (per the perf review) => looser tolerance vs. the f32 reference.
    assert err_st < 1e-1, err_st
    assert err_sub < 1e-1, err_sub

    print("KERNEL_OK")
</pallas_src>

<mosaic_0001>
module attributes {stable_mosaic.version = 11 : i64} {
  func.func @_two_phase_kernel(%arg0: i32, %arg1: memref<64x16xbf16, #tpu.memory_space<vmem>>, %arg2: memref<16x256xbf16, #tpu.memory_space<vmem>>, %arg3: memref<1x256xf32, #tpu.memory_space<vmem>>, %arg4: memref<32x128xbf16, #tpu.memory_space<vmem>>, %arg5: memref<32x192xbf16, #tpu.memory_space<vmem>>, %arg6: memref<1x192xf32, #tpu.memory_space<vmem>>, %arg7: memref<32x32xbf16, #tpu.memory_space<vmem>>, %arg8: memref<1x32xf32, #tpu.memory_space<vmem>>, %arg9: memref<32x32xbf16, #tpu.memory_space<vmem>>, %arg10: memref<1x32xf32, #tpu.memory_space<vmem>>, %arg11: memref<32x128xbf16, #tpu.memory_space<vmem>>, %arg12: memref<32x128xbf16, #tpu.memory_space<vmem>>, %arg13: memref<32x128xbf16, #tpu.memory_space<vmem>>, %arg14: memref<1x128xf32, #tpu.memory_space<vmem>>, %arg15: memref<64x128xf32, #tpu.memory_space<vmem>>, %arg16: memref<64x128xf32, #tpu.memory_space<vmem>>, %arg17: memref<64x32xf32, #tpu.memory_space<vmem>>, %arg18: memref<64x256xf32, #tpu.memory_space<vmem>>) attributes {dimension_semantics = [#tpu.dimension_semantics<arbitrary>], iteration_bounds = array<i64: 1>, scalar_prefetch = 0 : i64, scratch_operands = 2 : i64, tpu.core_type = #tpu.core_type<tc>, window_params = [{pipeline_mode = #tpu.pipeline_mode<synchronous>, transform_indices = @transform_0, window_bounds = array<i64: 64, 16>}, {pipeline_mode = #tpu.pipeline_mode<synchronous>, transform_indices = @transform_1, window_bounds = array<i64: 16, 256>}, {pipeline_mode = #tpu.pipeline_mode<synchronous>, transform_indices = @transform_2, window_bounds = array<i64: 1, 256>}, {pipeline_mode = #tpu.pipeline_mode<synchronous>, transform_indices = @transform_3, window_bounds = array<i64: 32, 128>}, {pipeline_mode = #tpu.pipeline_mode<synchronous>, transform_indices = @transform_4, window_bounds = array<i64: 32, 192>}, {pipeline_mode = #tpu.pipeline_mode<synchronous>, transform_indices = @transform_5, window_bounds = array<i64: 1, 192>}, {pipeline_mode = #tpu.pipeline_mode<synchronous>, transform_indices = @transform_6, window_bounds = array<i64: 32, 32>}, {pipeline_mode = #tpu.pipeline_mode<synchronous>, transform_indices = @transform_7, window_bounds = array<i64: 1, 32>}, {pipeline_mode = #tpu.pipeline_mode<synchronous>, transform_indices = @transform_8, window_bounds = array<i64: 32, 32>}, {pipeline_mode = #tpu.pipeline_mode<synchronous>, transform_indices = @transform_9, window_bounds = array<i64: 1, 32>}, {pipeline_mode = #tpu.pipeline_mode<synchronous>, transform_indices = @transform_10, window_bounds = array<i64: 32, 128>}, {pipeline_mode = #tpu.pipeline_mode<synchronous>, transform_indices = @transform_11, window_bounds = array<i64: 32, 128>}, {pipeline_mode = #tpu.pipeline_mode<synchronous>, transform_indices = @transform_12, window_bounds = array<i64: 32, 128>}, {pipeline_mode = #tpu.pipeline_mode<synchronous>, transform_indices = @transform_13, window_bounds = array<i64: 1, 128>}, {pipeline_mode = #tpu.pipeline_mode<synchronous>, transform_indices = @transform_14, window_bounds = array<i64: 64, 128>}, {pipeline_mode = #tpu.pipeline_mode<synchronous>, transform_indices = @transform_15, window_bounds = array<i64: 64, 128>}]} {
    %c0 = arith.constant 0 : index
    %c0_0 = arith.constant 0 : index
    %0 = vector.load %arg1[%c0, %c0_0] : memref<64x16xbf16, #tpu.memory_space<vmem>>, vector<64x16xbf16>
    %c0_1 = arith.constant 0 : index
    %c0_2 = arith.constant 0 : index
    %1 = vector.load %arg2[%c0_1, %c0_2] : memref<16x256xbf16, #tpu.memory_space<vmem>>, vector<16x256xbf16>
    %cst = arith.constant dense<0.000000e+00> : vector<64x256xf32>
    %2 = tpu.matmul %0, %1, %cst {dimension_numbers = #tpu.dot_dimension_numbers<[1], [0], [0], [1], [0, 0, 1, 1], [], []>} : vector<64x16xbf16>, vector<16x256xbf16>, vector<64x256xf32> -> vector<64x256xf32>
    %c0_3 = arith.constant 0 : index
    %c0_4 = arith.constant 0 : index
    %3 = vector.load %arg3[%c0_3, %c0_4] : memref<1x256xf32, #tpu.memory_space<vmem>>, vector<1x256xf32>
    %4 = vector.broadcast %3 : vector<1x256xf32> to vector<64x256xf32>
    %5 = arith.addf %2, %4 : vector<64x256xf32>
    %c0_5 = arith.constant 0 : index
    %c0_6 = arith.constant 0 : index
    %6 = vector.load %arg18[%c0_5, %c0_6] : memref<64x256xf32, #tpu.memory_space<vmem>>, vector<64x256xf32>
    tpu.vector_store %arg18[%c0_5, %c0_6], %5 {strides = array<i32>} : memref<64x256xf32, #tpu.memory_space<vmem>>, vector<64x256xf32>,
    %c0_7 = arith.constant 0 : index
    %c0_8 = arith.constant 0 : index
    %7 = vector.load %arg4[%c0_7, %c0_8] : memref<32x128xbf16, #tpu.memory_space<vmem>>, vector<32x128xbf16>
    %cst_9 = arith.constant 0.000000e+00 : f32
    %8 = vector.broadcast %cst_9 : f32 to vector<8x32xf32>
    %c0_i32 = arith.constant 0 : i32
    %c8_i32 = arith.constant 8 : i32
    %9 = arith.muli %c0_i32, %c8_i32 : i32
    %10 = arith.index_cast %9 : i32 to index
    %c0_10 = arith.constant 0 : index
    %11 = vector.load %arg18[%10, %c0_10] : memref<64x256xf32, #tpu.memory_space<vmem>>, vector<8x128xf32>
    %12 = arith.truncf %8 : vector<8x32xf32> to vector<8x32xbf16>
    %cst_11 = arith.constant dense<0.000000e+00> : vector<8x128xf32>
    %13 = tpu.matmul %12, %7, %cst_11 {dimension_numbers = #tpu.dot_dimension_numbers<[1], [0], [0], [1], [0, 0, 1, 1], [], []>} : vector<8x32xbf16>, vector<32x128xbf16>, vector<8x128xf32> -> vector<8x128xf32>
    %14 = arith.addf %11, %13 : vector<8x128xf32>
    %15 = vector.extract_strided_slice %14 {offsets = [0, 0], sizes = [8, 32], strides = [1, 1]} : vector<8x128xf32> to vector<8x32xf32>
    %cst_12 = arith.constant 5.000000e-01 : f32
    %16 = vector.broadcast %cst_12 : f32 to vector<8x32xf32>
    %17 = arith.mulf %16, %15 : vector<8x32xf32>
    %18 = math.tanh %17 : vector<8x32xf32>
    %cst_13 = arith.constant 5.000000e-01 : f32
    %19 = vector.broadcast %cst_13 : f32 to vector<8x32xf32>
    %20 = arith.mulf %19, %18 : vector<8x32xf32>
    %cst_14 = arith.constant 5.000000e-01 : f32
    %21 = vector.broadcast %cst_14 : f32 to vector<8x32xf32>
    %22 = arith.addf %20, %21 : vector<8x32xf32>
    %23 = vector.extract_strided_slice %14 {offsets = [0, 32], sizes = [8, 32], strides = [1, 1]} : vector<8x128xf32> to vector<8x32xf32>
    %cst_15 = arith.constant 5.000000e-01 : f32
    %24 = vector.broadcast %cst_15 : f32 to vector<8x32xf32>
    %25 = arith.mulf %24, %23 : vector<8x32xf32>
    %26 = math.tanh %25 : vector<8x32xf32>
    %cst_16 = arith.constant 5.000000e-01 : f32
    %27 = vector.broadcast %cst_16 : f32 to vector<8x32xf32>
    %28 = arith.mulf %27, %26 : vector<8x32xf32>
    %cst_17 = arith.constant 5.000000e-01 : f32
    %29 = vector.broadcast %cst_17 : f32 to vector<8x32xf32>
    %30 = arith.addf %28, %29 : vector<8x32xf32>
    %31 = vector.extract_strided_slice %14 {offsets = [0, 64], sizes = [8, 32], strides = [1, 1]} : vector<8x128xf32> to vector<8x32xf32>
    %32 = math.tanh %31 : vector<8x32xf32>
    %33 = vector.extract_strided_slice %14 {offsets = [0, 96], sizes = [8, 32], strides = [1, 1]} : vector<8x128xf32> to vector<8x32xf32>
    %cst_18 = arith.constant 5.000000e-01 : f32
    %34 = vector.broadcast %cst_18 : f32 to vector<8x32xf32>
    %35 = arith.mulf %34, %33 : vector<8x32xf32>
    %36 = math.tanh %35 : vector<8x32xf32>
    %cst_19 = arith.constant 5.000000e-01 : f32
    %37 = vector.broadcast %cst_19 : f32 to vector<8x32xf32>
    %38 = arith.mulf %37, %36 : vector<8x32xf32>
    %cst_20 = arith.constant 5.000000e-01 : f32
    %39 = vector.broadcast %cst_20 : f32 to vector<8x32xf32>
    %40 = arith.addf %38, %39 : vector<8x32xf32>
    %41 = arith.mulf %30, %8 : vector<8x32xf32>
    %42 = arith.mulf %22, %32 : vector<8x32xf32>
    %43 = arith.addf %41, %42 : vector<8x32xf32>
    %44 = math.tanh %43 : vector<8x32xf32>
    %45 = arith.mulf %40, %44 : vector<8x32xf32>
    %46 = arith.index_cast %9 : i32 to index
    %c0_21 = arith.constant 0 : index
    %47 = vector.load %arg17[%46, %c0_21] : memref<64x32xf32, #tpu.memory_space<vmem>>, vector<8x32xf32>
    tpu.vector_store %arg17[%46, %c0_21], %45 {strides = array<i32>} : memref<64x32xf32, #tpu.memory_space<vmem>>, vector<8x32xf32>,
    %c1_i32 = arith.constant 1 : i32
    %c8_i32_22 = arith.constant 8 : i32
    %48 = arith.muli %c1_i32, %c8_i32_22 : i32
    %49 = arith.index_cast %48 : i32 to index
    %c0_23 = arith.constant 0 : index
    %50 = vector.load %arg18[%49, %c0_23] : memref<64x256xf32, #tpu.memory_space<vmem>>, vector<8x128xf32>
    %51 = arith.truncf %45 : vector<8x32xf32> to vector<8x32xbf16>
    %cst_24 = arith.constant dense<0.000000e+00> : vector<8x128xf32>
    %52 = tpu.matmul %51, %7, %cst_24 {dimension_numbers = #tpu.dot_dimension_numbers<[1], [0], [0], [1], [0, 0, 1, 1], [], []>} : vector<8x32xbf16>, vector<32x128xbf16>, vector<8x128xf32> -> vector<8x128xf32>
    %53 = arith.addf %50, %52 : vector<8x128xf32>
    %54 = vector.extract_strided_slice %53 {offsets = [0, 0], sizes = [8, 32], strides = [1, 1]} : vector<8x128xf32> to vector<8x32xf32>
    %cst_25 = arith.constant 5.000000e-01 : f32
    %55 = vector.broadcast %cst_25 : f32 to vector<8x32xf32>
    %56 = arith.mulf %55, %54 : vector<8x32xf32>
    %57 = math.tanh %56 : vector<8x32xf32>
    %cst_26 = arith.constant 5.000000e-01 : f32
    %58 = vector.broadcast %cst_26 : f32 to vector<8x32xf32>
    %59 = arith.mulf %58, %57 : vector<8x32xf32>
    %cst_27 = arith.constant 5.000000e-01 : f32
    %60 = vector.broadcast %cst_27 : f32 to vector<8x32xf32>
    %61 = arith.addf %59, %60 : vector<8x32xf32>
    %62 = vector.extract_strided_slice %53 {offsets = [0, 32], sizes = [8, 32], strides = [1, 1]} : vector<8x128xf32> to vector<8x32xf32>
    %cst_28 = arith.constant 5.000000e-01 : f32
    %63 = vector.broadcast %cst_28 : f32 to vector<8x32xf32>
    %64 = arith.mulf %63, %62 : vector<8x32xf32>
    %65 = math.tanh %64 : vector<8x32xf32>
    %cst_29 = arith.constant 5.000000e-01 : f32
    %66 = vector.broadcast %cst_29 : f32 to vector<8x32xf32>
    %67 = arith.mulf %66, %65 : vector<8x32xf32>
    %cst_30 = arith.constant 5.000000e-01 : f32
    %68 = vector.broadcast %cst_30 : f32 to vector<8x32xf32>
    %69 = arith.addf %67, %68 : vector<8x32xf32>
    %70 = vector.extract_strided_slice %53 {offsets = [0, 64], sizes = [8, 32], strides = [1, 1]} : vector<8x128xf32> to vector<8x32xf32>
    %71 = math.tanh %70 : vector<8x32xf32>
    %72 = vector.extract_strided_slice %53 {offsets = [0, 96], sizes = [8, 32], strides = [1, 1]} : vector<8x128xf32> to vector<8x32xf32>
    %cst_31 = arith.constant 5.000000e-01 : f32
    %73 = vector.broadcast %cst_31 : f32 to vector<8x32xf32>
    %74 = arith.mulf %73, %72 : vector<8x32xf32>
    %75 = math.tanh %74 : vector<8x32xf32>
    %cst_32 = arith.constant 5.000000e-01 : f32
    %76 = vector.broadcast %cst_32 : f32 to vector<8x32xf32>
    %77 = arith.mulf %76, %75 : vector<8x32xf32>
    %cst_33 = arith.constant 5.000000e-01 : f32
    %78 = vector.broadcast %cst_33 : f32 to vector<8x32xf32>
    %79 = arith.addf %77, %78 : vector<8x32xf32>
    %80 = arith.mulf %69, %43 : vector<8x32xf32>
    %81 = arith.mulf %61, %71 : vector<8x32xf32>
    %82 = arith.addf %80, %81 : vector<8x32xf32>
    %83 = math.tanh %82 : vector<8x32xf32>
    %84 = arith.mulf %79, %83 : vector<8x32xf32>
    %85 = arith.index_cast %48 : i32 to index
    %c0_34 = arith.constant 0 : index
    %86 = vector.load %arg17[%85, %c0_34] : memref<64x32xf32, #tpu.memory_space<vmem>>, vector<8x32xf32>
    tpu.vector_store %arg17[%85, %c0_34], %84 {strides = array<i32>} : memref<64x32xf32, #tpu.memory_space<vmem>>, vector<8x32xf32>,
    %c2_i32 = arith.constant 2 : i32
    %c8_i32_35 = arith.constant 8 : i32
    %87 = arith.muli %c2_i32, %c8_i32_35 : i32
    %88 = arith.index_cast %87 : i32 to index
    %c0_36 = arith.constant 0 : index
    %89 = vector.load %arg18[%88, %c0_36] : memref<64x256xf32, #tpu.memory_space<vmem>>, vector<8x128xf32>
    %90 = arith.truncf %84 : vector<8x32xf32> to vector<8x32xbf16>
    %cst_37 = arith.constant dense<0.000000e+00> : vector<8x128xf32>
    %91 = tpu.matmul %90, %7, %cst_37 {dimension_numbers = #tpu.dot_dimension_numbers<[1], [0], [0], [1], [0, 0, 1, 1], [], []>} : vector<8x32xbf16>, vector<32x128xbf16>, vector<8x128xf32> -> vector<8x128xf32>
    %92 = arith.addf %89, %91 : vector<8x128xf32>
    %93 = vector.extract_strided_slice %92 {offsets = [0, 0], sizes = [8, 32], strides = [1, 1]} : vector<8x128xf32> to vector<8x32xf32>
    %cst_38 = arith.constant 5.000000e-01 : f32
    %94 = vector.broadcast %cst_38 : f32 to vector<8x32xf32>
    %95 = arith.mulf %94, %93 : vector<8x32xf32>
    %96 = math.tanh %95 : vector<8x32xf32>
    %cst_39 = arith.constant 5.000000e-01 : f32
    %97 = vector.broadcast %cst_39 : f32 to vector<8x32xf32>
    %98 = arith.mulf %97, %96 : vector<8x32xf32>
    %cst_40 = arith.constant 5.000000e-01 : f32
    %99 = vector.broadcast %cst_40 : f32 to vector<8x32xf32>
    %100 = arith.addf %98, %99 : vector<8x32xf32>
    %101 = vector.extract_strided_slice %92 {offsets = [0, 32], sizes = [8, 32], strides = [1, 1]} : vector<8x128xf32> to vector<8x32xf32>
    %cst_41 = arith.constant 5.000000e-01 : f32
    %102 = vector.broadcast %cst_41 : f32 to vector<8x32xf32>
    %103 = arith.mulf %102, %101 : vector<8x32xf32>
    %104 = math.tanh %103 : vector<8x32xf32>
    %cst_42 = arith.constant 5.000000e-01 : f32
    %105 = vector.broadcast %cst_42 : f32 to vector<8x32xf32>
    %106 = arith.mulf %105, %104 : vector<8x32xf32>
    %cst_43 = arith.constant 5.000000e-01 : f32
    %107 = vector.broadcast %cst_43 : f32 to vector<8x32xf32>
    %108 = arith.addf %106, %107 : vector<8x32xf32>
    %109 = vector.extract_strided_slice %92 {offsets = [0, 64], sizes = [8, 32], strides = [1, 1]} : vector<8x128xf32> to vector<8x32xf32>
    %110 = math.tanh %109 : vector<8x32xf32>
    %111 = vector.extract_strided_slice %92 {offsets = [0, 96], sizes = [8, 32], strides = [1, 1]} : vector<8x128xf32> to vector<8x32xf32>
    %cst_44 = arith.constant 5.000000e-01 : f32
    %112 = vector.broadcast %cst_44 : f32 to vector<8x32xf32>
    %113 = arith.mulf %112, %111 : vector<8x32xf32>
    %114 = math.tanh %113 : vector<8x32xf32>
    %cst_45 = arith.constant 5.000000e-01 : f32
    %115 = vector.broadcast %cst_45 : f32 to vector<8x32xf32>
    %116 = arith.mulf %115, %114 : vector<8x32xf32>
    %cst_46 = arith.constant 5.000000e-01 : f32
    %117 = vector.broadcast %cst_46 : f32 to vector<8x32xf32>
    %118 = arith.addf %116, %117 : vector<8x32xf32>
    %119 = arith.mulf %108, %82 : vector<8x32xf32>
    %120 = arith.mulf %100, %110 : vector<8x32xf32>
    %121 = arith.addf %119, %120 : vector<8x32xf32>
    %122 = math.tanh %121 : vector<8x32xf32>
    %123 = arith.mulf %118, %122 : vector<8x32xf32>
    %124 = arith.index_cast %87 : i32 to index
    %c0_47 = arith.constant 0 : index
    %125 = vector.load %arg17[%124, %c0_47] : memref<64x32xf32, #tpu.memory_space<vmem>>, vector<8x32xf32>
    tpu.vector_store %arg17[%124, %c0_47], %123 {strides = array<i32>} : memref<64x32xf32, #tpu.memory_space<vmem>>, vector<8x32xf32>,
    %c3_i32 = arith.constant 3 : i32
    %c8_i32_48 = arith.constant 8 : i32
    %126 = arith.muli %c3_i32, %c8_i32_48 : i32
    %127 = arith.index_cast %126 : i32 to index
    %c0_49 = arith.constant 0 : index
    %128 = vector.load %arg18[%127, %c0_49] : memref<64x256xf32, #tpu.memory_space<vmem>>, vector<8x128xf32>
    %129 = arith.truncf %123 : vector<8x32xf32> to vector<8x32xbf16>
    %cst_50 = arith.constant dense<0.000000e+00> : vector<8x128xf32>
    %130 = tpu.matmul %129, %7, %cst_50 {dimension_numbers = #tpu.dot_dimension_numbers<[1], [0], [0], [1], [0, 0, 1, 1], [], []>} : vector<8x32xbf16>, vector<32x128xbf16>, vector<8x128xf32> -> vector<8x128xf32>
    %131 = arith.addf %128, %130 : vector<8x128xf32>
    %132 = vector.extract_strided_slice %131 {offsets = [0, 0], sizes = [8, 32], strides = [1, 1]} : vector<8x128xf32> to vector<8x32xf32>
    %cst_51 = arith.constant 5.000000e-01 : f32
    %133 = vector.broadcast %cst_51 : f32 to vector<8x32xf32>
    %134 = arith.mulf %133, %132 : vector<8x32xf32>
    %135 = math.tanh %134 : vector<8x32xf32>
    %cst_52 = arith.constant 5.000000e-01 : f32
    %136 = vector.broadcast %cst_52 : f32 to vector<8x32xf32>
    %137 = arith.mulf %136, %135 : vector<8x32xf32>
    %cst_53 = arith.constant 5.000000e-01 : f32
    %138 = vector.broadcast %cst_53 : f32 to vector<8x32xf32>
    %139 = arith.addf %137, %138 : vector<8x32xf32>
    %140 = vector.extract_strided_slice %131 {offsets = [0, 32], sizes = [8, 32], strides = [1, 1]} : vector<8x128xf32> to vector<8x32xf32>
    %cst_54 = arith.constant 5.000000e-01 : f32
    %141 = vector.broadcast %cst_54 : f32 to vector<8x32xf32>
    %142 = arith.mulf %141, %140 : vector<8x32xf32>
    %143 = math.tanh %142 : vector<8x32xf32>
    %cst_55 = arith.constant 5.000000e-01 : f32
    %144 = vector.broadcast %cst_55 : f32 to vector<8x32xf32>
    %145 = arith.mulf %144, %143 : vector<8x32xf32>
    %cst_56 = arith.constant 5.000000e-01 : f32
    %146 = vector.broadcast %cst_56 : f32 to vector<8x32xf32>
    %147 = arith.addf %145, %146 : vector<8x32xf32>
    %148 = vector.extract_strided_slice %131 {offsets = [0, 64], sizes = [8, 32], strides = [1, 1]} : vector<8x128xf32> to vector<8x32xf32>
    %149 = math.tanh %148 : vector<8x32xf32>
    %150 = vector.extract_strided_slice %131 {offsets = [0, 96], sizes = [8, 32], strides = [1, 1]} : vector<8x128xf32> to vector<8x32xf32>
    %cst_57 = arith.constant 5.000000e-01 : f32
    %151 = vector.broadcast %cst_57 : f32 to vector<8x32xf32>
    %152 = arith.mulf %151, %150 : vector<8x32xf32>
    %153 = math.tanh %152 : vector<8x32xf32>
    %cst_58 = arith.constant 5.000000e-01 : f32
    %154 = vector.broadcast %cst_58 : f32 to vector<8x32xf32>
    %155 = arith.mulf %154, %153 : vector<8x32xf32>
    %cst_59 = arith.constant 5.000000e-01 : f32
    %156 = vector.broadcast %cst_59 : f32 to vector<8x32xf32>
    %157 = arith.addf %155, %156 : vector<8x32xf32>
    %158 = arith.mulf %147, %121 : vector<8x32xf32>
    %159 = arith.mulf %139, %149 : vector<8x32xf32>
    %160 = arith.addf %158, %159 : vector<8x32xf32>
    %161 = math.tanh %160 : vector<8x32xf32>
    %162 = arith.mulf %157, %161 : vector<8x32xf32>
    %163 = arith.index_cast %126 : i32 to index
    %c0_60 = arith.constant 0 : index
    %164 = vector.load %arg17[%163, %c0_60] : memref<64x32xf32, #tpu.memory_space<vmem>>, vector<8x32xf32>
    tpu.vector_store %arg17[%163, %c0_60], %162 {strides = array<i32>} : memref<64x32xf32, #tpu.memory_space<vmem>>, vector<8x32xf32>,
    %c4_i32 = arith.constant 4 : i32
    %c8_i32_61 = arith.constant 8 : i32
    %165 = arith.muli %c4_i32, %c8_i32_61 : i32
    %166 = arith.index_cast %165 : i32 to index
    %c0_62 = arith.constant 0 : index
    %167 = vector.load %arg18[%166, %c0_62] : memref<64x256xf32, #tpu.memory_space<vmem>>, vector<8x128xf32>
    %168 = arith.truncf %162 : vector<8x32xf32> to vector<8x32xbf16>
    %cst_63 = arith.constant dense<0.000000e+00> : vector<8x128xf32>
    %169 = tpu.matmul %168, %7, %cst_63 {dimension_numbers = #tpu.dot_dimension_numbers<[1], [0], [0], [1], [0, 0, 1, 1], [], []>} : vector<8x32xbf16>, vector<32x128xbf16>, vector<8x128xf32> -> vector<8x128xf32>
    %170 = arith.addf %167, %169 : vector<8x128xf32>
    %171 = vector.extract_strided_slice %170 {offsets = [0, 0], sizes = [8, 32], strides = [1, 1]} : vector<8x128xf32> to vector<8x32xf32>
    %cst_64 = arith.constant 5.000000e-01 : f32
    %172 = vector.broadcast %cst_64 : f32 to vector<8x32xf32>
    %173 = arith.mulf %172, %171 : vector<8x32xf32>
    %174 = math.tanh %173 : vector<8x32xf32>
    %cst_65 = arith.constant 5.000000e-01 : f32
    %175 = vector.broadcast %cst_65 : f32 to vector<8x32xf32>
    %176 = arith.mulf %175, %174 : vector<8x32xf32>
    %cst_66 = arith.constant 5.000000e-01 : f32
    %177 = vector.broadcast %cst_66 : f32 to vector<8x32xf32>
    %178 = arith.addf %176, %177 : vector<8x32xf32>
    %179 = vector.extract_strided_slice %170 {offsets = [0, 32], sizes = [8, 32], strides = [1, 1]} : vector<8x128xf32> to vector<8x32xf32>
    %cst_67 = arith.constant 5.000000e-01 : f32
    %180 = vector.broadcast %cst_67 : f32 to vector<8x32xf32>
    %181 = arith.mulf %180, %179 : vector<8x32xf32>
    %182 = math.tanh %181 : vector<8x32xf32>
    %cst_68 = arith.constant 5.000000e-01 : f32
    %183 = vector.broadcast %cst_68 : f32 to vector<8x32xf32>
    %184 = arith.mulf %183, %182 : vector<8x32xf32>
    %cst_69 = arith.constant 5.000000e-01 : f32
    %185 = vector.broadcast %cst_69 : f32 to vector<8x32xf32>
    %186 = arith.addf %184, %185 : vector<8x32xf32>
    %187 = vector.extract_strided_slice %170 {offsets = [0, 64], sizes = [8, 32], strides = [1, 1]} : vector<8x128xf32> to vector<8x32xf32>
    %188 = math.tanh %187 : vector<8x32xf32>
    %189 = vector.extract_strided_slice %170 {offsets = [0, 96], sizes = [8, 32], strides = [1, 1]} : vector<8x128xf32> to vector<8x32xf32>
    %cst_70 = arith.constant 5.000000e-01 : f32
    %190 = vector.broadcast %cst_70 : f32 to vector<8x32xf32>
    %191 = arith.mulf %190, %189 : vector<8x32xf32>
    %192 = math.tanh %191 : vector<8x32xf32>
    %cst_71 = arith.constant 5.000000e-01 : f32
    %193 = vector.broadcast %cst_71 : f32 to vector<8x32xf32>
    %194 = arith.mulf %193, %192 : vector<8x32xf32>
    %cst_72 = arith.constant 5.000000e-01 : f32
    %195 = vector.broadcast %cst_72 : f32 to vector<8x32xf32>
    %196 = arith.addf %194, %195 : vector<8x32xf32>
    %197 = arith.mulf %186, %160 : vector<8x32xf32>
    %198 = arith.mulf %178, %188 : vector<8x32xf32>
    %199 = arith.addf %197, %198 : vector<8x32xf32>
    %200 = math.tanh %199 : vector<8x32xf32>
    %201 = arith.mulf %196, %200 : vector<8x32xf32>
    %202 = arith.index_cast %165 : i32 to index
    %c0_73 = arith.constant 0 : index
    %203 = vector.load %arg17[%202, %c0_73] : memref<64x32xf32, #tpu.memory_space<vmem>>, vector<8x32xf32>
    tpu.vector_store %arg17[%202, %c0_73], %201 {strides = array<i32>} : memref<64x32xf32, #tpu.memory_space<vmem>>, vector<8x32xf32>,
    %c5_i32 = arith.constant 5 : i32
    %c8_i32_74 = arith.constant 8 : i32
    %204 = arith.muli %c5_i32, %c8_i32_74 : i32
    %205 = arith.index_cast %204 : i32 to index
    %c0_75 = arith.constant 0 : index
    %206 = vector.load %arg18[%205, %c0_75] : memref<64x256xf32, #tpu.memory_space<vmem>>, vector<8x128xf32>
    %207 = arith.truncf %201 : vector<8x32xf32> to vector<8x32xbf16>
    %cst_76 = arith.constant dense<0.000000e+00> : vector<8x128xf32>
    %208 = tpu.matmul %207, %7, %cst_76 {dimension_numbers = #tpu.dot_dimension_numbers<[1], [0], [0], [1], [0, 0, 1, 1], [], []>} : vector<8x32xbf16>, vector<32x128xbf16>, vector<8x128xf32> -> vector<8x128xf32>
    %209 = arith.addf %206, %208 : vector<8x128xf32>
    %210 = vector.extract_strided_slice %209 {offsets = [0, 0], sizes = [8, 32], strides = [1, 1]} : vector<8x128xf32> to vector<8x32xf32>
    %cst_77 = arith.constant 5.000000e-01 : f32
    %211 = vector.broadcast %cst_77 : f32 to vector<8x32xf32>
    %212 = arith.mulf %211, %210 : vector<8x32xf32>
    %213 = math.tanh %212 : vector<8x32xf32>
    %cst_78 = arith.constant 5.000000e-01 : f32
    %214 = vector.broadcast %cst_78 : f32 to vector<8x32xf32>
    %215 = arith.mulf %214, %213 : vector<8x32xf32>
    %cst_79 = arith.constant 5.000000e-01 : f32
    %216 = vector.broadcast %cst_79 : f32 to vector<8x32xf32>
    %217 = arith.addf %215, %216 : vector<8x32xf32>
    %218 = vector.extract_strided_slice %209 {offsets = [0, 32], sizes = [8, 32], strides = [1, 1]} : vector<8x128xf32> to vector<8x32xf32>
    %cst_80 = arith.constant 5.000000e-01 : f32
    %219 = vector.broadcast %cst_80 : f32 to vector<8x32xf32>
    %220 = arith.mulf %219, %218 : vector<8x32xf32>
    %221 = math.tanh %220 : vector<8x32xf32>
    %cst_81 = arith.constant 5.000000e-01 : f32
    %222 = vector.broadcast %cst_81 : f32 to vector<8x32xf32>
    %223 = arith.mulf %222, %221 : vector<8x32xf32>
    %cst_82 = arith.constant 5.000000e-01 : f32
    %224 = vector.broadcast %cst_82 : f32 to vector<8x32xf32>
    %225 = arith.addf %223, %224 : vector<8x32xf32>
    %226 = vector.extract_strided_slice %209 {offsets = [0, 64], sizes = [8, 32], strides = [1, 1]} : vector<8x128xf32> to vector<8x32xf32>
    %227 = math.tanh %226 : vector<8x32xf32>
    %228 = vector.extract_strided_slice %209 {offsets = [0, 96], sizes = [8, 32], strides = [1, 1]} : vector<8x128xf32> to vector<8x32xf32>
    %cst_83 = arith.constant 5.000000e-01 : f32
    %229 = vector.broadcast %cst_83 : f32 to vector<8x32xf32>
    %230 = arith.mulf %229, %228 : vector<8x32xf32>
    %231 = math.tanh %230 : vector<8x32xf32>
    %cst_84 = arith.constant 5.000000e-01 : f32
    %232 = vector.broadcast %cst_84 : f32 to vector<8x32xf32>
    %233 = arith.mulf %232, %231 : vector<8x32xf32>
    %cst_85 = arith.constant 5.000000e-01 : f32
    %234 = vector.broadcast %cst_85 : f32 to vector<8x32xf32>
    %235 = arith.addf %233, %234 : vector<8x32xf32>
    %236 = arith.mulf %225, %199 : vector<8x32xf32>
    %237 = arith.mulf %217, %227 : vector<8x32xf32>
    %238 = arith.addf %236, %237 : vector<8x32xf32>
    %239 = math.tanh %238 : vector<8x32xf32>
    %240 = arith.mulf %235, %239 : vector<8x32xf32>
    %241 = arith.index_cast %204 : i32 to index
    %c0_86 = arith.constant 0 : index
    %242 = vector.load %arg17[%241, %c0_86] : memref<64x32xf32, #tpu.memory_space<vmem>>, vector<8x32xf32>
    tpu.vector_store %arg17[%241, %c0_86], %240 {strides = array<i32>} : memref<64x32xf32, #tpu.memory_space<vmem>>, vector<8x32xf32>,
    %c6_i32 = arith.constant 6 : i32
    %c8_i32_87 = arith.constant 8 : i32
    %243 = arith.muli %c6_i32, %c8_i32_87 : i32
    %244 = arith.index_cast %243 : i32 to index
    %c0_88 = arith.constant 0 : index
    %245 = vector.load %arg18[%244, %c0_88] : memref<64x256xf32, #tpu.memory_space<vmem>>, vector<8x128xf32>
    %246 = arith.truncf %240 : vector<8x32xf32> to vector<8x32xbf16>
    %cst_89 = arith.constant dense<0.000000e+00> : vector<8x128xf32>
    %247 = tpu.matmul %246, %7, %cst_89 {dimension_numbers = #tpu.dot_dimension_numbers<[1], [0], [0], [1], [0, 0, 1, 1], [], []>} : vector<8x32xbf16>, vector<32x128xbf16>, vector<8x128xf32> -> vector<8x128xf32>
    %248 = arith.addf %245, %247 : vector<8x128xf32>
    %249 = vector.extract_strided_slice %248 {offsets = [0, 0], sizes = [8, 32], strides = [1, 1]} : vector<8x128xf32> to vector<8x32xf32>
    %cst_90 = arith.constant 5.000000e-01 : f32
    %250 = vector.broadcast %cst_90 : f32 to vector<8x32xf32>
    %251 = arith.mulf %250, %249 : vector<8x32xf32>
    %252 = math.tanh %251 : vector<8x32xf32>
    %cst_91 = arith.constant 5.000000e-01 : f32
    %253 = vector.broadcast %cst_91 : f32 to vector<8x32xf32>
    %254 = arith.mulf %253, %252 : vector<8x32xf32>
    %cst_92 = arith.constant 5.000000e-01 : f32
    %255 = vector.broadcast %cst_92 : f32 to vector<8x32xf32>
    %256 = arith.addf %254, %255 : vector<8x32xf32>
    %257 = vector.extract_strided_slice %248 {offsets = [0, 32], sizes = [8, 32], strides = [1, 1]} : vector<8x128xf32> to vector<8x32xf32>
    %cst_93 = arith.constant 5.000000e-01 : f32
    %258 = vector.broadcast %cst_93 : f32 to vector<8x32xf32>
    %259 = arith.mulf %258, %257 : vector<8x32xf32>
    %260 = math.tanh %259 : vector<8x32xf32>
    %cst_94 = arith.constant 5.000000e-01 : f32
    %261 = vector.broadcast %cst_94 : f32 to vector<8x32xf32>
    %262 = arith.mulf %261, %260 : vector<8x32xf32>
    %cst_95 = arith.constant 5.000000e-01 : f32
    %263 = vector.broadcast %cst_95 : f32 to vector<8x32xf32>
    %264 = arith.addf %262, %263 : vector<8x32xf32>
    %265 = vector.extract_strided_slice %248 {offsets = [0, 64], sizes = [8, 32], strides = [1, 1]} : vector<8x128xf32> to vector<8x32xf32>
    %266 = math.tanh %265 : vector<8x32xf32>
    %267 = vector.extract_strided_slice %248 {offsets = [0, 96], sizes = [8, 32], strides = [1, 1]} : vector<8x128xf32> to vector<8x32xf32>
    %cst_96 = arith.constant 5.000000e-01 : f32
    %268 = vector.broadcast %cst_96 : f32 to vector<8x32xf32>
    %269 = arith.mulf %268, %267 : vector<8x32xf32>
    %270 = math.tanh %269 : vector<8x32xf32>
    %cst_97 = arith.constant 5.000000e-01 : f32
    %271 = vector.broadcast %cst_97 : f32 to vector<8x32xf32>
    %272 = arith.mulf %271, %270 : vector<8x32xf32>
    %cst_98 = arith.constant 5.000000e-01 : f32
    %273 = vector.broadcast %cst_98 : f32 to vector<8x32xf32>
    %274 = arith.addf %272, %273 : vector<8x32xf32>
    %275 = arith.mulf %264, %238 : vector<8x32xf32>
    %276 = arith.mulf %256, %266 : vector<8x32xf32>
    %277 = arith.addf %275, %276 : vector<8x32xf32>
    %278 = math.tanh %277 : vector<8x32xf32>
    %279 = arith.mulf %274, %278 : vector<8x32xf32>
    %280 = arith.index_cast %243 : i32 to index
    %c0_99 = arith.constant 0 : index
    %281 = vector.load %arg17[%280, %c0_99] : memref<64x32xf32, #tpu.memory_space<vmem>>, vector<8x32xf32>
    tpu.vector_store %arg17[%280, %c0_99], %279 {strides = array<i32>} : memref<64x32xf32, #tpu.memory_space<vmem>>, vector<8x32xf32>,
    %c7_i32 = arith.constant 7 : i32
    %c8_i32_100 = arith.constant 8 : i32
    %282 = arith.muli %c7_i32, %c8_i32_100 : i32
    %283 = arith.index_cast %282 : i32 to index
    %c0_101 = arith.constant 0 : index
    %284 = vector.load %arg18[%283, %c0_101] : memref<64x256xf32, #tpu.memory_space<vmem>>, vector<8x128xf32>
    %285 = arith.truncf %279 : vector<8x32xf32> to vector<8x32xbf16>
    %cst_102 = arith.constant dense<0.000000e+00> : vector<8x128xf32>
    %286 = tpu.matmul %285, %7, %cst_102 {dimension_numbers = #tpu.dot_dimension_numbers<[1], [0], [0], [1], [0, 0, 1, 1], [], []>} : vector<8x32xbf16>, vector<32x128xbf16>, vector<8x128xf32> -> vector<8x128xf32>
    %287 = arith.addf %284, %286 : vector<8x128xf32>
    %288 = vector.extract_strided_slice %287 {offsets = [0, 0], sizes = [8, 32], strides = [1, 1]} : vector<8x128xf32> to vector<8x32xf32>
    %cst_103 = arith.constant 5.000000e-01 : f32
    %289 = vector.broadcast %cst_103 : f32 to vector<8x32xf32>
    %290 = arith.mulf %289, %288 : vector<8x32xf32>
    %291 = math.tanh %290 : vector<8x32xf32>
    %cst_104 = arith.constant 5.000000e-01 : f32
    %292 = vector.broadcast %cst_104 : f32 to vector<8x32xf32>
    %293 = arith.mulf %292, %291 : vector<8x32xf32>
    %cst_105 = arith.constant 5.000000e-01 : f32
    %294 = vector.broadcast %cst_105 : f32 to vector<8x32xf32>
    %295 = arith.addf %293, %294 : vector<8x32xf32>
    %296 = vector.extract_strided_slice %287 {offsets = [0, 32], sizes = [8, 32], strides = [1, 1]} : vector<8x128xf32> to vector<8x32xf32>
    %cst_106 = arith.constant 5.000000e-01 : f32
    %297 = vector.broadcast %cst_106 : f32 to vector<8x32xf32>
    %298 = arith.mulf %297, %296 : vector<8x32xf32>
    %299 = math.tanh %298 : vector<8x32xf32>
    %cst_107 = arith.constant 5.000000e-01 : f32
    %300 = vector.broadcast %cst_107 : f32 to vector<8x32xf32>
    %301 = arith.mulf %300, %299 : vector<8x32xf32>
    %cst_108 = arith.constant 5.000000e-01 : f32
    %302 = vector.broadcast %cst_108 : f32 to vector<8x32xf32>
    %303 = arith.addf %301, %302 : vector<8x32xf32>
    %304 = vector.extract_strided_slice %287 {offsets = [0, 64], sizes = [8, 32], strides = [1, 1]} : vector<8x128xf32> to vector<8x32xf32>
    %305 = math.tanh %304 : vector<8x32xf32>
    %306 = vector.extract_strided_slice %287 {offsets = [0, 96], sizes = [8, 32], strides = [1, 1]} : vector<8x128xf32> to vector<8x32xf32>
    %cst_109 = arith.constant 5.000000e-01 : f32
    %307 = vector.broadcast %cst_109 : f32 to vector<8x32xf32>
    %308 = arith.mulf %307, %306 : vector<8x32xf32>
    %309 = math.tanh %308 : vector<8x32xf32>
    %cst_110 = arith.constant 5.000000e-01 : f32
    %310 = vector.broadcast %cst_110 : f32 to vector<8x32xf32>
    %311 = arith.mulf %310, %309 : vector<8x32xf32>
    %cst_111 = arith.constant 5.000000e-01 : f32
    %312 = vector.broadcast %cst_111 : f32 to vector<8x32xf32>
    %313 = arith.addf %311, %312 : vector<8x32xf32>
    %314 = arith.mulf %303, %277 : vector<8x32xf32>
    %315 = arith.mulf %295, %305 : vector<8x32xf32>
    %316 = arith.addf %314, %315 : vector<8x32xf32>
    %317 = math.tanh %316 : vector<8x32xf32>
    %318 = arith.mulf %313, %317 : vector<8x32xf32>
    %319 = arith.index_cast %282 : i32 to index
    %c0_112 = arith.constant 0 : index
    %320 = vector.load %arg17[%319, %c0_112] : memref<64x32xf32, #tpu.memory_space<vmem>>, vector<8x32xf32>
    tpu.vector_store %arg17[%319, %c0_112], %318 {strides = array<i32>} : memref<64x32xf32, #tpu.memory_space<vmem>>, vector<8x32xf32>,
    %c8_i32_113 = arith.constant 8 : i32
    %c0_114 = arith.constant 0 : index
    %c0_115 = arith.constant 0 : index
    %321 = vector.load %arg17[%c0_114, %c0_115] : memref<64x32xf32, #tpu.memory_space<vmem>>, vector<64x32xf32>
    %322 = arith.truncf %321 : vector<64x32xf32> to vector<64x32xbf16>
    %c0_116 = arith.constant 0 : index
    %c0_117 = arith.constant 0 : index
    %323 = vector.load %arg5[%c0_116, %c0_117] : memref<32x192xbf16, #tpu.memory_space<vmem>>, vector<32x192xbf16>
    %cst_118 = arith.constant dense<0.000000e+00> : vector<64x192xf32>
    %324 = tpu.matmul %322, %323, %cst_118 {dimension_numbers = #tpu.dot_dimension_numbers<[1], [0], [0], [1], [0, 0, 1, 1], [], []>} : vector<64x32xbf16>, vector<32x192xbf16>, vector<64x192xf32> -> vector<64x192xf32>
    %c0_119 = arith.constant 0 : index
    %c0_120 = arith.constant 0 : index
    %325 = vector.load %arg6[%c0_119, %c0_120] : memref<1x192xf32, #tpu.memory_space<vmem>>, vector<1x192xf32>
    %326 = vector.broadcast %325 : vector<1x192xf32> to vector<64x192xf32>
    %327 = arith.addf %324, %326 : vector<64x192xf32>
    %328 = vector.extract_strided_slice %327 {offsets = [0, 0], sizes = [64, 128], strides = [1, 1]} : vector<64x192xf32> to vector<64x128xf32>
    %cst_121 = arith.constant dense<0xFF800000> : vector<64xf32>
    %329 = vector.multi_reduction <maximumf>, %328, %cst_121 [1] : vector<64x128xf32> to vector<64xf32>
    %330 = vector.shape_cast %329 : vector<64xf32> to vector<64x1xf32>
    %331 = vector.broadcast %330 : vector<64x1xf32> to vector<64x128xf32>
    %332 = arith.subf %328, %331 : vector<64x128xf32>
    %333 = math.exp %332 : vector<64x128xf32>
    %cst_122 = arith.constant dense<0.000000e+00> : vector<64xf32>
    %334 = vector.multi_reduction <add>, %333, %cst_122 [1] : vector<64x128xf32> to vector<64xf32>
    %335 = vector.shape_cast %334 : vector<64xf32> to vector<64x1xf32>
    %336 = math.log %335 : vector<64x1xf32>
    %337 = vector.broadcast %336 : vector<64x1xf32> to vector<64x128xf32>
    %338 = arith.subf %332, %337 : vector<64x128xf32>
    %c0_123 = arith.constant 0 : index
    %c0_124 = arith.constant 0 : index
    %339 = vector.load %arg15[%c0_123, %c0_124] : memref<64x128xf32, #tpu.memory_space<vmem>>, vector<64x128xf32>
    tpu.vector_store %arg15[%c0_123, %c0_124], %338 {strides = array<i32>} : memref<64x128xf32, #tpu.memory_space<vmem>>, vector<64x128xf32>,
    %340 = vector.extract_strided_slice %327 {offsets = [0, 128], sizes = [64, 32], strides = [1, 1]} : vector<64x192xf32> to vector<64x32xf32>
    %341 = vector.extract_strided_slice %327 {offsets = [0, 160], sizes = [64, 32], strides = [1, 1]} : vector<64x192xf32> to vector<64x32xf32>
    %342 = arith.truncf %318 : vector<8x32xf32> to vector<8x32xbf16>
    %c0_125 = arith.constant 0 : index
    %c0_126 = arith.constant 0 : index
    %343 = vector.load %arg7[%c0_125, %c0_126] : memref<32x32xbf16, #tpu.memory_space<vmem>>, vector<32x32xbf16>
    %cst_127 = arith.constant dense<0.000000e+00> : vector<8x32xf32>
    %344 = tpu.matmul %342, %343, %cst_127 {dimension_numbers = #tpu.dot_dimension_numbers<[1], [0], [0], [1], [0, 0, 1, 1], [], []>} : vector<8x32xbf16>, vector<32x32xbf16>, vector<8x32xf32> -> vector<8x32xf32>
    %c0_128 = arith.constant 0 : index
    %c0_129 = arith.constant 0 : index
    %345 = vector.load %arg8[%c0_128, %c0_129] : memref<1x32xf32, #tpu.memory_space<vmem>>, vector<1x32xf32>
    %346 = vector.broadcast %345 : vector<1x32xf32> to vector<8x32xf32>
    %347 = arith.addf %344, %346 : vector<8x32xf32>
    %cst_130 = arith.constant 0.176776692 : f32
    %348 = vector.broadcast %cst_130 : f32 to vector<8x32xf32>
    %349 = arith.mulf %347, %348 : vector<8x32xf32>
    %350 = vector.shape_cast %340 : vector<64x32xf32> to vector<8x8x32xf32>
    %351 = vector.shape_cast %341 : vector<64x32xf32> to vector<8x8x32xf32>
    %352 = vector.shape_cast %349 : vector<8x32xf32> to vector<1x8x32xf32>
    %353 = vector.broadcast %352 : vector<1x8x32xf32> to vector<8x8x32xf32>
    %354 = arith.mulf %350, %353 : vector<8x8x32xf32>
    %cst_131 = arith.constant dense<0.000000e+00> : vector<8x8xf32>
    %355 = vector.multi_reduction <add>, %354, %cst_131 [2] : vector<8x8x32xf32> to vector<8x8xf32>
    %356 = vector.shape_cast %355 : vector<8x8xf32> to vector<8x8x1xf32>
    %cst_132 = arith.constant dense<0xFF800000> : vector<8x1xf32>
    %357 = vector.multi_reduction <maximumf>, %356, %cst_132 [0] : vector<8x8x1xf32> to vector<8x1xf32>
    %358 = vector.shape_cast %357 : vector<8x1xf32> to vector<1x8x1xf32>
    %359 = vector.broadcast %358 : vector<1x8x1xf32> to vector<8x8x1xf32>
    %360 = arith.subf %356, %359 : vector<8x8x1xf32>
    %361 = math.exp %360 : vector<8x8x1xf32>
    %cst_133 = arith.constant dense<0.000000e+00> : vector<8x1xf32>
    %362 = vector.multi_reduction <add>, %361, %cst_133 [0] : vector<8x8x1xf32> to vector<8x1xf32>
    %363 = vector.shape_cast %362 : vector<8x1xf32> to vector<1x8x1xf32>
    %364 = tpu.reciprocal %363 {approx = true} : vector<1x8x1xf32> -> vector<1x8x1xf32>
    %365 = vector.broadcast %364 : vector<1x8x1xf32> to vector<8x8x1xf32>
    %366 = arith.mulf %361, %365 : vector<8x8x1xf32>
    %367 = vector.broadcast %366 : vector<8x8x1xf32> to vector<8x8x32xf32>
    %368 = arith.mulf %367, %351 : vector<8x8x32xf32>
    %cst_134 = arith.constant dense<0.000000e+00> : vector<8x32xf32>
    %369 = vector.multi_reduction <add>, %368, %cst_134 [0] : vector<8x8x32xf32> to vector<8x32xf32>
    %370 = arith.truncf %369 : vector<8x32xf32> to vector<8x32xbf16>
    %c0_135 = arith.constant 0 : index
    %c0_136 = arith.constant 0 : index
    %371 = vector.load %arg9[%c0_135, %c0_136] : memref<32x32xbf16, #tpu.memory_space<vmem>>, vector<32x32xbf16>
    %cst_137 = arith.constant dense<0.000000e+00> : vector<8x32xf32>
    %372 = tpu.matmul %370, %371, %cst_137 {dimension_numbers = #tpu.dot_dimension_numbers<[1], [0], [0], [1], [0, 0, 1, 1], [], []>} : vector<8x32xbf16>, vector<32x32xbf16>, vector<8x32xf32> -> vector<8x32xf32>
    %c0_138 = arith.constant 0 : index
    %c0_139 = arith.constant 0 : index
    %373 = vector.load %arg10[%c0_138, %c0_139] : memref<1x32xf32, #tpu.memory_space<vmem>>, vector<1x32xf32>
    %374 = vector.broadcast %373 : vector<1x32xf32> to vector<8x32xf32>
    %375 = arith.addf %372, %374 : vector<8x32xf32>
    %376 = arith.truncf %375 : vector<8x32xf32> to vector<8x32xbf16>
    %c0_140 = arith.constant 0 : index
    %c0_141 = arith.constant 0 : index
    %377 = vector.load %arg11[%c0_140, %c0_141] : memref<32x128xbf16, #tpu.memory_space<vmem>>, vector<32x128xbf16>
    %cst_142 = arith.constant dense<0.000000e+00> : vector<8x128xf32>
    %378 = tpu.matmul %376, %377, %cst_142 {dimension_numbers = #tpu.dot_dimension_numbers<[1], [0], [0], [1], [0, 0, 1, 1], [], []>} : vector<8x32xbf16>, vector<32x128xbf16>, vector<8x128xf32> -> vector<8x128xf32>
    %c0_143 = arith.constant 0 : index
    %c128 = arith.constant 128 : index
    %379 = vector.load %arg18[%c0_143, %c128] : memref<64x256xf32, #tpu.memory_space<vmem>>, vector<64x128xf32>
    %380 = vector.shape_cast %379 : vector<64x128xf32> to vector<8x8x128xf32>
    %381 = vector.shape_cast %378 : vector<8x128xf32> to vector<1x8x128xf32>
    %382 = vector.broadcast %381 : vector<1x8x128xf32> to vector<8x8x128xf32>
    %383 = arith.addf %380, %382 : vector<8x8x128xf32>
    %384 = vector.shape_cast %383 : vector<8x8x128xf32> to vector<64x128xf32>
    %c0_144 = arith.constant 0 : index
    %c128_145 = arith.constant 128 : index
    %385 = vector.load %arg18[%c0_144, %c128_145] : memref<64x256xf32, #tpu.memory_space<vmem>>, vector<64x128xf32>
    tpu.vector_store %arg18[%c0_144, %c128_145], %384 {strides = array<i32>} : memref<64x256xf32, #tpu.memory_space<vmem>>, vector<64x128xf32>,
    %c0_146 = arith.constant 0 : index
    %c0_147 = arith.constant 0 : index
    %386 = vector.load %arg12[%c0_146, %c0_147] : memref<32x128xbf16, #tpu.memory_space<vmem>>, vector<32x128xbf16>
    %c0_i32_148 = arith.constant 0 : i32
    %c8_i32_149 = arith.constant 8 : i32
    %387 = arith.muli %c0_i32_148, %c8_i32_149 : i32
    %388 = arith.index_cast %387 : i32 to index
    %c128_150 = arith.constant 128 : index
    %389 = vector.load %arg18[%388, %c128_150] : memref<64x256xf32, #tpu.memory_space<vmem>>, vector<8x128xf32>
    %390 = arith.truncf %318 : vector<8x32xf32> to vector<8x32xbf16>
    %cst_151 = arith.constant dense<0.000000e+00> : vector<8x128xf32>
    %391 = tpu.matmul %390, %386, %cst_151 {dimension_numbers = #tpu.dot_dimension_numbers<[1], [0], [0], [1], [0, 0, 1, 1], [], []>} : vector<8x32xbf16>, vector<32x128xbf16>, vector<8x128xf32> -> vector<8x128xf32>
    %392 = arith.addf %389, %391 : vector<8x128xf32>
    %393 = vector.extract_strided_slice %392 {offsets = [0, 0], sizes = [8, 32], strides = [1, 1]} : vector<8x128xf32> to vector<8x32xf32>
    %cst_152 = arith.constant 5.000000e-01 : f32
    %394 = vector.broadcast %cst_152 : f32 to vector<8x32xf32>
    %395 = arith.mulf %394, %393 : vector<8x32xf32>
    %396 = math.tanh %395 : vector<8x32xf32>
    %cst_153 = arith.constant 5.000000e-01 : f32
    %397 = vector.broadcast %cst_153 : f32 to vector<8x32xf32>
    %398 = arith.mulf %397, %396 : vector<8x32xf32>
    %cst_154 = arith.constant 5.000000e-01 : f32
    %399 = vector.broadcast %cst_154 : f32 to vector<8x32xf32>
    %400 = arith.addf %398, %399 : vector<8x32xf32>
    %401 = vector.extract_strided_slice %392 {offsets = [0, 32], sizes = [8, 32], strides = [1, 1]} : vector<8x128xf32> to vector<8x32xf32>
    %cst_155 = arith.constant 5.000000e-01 : f32
    %402 = vector.broadcast %cst_155 : f32 to vector<8x32xf32>
    %403 = arith.mulf %402, %401 : vector<8x32xf32>
    %404 = math.tanh %403 : vector<8x32xf32>
    %cst_156 = arith.constant 5.000000e-01 : f32
    %405 = vector.broadcast %cst_156 : f32 to vector<8x32xf32>
    %406 = arith.mulf %405, %404 : vector<8x32xf32>
    %cst_157 = arith.constant 5.000000e-01 : f32
    %407 = vector.broadcast %cst_157 : f32 to vector<8x32xf32>
    %408 = arith.addf %406, %407 : vector<8x32xf32>
    %409 = vector.extract_strided_slice %392 {offsets = [0, 64], sizes = [8, 32], strides = [1, 1]} : vector<8x128xf32> to vector<8x32xf32>
    %410 = math.tanh %409 : vector<8x32xf32>
    %411 = vector.extract_strided_slice %392 {offsets = [0, 96], sizes = [8, 32], strides = [1, 1]} : vector<8x128xf32> to vector<8x32xf32>
    %cst_158 = arith.constant 5.000000e-01 : f32
    %412 = vector.broadcast %cst_158 : f32 to vector<8x32xf32>
    %413 = arith.mulf %412, %411 : vector<8x32xf32>
    %414 = math.tanh %413 : vector<8x32xf32>
    %cst_159 = arith.constant 5.000000e-01 : f32
    %415 = vector.broadcast %cst_159 : f32 to vector<8x32xf32>
    %416 = arith.mulf %415, %414 : vector<8x32xf32>
    %cst_160 = arith.constant 5.000000e-01 : f32
    %417 = vector.broadcast %cst_160 : f32 to vector<8x32xf32>
    %418 = arith.addf %416, %417 : vector<8x32xf32>
    %419 = arith.mulf %408, %316 : vector<8x32xf32>
    %420 = arith.mulf %400, %410 : vector<8x32xf32>
    %421 = arith.addf %419, %420 : vector<8x32xf32>
    %422 = math.tanh %421 : vector<8x32xf32>
    %423 = arith.mulf %418, %422 : vector<8x32xf32>
    %424 = arith.index_cast %387 : i32 to index
    %c0_161 = arith.constant 0 : index
    %425 = vector.load %arg17[%424, %c0_161] : memref<64x32xf32, #tpu.memory_space<vmem>>, vector<8x32xf32>
    tpu.vector_store %arg17[%424, %c0_161], %423 {strides = array<i32>} : memref<64x32xf32, #tpu.memory_space<vmem>>, vector<8x32xf32>,
    %c1_i32_162 = arith.constant 1 : i32
    %c8_i32_163 = arith.constant 8 : i32
    %426 = arith.muli %c1_i32_162, %c8_i32_163 : i32
    %427 = arith.index_cast %426 : i32 to index
    %c128_164 = arith.constant 128 : index
    %428 = vector.load %arg18[%427, %c128_164] : memref<64x256xf32, #tpu.memory_space<vmem>>, vector<8x128xf32>
    %429 = arith.truncf %423 : vector<8x32xf32> to vector<8x32xbf16>
    %cst_165 = arith.constant dense<0.000000e+00> : vector<8x128xf32>
    %430 = tpu.matmul %429, %386, %cst_165 {dimension_numbers = #tpu.dot_dimension_numbers<[1], [0], [0], [1], [0, 0, 1, 1], [], []>} : vector<8x32xbf16>, vector<32x128xbf16>, vector<8x128xf32> -> vector<8x128xf32>
    %431 = arith.addf %428, %430 : vector<8x128xf32>
    %432 = vector.extract_strided_slice %431 {offsets = [0, 0], sizes = [8, 32], strides = [1, 1]} : vector<8x128xf32> to vector<8x32xf32>
    %cst_166 = arith.constant 5.000000e-01 : f32
    %433 = vector.broadcast %cst_166 : f32 to vector<8x32xf32>
    %434 = arith.mulf %433, %432 : vector<8x32xf32>
    %435 = math.tanh %434 : vector<8x32xf32>
    %cst_167 = arith.constant 5.000000e-01 : f32
    %436 = vector.broadcast %cst_167 : f32 to vector<8x32xf32>
    %437 = arith.mulf %436, %435 : vector<8x32xf32>
    %cst_168 = arith.constant 5.000000e-01 : f32
    %438 = vector.broadcast %cst_168 : f32 to vector<8x32xf32>
    %439 = arith.addf %437, %438 : vector<8x32xf32>
    %440 = vector.extract_strided_slice %431 {offsets = [0, 32], sizes = [8, 32], strides = [1, 1]} : vector<8x128xf32> to vector<8x32xf32>
    %cst_169 = arith.constant 5.000000e-01 : f32
    %441 = vector.broadcast %cst_169 : f32 to vector<8x32xf32>
    %442 = arith.mulf %441, %440 : vector<8x32xf32>
    %443 = math.tanh %442 : vector<8x32xf32>
    %cst_170 = arith.constant 5.000000e-01 : f32
    %444 = vector.broadcast %cst_170 : f32 to vector<8x32xf32>
    %445 = arith.mulf %444, %443 : vector<8x32xf32>
    %cst_171 = arith.constant 5.000000e-01 : f32
    %446 = vector.broadcast %cst_171 : f32 to vector<8x32xf32>
    %447 = arith.addf %445, %446 : vector<8x32xf32>
    %448 = vector.extract_strided_slice %431 {offsets = [0, 64], sizes = [8, 32], strides = [1, 1]} : vector<8x128xf32> to vector<8x32xf32>
    %449 = math.tanh %448 : vector<8x32xf32>
    %450 = vector.extract_strided_slice %431 {offsets = [0, 96], sizes = [8, 32], strides = [1, 1]} : vector<8x128xf32> to vector<8x32xf32>
    %cst_172 = arith.constant 5.000000e-01 : f32
    %451 = vector.broadcast %cst_172 : f32 to vector<8x32xf32>
    %452 = arith.mulf %451, %450 : vector<8x32xf32>
    %453 = math.tanh %452 : vector<8x32xf32>
    %cst_173 = arith.constant 5.000000e-01 : f32
    %454 = vector.broadcast %cst_173 : f32 to vector<8x32xf32>
    %455 = arith.mulf %454, %453 : vector<8x32xf32>
    %cst_174 = arith.constant 5.000000e-01 : f32
    %456 = vector.broadcast %cst_174 : f32 to vector<8x32xf32>
    %457 = arith.addf %455, %456 : vector<8x32xf32>
    %458 = arith.mulf %447, %421 : vector<8x32xf32>
    %459 = arith.mulf %439, %449 : vector<8x32xf32>
    %460 = arith.addf %458, %459 : vector<8x32xf32>
    %461 = math.tanh %460 : vector<8x32xf32>
    %462 = arith.mulf %457, %461 : vector<8x32xf32>
    %463 = arith.index_cast %426 : i32 to index
    %c0_175 = arith.constant 0 : index
    %464 = vector.load %arg17[%463, %c0_175] : memref<64x32xf32, #tpu.memory_space<vmem>>, vector<8x32xf32>
    tpu.vector_store %arg17[%463, %c0_175], %462 {strides = array<i32>} : memref<64x32xf32, #tpu.memory_space<vmem>>, vector<8x32xf32>,
    %c2_i32_176 = arith.constant 2 : i32
    %c8_i32_177 = arith.constant 8 : i32
    %465 = arith.muli %c2_i32_176, %c8_i32_177 : i32
    %466 = arith.index_cast %465 : i32 to index
    %c128_178 = arith.constant 128 : index
    %467 = vector.load %arg18[%466, %c128_178] : memref<64x256xf32, #tpu.memory_space<vmem>>, vector<8x128xf32>
    %468 = arith.truncf %462 : vector<8x32xf32> to vector<8x32xbf16>
    %cst_179 = arith.constant dense<0.000000e+00> : vector<8x128xf32>
    %469 = tpu.matmul %468, %386, %cst_179 {dimension_numbers = #tpu.dot_dimension_numbers<[1], [0], [0], [1], [0, 0, 1, 1], [], []>} : vector<8x32xbf16>, vector<32x128xbf16>, vector<8x128xf32> -> vector<8x128xf32>
    %470 = arith.addf %467, %469 : vector<8x128xf32>
    %471 = vector.extract_strided_slice %470 {offsets = [0, 0], sizes = [8, 32], strides = [1, 1]} : vector<8x128xf32> to vector<8x32xf32>
    %cst_180 = arith.constant 5.000000e-01 : f32
    %472 = vector.broadcast %cst_180 : f32 to vector<8x32xf32>
    %473 = arith.mulf %472, %471 : vector<8x32xf32>
    %474 = math.tanh %473 : vector<8x32xf32>
    %cst_181 = arith.constant 5.000000e-01 : f32
    %475 = vector.broadcast %cst_181 : f32 to vector<8x32xf32>
    %476 = arith.mulf %475, %474 : vector<8x32xf32>
    %cst_182 = arith.constant 5.000000e-01 : f32
    %477 = vector.broadcast %cst_182 : f32 to vector<8x32xf32>
    %478 = arith.addf %476, %477 : vector<8x32xf32>
    %479 = vector.extract_strided_slice %470 {offsets = [0, 32], sizes = [8, 32], strides = [1, 1]} : vector<8x128xf32> to vector<8x32xf32>
    %cst_183 = arith.constant 5.000000e-01 : f32
    %480 = vector.broadcast %cst_183 : f32 to vector<8x32xf32>
    %481 = arith.mulf %480, %479 : vector<8x32xf32>
    %482 = math.tanh %481 : vector<8x32xf32>
    %cst_184 = arith.constant 5.000000e-01 : f32
    %483 = vector.broadcast %cst_184 : f32 to vector<8x32xf32>
    %484 = arith.mulf %483, %482 : vector<8x32xf32>
    %cst_185 = arith.constant 5.000000e-01 : f32
    %485 = vector.broadcast %cst_185 : f32 to vector<8x32xf32>
    %486 = arith.addf %484, %485 : vector<8x32xf32>
    %487 = vector.extract_strided_slice %470 {offsets = [0, 64], sizes = [8, 32], strides = [1, 1]} : vector<8x128xf32> to vector<8x32xf32>
    %488 = math.tanh %487 : vector<8x32xf32>
    %489 = vector.extract_strided_slice %470 {offsets = [0, 96], sizes = [8, 32], strides = [1, 1]} : vector<8x128xf32> to vector<8x32xf32>
    %cst_186 = arith.constant 5.000000e-01 : f32
    %490 = vector.broadcast %cst_186 : f32 to vector<8x32xf32>
    %491 = arith.mulf %490, %489 : vector<8x32xf32>
    %492 = math.tanh %491 : vector<8x32xf32>
    %cst_187 = arith.constant 5.000000e-01 : f32
    %493 = vector.broadcast %cst_187 : f32 to vector<8x32xf32>
    %494 = arith.mulf %493, %492 : vector<8x32xf32>
    %cst_188 = arith.constant 5.000000e-01 : f32
    %495 = vector.broadcast %cst_188 : f32 to vector<8x32xf32>
    %496 = arith.addf %494, %495 : vector<8x32xf32>
    %497 = arith.mulf %486, %460 : vector<8x32xf32>
    %498 = arith.mulf %478, %488 : vector<8x32xf32>
    %499 = arith.addf %497, %498 : vector<8x32xf32>
    %500 = math.tanh %499 : vector<8x32xf32>
    %501 = arith.mulf %496, %500 : vector<8x32xf32>
    %502 = arith.index_cast %465 : i32 to index
    %c0_189 = arith.constant 0 : index
    %503 = vector.load %arg17[%502, %c0_189] : memref<64x32xf32, #tpu.memory_space<vmem>>, vector<8x32xf32>
    tpu.vector_store %arg17[%502, %c0_189], %501 {strides = array<i32>} : memref<64x32xf32, #tpu.memory_space<vmem>>, vector<8x32xf32>,
    %c3_i32_190 = arith.constant 3 : i32
    %c8_i32_191 = arith.constant 8 : i32
    %504 = arith.muli %c3_i32_190, %c8_i32_191 : i32
    %505 = arith.index_cast %504 : i32 to index
    %c128_192 = arith.constant 128 : index
    %506 = vector.load %arg18[%505, %c128_192] : memref<64x256xf32, #tpu.memory_space<vmem>>, vector<8x128xf32>
    %507 = arith.truncf %501 : vector<8x32xf32> to vector<8x32xbf16>
    %cst_193 = arith.constant dense<0.000000e+00> : vector<8x128xf32>
    %508 = tpu.matmul %507, %386, %cst_193 {dimension_numbers = #tpu.dot_dimension_numbers<[1], [0], [0], [1], [0, 0, 1, 1], [], []>} : vector<8x32xbf16>, vector<32x128xbf16>, vector<8x128xf32> -> vector<8x128xf32>
    %509 = arith.addf %506, %508 : vector<8x128xf32>
    %510 = vector.extract_strided_slice %509 {offsets = [0, 0], sizes = [8, 32], strides = [1, 1]} : vector<8x128xf32> to vector<8x32xf32>
    %cst_194 = arith.constant 5.000000e-01 : f32
    %511 = vector.broadcast %cst_194 : f32 to vector<8x32xf32>
    %512 = arith.mulf %511, %510 : vector<8x32xf32>
    %513 = math.tanh %512 : vector<8x32xf32>
    %cst_195 = arith.constant 5.000000e-01 : f32
    %514 = vector.broadcast %cst_195 : f32 to vector<8x32xf32>
    %515 = arith.mulf %514, %513 : vector<8x32xf32>
    %cst_196 = arith.constant 5.000000e-01 : f32
    %516 = vector.broadcast %cst_196 : f32 to vector<8x32xf32>
    %517 = arith.addf %515, %516 : vector<8x32xf32>
    %518 = vector.extract_strided_slice %509 {offsets = [0, 32], sizes = [8, 32], strides = [1, 1]} : vector<8x128xf32> to vector<8x32xf32>
    %cst_197 = arith.constant 5.000000e-01 : f32
    %519 = vector.broadcast %cst_197 : f32 to vector<8x32xf32>
    %520 = arith.mulf %519, %518 : vector<8x32xf32>
    %521 = math.tanh %520 : vector<8x32xf32>
    %cst_198 = arith.constant 5.000000e-01 : f32
    %522 = vector.broadcast %cst_198 : f32 to vector<8x32xf32>
    %523 = arith.mulf %522, %521 : vector<8x32xf32>
    %cst_199 = arith.constant 5.000000e-01 : f32
    %524 = vector.broadcast %cst_199 : f32 to vector<8x32xf32>
    %525 = arith.addf %523, %524 : vector<8x32xf32>
    %526 = vector.extract_strided_slice %509 {offsets = [0, 64], sizes = [8, 32], strides = [1, 1]} : vector<8x128xf32> to vector<8x32xf32>
    %527 = math.tanh %526 : vector<8x32xf32>
    %528 = vector.extract_strided_slice %509 {offsets = [0, 96], sizes = [8, 32], strides = [1, 1]} : vector<8x128xf32> to vector<8x32xf32>
    %cst_200 = arith.constant 5.000000e-01 : f32
    %529 = vector.broadcast %cst_200 : f32 to vector<8x32xf32>
    %530 = arith.mulf %529, %528 : vector<8x32xf32>
    %531 = math.tanh %530 : vector<8x32xf32>
    %cst_201 = arith.constant 5.000000e-01 : f32
    %532 = vector.broadcast %cst_201 : f32 to vector<8x32xf32>
    %533 = arith.mulf %532, %531 : vector<8x32xf32>
    %cst_202 = arith.constant 5.000000e-01 : f32
    %534 = vector.broadcast %cst_202 : f32 to vector<8x32xf32>
    %535 = arith.addf %533, %534 : vector<8x32xf32>
    %536 = arith.mulf %525, %499 : vector<8x32xf32>
    %537 = arith.mulf %517, %527 : vector<8x32xf32>
    %538 = arith.addf %536, %537 : vector<8x32xf32>
    %539 = math.tanh %538 : vector<8x32xf32>
    %540 = arith.mulf %535, %539 : vector<8x32xf32>
    %541 = arith.index_cast %504 : i32 to index
    %c0_203 = arith.constant 0 : index
    %542 = vector.load %arg17[%541, %c0_203] : memref<64x32xf32, #tpu.memory_space<vmem>>, vector<8x32xf32>
    tpu.vector_store %arg17[%541, %c0_203], %540 {strides = array<i32>} : memref<64x32xf32, #tpu.memory_space<vmem>>, vector<8x32xf32>,
    %c4_i32_204 = arith.constant 4 : i32
    %c8_i32_205 = arith.constant 8 : i32
    %543 = arith.muli %c4_i32_204, %c8_i32_205 : i32
    %544 = arith.index_cast %543 : i32 to index
    %c128_206 = arith.constant 128 : index
    %545 = vector.load %arg18[%544, %c128_206] : memref<64x256xf32, #tpu.memory_space<vmem>>, vector<8x128xf32>
    %546 = arith.truncf %540 : vector<8x32xf32> to vector<8x32xbf16>
    %cst_207 = arith.constant dense<0.000000e+00> : vector<8x128xf32>
    %547 = tpu.matmul %546, %386, %cst_207 {dimension_numbers = #tpu.dot_dimension_numbers<[1], [0], [0], [1], [0, 0, 1, 1], [], []>} : vector<8x32xbf16>, vector<32x128xbf16>, vector<8x128xf32> -> vector<8x128xf32>
    %548 = arith.addf %545, %547 : vector<8x128xf32>
    %549 = vector.extract_strided_slice %548 {offsets = [0, 0], sizes = [8, 32], strides = [1, 1]} : vector<8x128xf32> to vector<8x32xf32>
    %cst_208 = arith.constant 5.000000e-01 : f32
    %550 = vector.broadcast %cst_208 : f32 to vector<8x32xf32>
    %551 = arith.mulf %550, %549 : vector<8x32xf32>
    %552 = math.tanh %551 : vector<8x32xf32>
    %cst_209 = arith.constant 5.000000e-01 : f32
    %553 = vector.broadcast %cst_209 : f32 to vector<8x32xf32>
    %554 = arith.mulf %553, %552 : vector<8x32xf32>
    %cst_210 = arith.constant 5.000000e-01 : f32
    %555 = vector.broadcast %cst_210 : f32 to vector<8x32xf32>
    %556 = arith.addf %554, %555 : vector<8x32xf32>
    %557 = vector.extract_strided_slice %548 {offsets = [0, 32], sizes = [8, 32], strides = [1, 1]} : vector<8x128xf32> to vector<8x32xf32>
    %cst_211 = arith.constant 5.000000e-01 : f32
    %558 = vector.broadcast %cst_211 : f32 to vector<8x32xf32>
    %559 = arith.mulf %558, %557 : vector<8x32xf32>
    %560 = math.tanh %559 : vector<8x32xf32>
    %cst_212 = arith.constant 5.000000e-01 : f32
    %561 = vector.broadcast %cst_212 : f32 to vector<8x32xf32>
    %562 = arith.mulf %561, %560 : vector<8x32xf32>
    %cst_213 = arith.constant 5.000000e-01 : f32
    %563 = vector.broadcast %cst_213 : f32 to vector<8x32xf32>
    %564 = arith.addf %562, %563 : vector<8x32xf32>
    %565 = vector.extract_strided_slice %548 {offsets = [0, 64], sizes = [8, 32], strides = [1, 1]} : vector<8x128xf32> to vector<8x32xf32>
    %566 = math.tanh %565 : vector<8x32xf32>
    %567 = vector.extract_strided_slice %548 {offsets = [0, 96], sizes = [8, 32], strides = [1, 1]} : vector<8x128xf32> to vector<8x32xf32>
    %cst_214 = arith.constant 5.000000e-01 : f32
    %568 = vector.broadcast %cst_214 : f32 to vector<8x32xf32>
    %569 = arith.mulf %568, %567 : vector<8x32xf32>
    %570 = math.tanh %569 : vector<8x32xf32>
    %cst_215 = arith.constant 5.000000e-01 : f32
    %571 = vector.broadcast %cst_215 : f32 to vector<8x32xf32>
    %572 = arith.mulf %571, %570 : vector<8x32xf32>
    %cst_216 = arith.constant 5.000000e-01 : f32
    %573 = vector.broadcast %cst_216 : f32 to vector<8x32xf32>
    %574 = arith.addf %572, %573 : vector<8x32xf32>
    %575 = arith.mulf %564, %538 : vector<8x32xf32>
    %576 = arith.mulf %556, %566 : vector<8x32xf32>
    %577 = arith.addf %575, %576 : vector<8x32xf32>
    %578 = math.tanh %577 : vector<8x32xf32>
    %579 = arith.mulf %574, %578 : vector<8x32xf32>
    %580 = arith.index_cast %543 : i32 to index
    %c0_217 = arith.constant 0 : index
    %581 = vector.load %arg17[%580, %c0_217] : memref<64x32xf32, #tpu.memory_space<vmem>>, vector<8x32xf32>
    tpu.vector_store %arg17[%580, %c0_217], %579 {strides = array<i32>} : memref<64x32xf32, #tpu.memory_space<vmem>>, vector<8x32xf32>,
    %c5_i32_218 = arith.constant 5 : i32
    %c8_i32_219 = arith.constant 8 : i32
    %582 = arith.muli %c5_i32_218, %c8_i32_219 : i32
    %583 = arith.index_cast %582 : i32 to index
    %c128_220 = arith.constant 128 : index
    %584 = vector.load %arg18[%583, %c128_220] : memref<64x256xf32, #tpu.memory_space<vmem>>, vector<8x128xf32>
    %585 = arith.truncf %579 : vector<8x32xf32> to vector<8x32xbf16>
    %cst_221 = arith.constant dense<0.000000e+00> : vector<8x128xf32>
    %586 = tpu.matmul %585, %386, %cst_221 {dimension_numbers = #tpu.dot_dimension_numbers<[1], [0], [0], [1], [0, 0, 1, 1], [], []>} : vector<8x32xbf16>, vector<32x128xbf16>, vector<8x128xf32> -> vector<8x128xf32>
    %587 = arith.addf %584, %586 : vector<8x128xf32>
    %588 = vector.extract_strided_slice %587 {offsets = [0, 0], sizes = [8, 32], strides = [1, 1]} : vector<8x128xf32> to vector<8x32xf32>
    %cst_222 = arith.constant 5.000000e-01 : f32
    %589 = vector.broadcast %cst_222 : f32 to vector<8x32xf32>
    %590 = arith.mulf %589, %588 : vector<8x32xf32>
    %591 = math.tanh %590 : vector<8x32xf32>
    %cst_223 = arith.constant 5.000000e-01 : f32
    %592 = vector.broadcast %cst_223 : f32 to vector<8x32xf32>
    %593 = arith.mulf %592, %591 : vector<8x32xf32>
    %cst_224 = arith.constant 5.000000e-01 : f32
    %594 = vector.broadcast %cst_224 : f32 to vector<8x32xf32>
    %595 = arith.addf %593, %594 : vector<8x32xf32>
    %596 = vector.extract_strided_slice %587 {offsets = [0, 32], sizes = [8, 32], strides = [1, 1]} : vector<8x128xf32> to vector<8x32xf32>
    %cst_225 = arith.constant 5.000000e-01 : f32
    %597 = vector.broadcast %cst_225 : f32 to vector<8x32xf32>
    %598 = arith.mulf %597, %596 : vector<8x32xf32>
    %599 = math.tanh %598 : vector<8x32xf32>
    %cst_226 = arith.constant 5.000000e-01 : f32
    %600 = vector.broadcast %cst_226 : f32 to vector<8x32xf32>
    %601 = arith.mulf %600, %599 : vector<8x32xf32>
    %cst_227 = arith.constant 5.000000e-01 : f32
    %602 = vector.broadcast %cst_227 : f32 to vector<8x32xf32>
    %603 = arith.addf %601, %602 : vector<8x32xf32>
    %604 = vector.extract_strided_slice %587 {offsets = [0, 64], sizes = [8, 32], strides = [1, 1]} : vector<8x128xf32> to vector<8x32xf32>
    %605 = math.tanh %604 : vector<8x32xf32>
    %606 = vector.extract_strided_slice %587 {offsets = [0, 96], sizes = [8, 32], strides = [1, 1]} : vector<8x128xf32> to vector<8x32xf32>
    %cst_228 = arith.constant 5.000000e-01 : f32
    %607 = vector.broadcast %cst_228 : f32 to vector<8x32xf32>
    %608 = arith.mulf %607, %606 : vector<8x32xf32>
    %609 = math.tanh %608 : vector<8x32xf32>
    %cst_229 = arith.constant 5.000000e-01 : f32
    %610 = vector.broadcast %cst_229 : f32 to vector<8x32xf32>
    %611 = arith.mulf %610, %609 : vector<8x32xf32>
    %cst_230 = arith.constant 5.000000e-01 : f32
    %612 = vector.broadcast %cst_230 : f32 to vector<8x32xf32>
    %613 = arith.addf %611, %612 : vector<8x32xf32>
    %614 = arith.mulf %603, %577 : vector<8x32xf32>
    %615 = arith.mulf %595, %605 : vector<8x32xf32>
    %616 = arith.addf %614, %615 : vector<8x32xf32>
    %617 = math.tanh %616 : vector<8x32xf32>
    %618 = arith.mulf %613, %617 : vector<8x32xf32>
    %619 = arith.index_cast %582 : i32 to index
    %c0_231 = arith.constant 0 : index
    %620 = vector.load %arg17[%619, %c0_231] : memref<64x32xf32, #tpu.memory_space<vmem>>, vector<8x32xf32>
    tpu.vector_store %arg17[%619, %c0_231], %618 {strides = array<i32>} : memref<64x32xf32, #tpu.memory_space<vmem>>, vector<8x32xf32>,
    %c6_i32_232 = arith.constant 6 : i32
    %c8_i32_233 = arith.constant 8 : i32
    %621 = arith.muli %c6_i32_232, %c8_i32_233 : i32
    %622 = arith.index_cast %621 : i32 to index
    %c128_234 = arith.constant 128 : index
    %623 = vector.load %arg18[%622, %c128_234] : memref<64x256xf32, #tpu.memory_space<vmem>>, vector<8x128xf32>
    %624 = arith.truncf %618 : vector<8x32xf32> to vector<8x32xbf16>
    %cst_235 = arith.constant dense<0.000000e+00> : vector<8x128xf32>
    %625 = tpu.matmul %624, %386, %cst_235 {dimension_numbers = #tpu.dot_dimension_numbers<[1], [0], [0], [1], [0, 0, 1, 1], [], []>} : vector<8x32xbf16>, vector<32x128xbf16>, vector<8x128xf32> -> vector<8x128xf32>
    %626 = arith.addf %623, %625 : vector<8x128xf32>
    %627 = vector.extract_strided_slice %626 {offsets = [0, 0], sizes = [8, 32], strides = [1, 1]} : vector<8x128xf32> to vector<8x32xf32>
    %cst_236 = arith.constant 5.000000e-01 : f32
    %628 = vector.broadcast %cst_236 : f32 to vector<8x32xf32>
    %629 = arith.mulf %628, %627 : vector<8x32xf32>
    %630 = math.tanh %629 : vector<8x32xf32>
    %cst_237 = arith.constant 5.000000e-01 : f32
    %631 = vector.broadcast %cst_237 : f32 to vector<8x32xf32>
    %632 = arith.mulf %631, %630 : vector<8x32xf32>
    %cst_238 = arith.constant 5.000000e-01 : f32
    %633 = vector.broadcast %cst_238 : f32 to vector<8x32xf32>
    %634 = arith.addf %632, %633 : vector<8x32xf32>
    %635 = vector.extract_strided_slice %626 {offsets = [0, 32], sizes = [8, 32], strides = [1, 1]} : vector<8x128xf32> to vector<8x32xf32>
    %cst_239 = arith.constant 5.000000e-01 : f32
    %636 = vector.broadcast %cst_239 : f32 to vector<8x32xf32>
    %637 = arith.mulf %636, %635 : vector<8x32xf32>
    %638 = math.tanh %637 : vector<8x32xf32>
    %cst_240 = arith.constant 5.000000e-01 : f32
    %639 = vector.broadcast %cst_240 : f32 to vector<8x32xf32>
    %640 = arith.mulf %639, %638 : vector<8x32xf32>
    %cst_241 = arith.constant 5.000000e-01 : f32
    %641 = vector.broadcast %cst_241 : f32 to vector<8x32xf32>
    %642 = arith.addf %640, %641 : vector<8x32xf32>
    %643 = vector.extract_strided_slice %626 {offsets = [0, 64], sizes = [8, 32], strides = [1, 1]} : vector<8x128xf32> to vector<8x32xf32>
    %644 = math.tanh %643 : vector<8x32xf32>
    %645 = vector.extract_strided_slice %626 {offsets = [0, 96], sizes = [8, 32], strides = [1, 1]} : vector<8x128xf32> to vector<8x32xf32>
    %cst_242 = arith.constant 5.000000e-01 : f32
    %646 = vector.broadcast %cst_242 : f32 to vector<8x32xf32>
    %647 = arith.mulf %646, %645 : vector<8x32xf32>
    %648 = math.tanh %647 : vector<8x32xf32>
    %cst_243 = arith.constant 5.000000e-01 : f32
    %649 = vector.broadcast %cst_243 : f32 to vector<8x32xf32>
    %650 = arith.mulf %649, %648 : vector<8x32xf32>
    %cst_244 = arith.constant 5.000000e-01 : f32
    %651 = vector.broadcast %cst_244 : f32 to vector<8x32xf32>
    %652 = arith.addf %650, %651 : vector<8x32xf32>
    %653 = arith.mulf %642, %616 : vector<8x32xf32>
    %654 = arith.mulf %634, %644 : vector<8x32xf32>
    %655 = arith.addf %653, %654 : vector<8x32xf32>
    %656 = math.tanh %655 : vector<8x32xf32>
    %657 = arith.mulf %652, %656 : vector<8x32xf32>
    %658 = arith.index_cast %621 : i32 to index
    %c0_245 = arith.constant 0 : index
    %659 = vector.load %arg17[%658, %c0_245] : memref<64x32xf32, #tpu.memory_space<vmem>>, vector<8x32xf32>
    tpu.vector_store %arg17[%658, %c0_245], %657 {strides = array<i32>} : memref<64x32xf32, #tpu.memory_space<vmem>>, vector<8x32xf32>,
    %c7_i32_246 = arith.constant 7 : i32
    %c8_i32_247 = arith.constant 8 : i32
    %660 = arith.muli %c7_i32_246, %c8_i32_247 : i32
    %661 = arith.index_cast %660 : i32 to index
    %c128_248 = arith.constant 128 : index
    %662 = vector.load %arg18[%661, %c128_248] : memref<64x256xf32, #tpu.memory_space<vmem>>, vector<8x128xf32>
    %663 = arith.truncf %657 : vector<8x32xf32> to vector<8x32xbf16>
    %cst_249 = arith.constant dense<0.000000e+00> : vector<8x128xf32>
    %664 = tpu.matmul %663, %386, %cst_249 {dimension_numbers = #tpu.dot_dimension_numbers<[1], [0], [0], [1], [0, 0, 1, 1], [], []>} : vector<8x32xbf16>, vector<32x128xbf16>, vector<8x128xf32> -> vector<8x128xf32>
    %665 = arith.addf %662, %664 : vector<8x128xf32>
    %666 = vector.extract_strided_slice %665 {offsets = [0, 0], sizes = [8, 32], strides = [1, 1]} : vector<8x128xf32> to vector<8x32xf32>
    %cst_250 = arith.constant 5.000000e-01 : f32
    %667 = vector.broadcast %cst_250 : f32 to vector<8x32xf32>
    %668 = arith.mulf %667, %666 : vector<8x32xf32>
    %669 = math.tanh %668 : vector<8x32xf32>
    %cst_251 = arith.constant 5.000000e-01 : f32
    %670 = vector.broadcast %cst_251 : f32 to vector<8x32xf32>
    %671 = arith.mulf %670, %669 : vector<8x32xf32>
    %cst_252 = arith.constant 5.000000e-01 : f32
    %672 = vector.broadcast %cst_252 : f32 to vector<8x32xf32>
    %673 = arith.addf %671, %672 : vector<8x32xf32>
    %674 = vector.extract_strided_slice %665 {offsets = [0, 32], sizes = [8, 32], strides = [1, 1]} : vector<8x128xf32> to vector<8x32xf32>
    %cst_253 = arith.constant 5.000000e-01 : f32
    %675 = vector.broadcast %cst_253 : f32 to vector<8x32xf32>
    %676 = arith.mulf %675, %674 : vector<8x32xf32>
    %677 = math.tanh %676 : vector<8x32xf32>
    %cst_254 = arith.constant 5.000000e-01 : f32
    %678 = vector.broadcast %cst_254 : f32 to vector<8x32xf32>
    %679 = arith.mulf %678, %677 : vector<8x32xf32>
    %cst_255 = arith.constant 5.000000e-01 : f32
    %680 = vector.broadcast %cst_255 : f32 to vector<8x32xf32>
    %681 = arith.addf %679, %680 : vector<8x32xf32>
    %682 = vector.extract_strided_slice %665 {offsets = [0, 64], sizes = [8, 32], strides = [1, 1]} : vector<8x128xf32> to vector<8x32xf32>
    %683 = math.tanh %682 : vector<8x32xf32>
    %684 = vector.extract_strided_slice %665 {offsets = [0, 96], sizes = [8, 32], strides = [1, 1]} : vector<8x128xf32> to vector<8x32xf32>
    %cst_256 = arith.constant 5.000000e-01 : f32
    %685 = vector.broadcast %cst_256 : f32 to vector<8x32xf32>
    %686 = arith.mulf %685, %684 : vector<8x32xf32>
    %687 = math.tanh %686 : vector<8x32xf32>
    %cst_257 = arith.constant 5.000000e-01 : f32
    %688 = vector.broadcast %cst_257 : f32 to vector<8x32xf32>
    %689 = arith.mulf %688, %687 : vector<8x32xf32>
    %cst_258 = arith.constant 5.000000e-01 : f32
    %690 = vector.broadcast %cst_258 : f32 to vector<8x32xf32>
    %691 = arith.addf %689, %690 : vector<8x32xf32>
    %692 = arith.mulf %681, %655 : vector<8x32xf32>
    %693 = arith.mulf %673, %683 : vector<8x32xf32>
    %694 = arith.addf %692, %693 : vector<8x32xf32>
    %695 = math.tanh %694 : vector<8x32xf32>
    %696 = arith.mulf %691, %695 : vector<8x32xf32>
    %697 = arith.index_cast %660 : i32 to index
    %c0_259 = arith.constant 0 : index
    %698 = vector.load %arg17[%697, %c0_259] : memref<64x32xf32, #tpu.memory_space<vmem>>, vector<8x32xf32>
    tpu.vector_store %arg17[%697, %c0_259], %696 {strides = array<i32>} : memref<64x32xf32, #tpu.memory_space<vmem>>, vector<8x32xf32>,
    %c8_i32_260 = arith.constant 8 : i32
    %c0_261 = arith.constant 0 : index
    %c0_262 = arith.constant 0 : index
    %699 = vector.load %arg17[%c0_261, %c0_262] : memref<64x32xf32, #tpu.memory_space<vmem>>, vector<64x32xf32>
    %700 = arith.truncf %699 : vector<64x32xf32> to vector<64x32xbf16>
    %c0_263 = arith.constant 0 : index
    %c0_264 = arith.constant 0 : index
    %701 = vector.load %arg13[%c0_263, %c0_264] : memref<32x128xbf16, #tpu.memory_space<vmem>>, vector<32x128xbf16>
    %cst_265 = arith.constant dense<0.000000e+00> : vector<64x128xf32>
    %702 = tpu.matmul %700, %701, %cst_265 {dimension_numbers = #tpu.dot_dimension_numbers<[1], [0], [0], [1], [0, 0, 1, 1], [], []>} : vector<64x32xbf16>, vector<32x128xbf16>, vector<64x128xf32> -> vector<64x128xf32>
    %c0_266 = arith.constant 0 : index
    %c0_267 = arith.constant 0 : index
    %703 = vector.load %arg14[%c0_266, %c0_267] : memref<1x128xf32, #tpu.memory_space<vmem>>, vector<1x128xf32>
    %704 = vector.broadcast %703 : vector<1x128xf32> to vector<64x128xf32>
    %705 = arith.addf %702, %704 : vector<64x128xf32>
    %cst_268 = arith.constant dense<0xFF800000> : vector<64xf32>
    %706 = vector.multi_reduction <maximumf>, %705, %cst_268 [1] : vector<64x128xf32> to vector<64xf32>
    %707 = vector.shape_cast %706 : vector<64xf32> to vector<64x1xf32>
    %708 = vector.broadcast %707 : vector<64x1xf32> to vector<64x128xf32>
    %709 = arith.subf %705, %708 : vector<64x128xf32>
    %710 = math.exp %709 : vector<64x128xf32>
    %cst_269 = arith.constant dense<0.000000e+00> : vector<64xf32>
    %711 = vector.multi_reduction <add>, %710, %cst_269 [1] : vector<64x128xf32> to vector<64xf32>
    %712 = vector.shape_cast %711 : vector<64xf32> to vector<64x1xf32>
    %713 = math.log %712 : vector<64x1xf32>
    %714 = vector.broadcast %713 : vector<64x1xf32> to vector<64x128xf32>
    %715 = arith.subf %709, %714 : vector<64x128xf32>
    %c0_270 = arith.constant 0 : index
    %c0_271 = arith.constant 0 : index
    %716 = vector.load %arg16[%c0_270, %c0_271] : memref<64x128xf32, #tpu.memory_space<vmem>>, vector<64x128xf32>
    tpu.vector_store %arg16[%c0_270, %c0_271], %715 {strides = array<i32>} : memref<64x128xf32, #tpu.memory_space<vmem>>, vector<64x128xf32>,
    return
  }
  func.func @transform_0(%arg0: i32) -> (i32, i32) {
    %c0_i32 = arith.constant 0 : i32
    %c0_i32_0 = arith.constant 0 : i32
    %c0_i32_1 = arith.constant 0 : i32
    return %c0_i32, %c0_i32_0 : i32, i32
  }
  func.func @transform_1(%arg0: i32) -> (i32, i32) {
    %c0_i32 = arith.constant 0 : i32
    %c0_i32_0 = arith.constant 0 : i32
    %c0_i32_1 = arith.constant 0 : i32
    return %c0_i32, %c0_i32_0 : i32, i32
  }
  func.func @transform_2(%arg0: i32) -> (i32, i32) {
    %c0_i32 = arith.constant 0 : i32
    %c0_i32_0 = arith.constant 0 : i32
    %c0_i32_1 = arith.constant 0 : i32
    return %c0_i32, %c0_i32_0 : i32, i32
  }
  func.func @transform_3(%arg0: i32) -> (i32, i32) {
    %c0_i32 = arith.constant 0 : i32
    %c0_i32_0 = arith.constant 0 : i32
    %c0_i32_1 = arith.constant 0 : i32
    return %c0_i32, %c0_i32_0 : i32, i32
  }
  func.func @transform_4(%arg0: i32) -> (i32, i32) {
    %c0_i32 = arith.constant 0 : i32
    %c0_i32_0 = arith.constant 0 : i32
    %c0_i32_1 = arith.constant 0 : i32
    return %c0_i32, %c0_i32_0 : i32, i32
  }
  func.func @transform_5(%arg0: i32) -> (i32, i32) {
    %c0_i32 = arith.constant 0 : i32
    %c0_i32_0 = arith.constant 0 : i32
    %c0_i32_1 = arith.constant 0 : i32
    return %c0_i32, %c0_i32_0 : i32, i32
  }
  func.func @transform_6(%arg0: i32) -> (i32, i32) {
    %c0_i32 = arith.constant 0 : i32
    %c0_i32_0 = arith.constant 0 : i32
    %c0_i32_1 = arith.constant 0 : i32
    return %c0_i32, %c0_i32_0 : i32, i32
  }
  func.func @transform_7(%arg0: i32) -> (i32, i32) {
    %c0_i32 = arith.constant 0 : i32
    %c0_i32_0 = arith.constant 0 : i32
    %c0_i32_1 = arith.constant 0 : i32
    return %c0_i32, %c0_i32_0 : i32, i32
  }
  func.func @transform_8(%arg0: i32) -> (i32, i32) {
    %c0_i32 = arith.constant 0 : i32
    %c0_i32_0 = arith.constant 0 : i32
    %c0_i32_1 = arith.constant 0 : i32
    return %c0_i32, %c0_i32_0 : i32, i32
  }
  func.func @transform_9(%arg0: i32) -> (i32, i32) {
    %c0_i32 = arith.constant 0 : i32
    %c0_i32_0 = arith.constant 0 : i32
    %c0_i32_1 = arith.constant 0 : i32
    return %c0_i32, %c0_i32_0 : i32, i32
  }
  func.func @transform_10(%arg0: i32) -> (i32, i32) {
    %c0_i32 = arith.constant 0 : i32
    %c0_i32_0 = arith.constant 0 : i32
    %c0_i32_1 = arith.constant 0 : i32
    return %c0_i32, %c0_i32_0 : i32, i32
  }
  func.func @transform_11(%arg0: i32) -> (i32, i32) {
    %c0_i32 = arith.constant 0 : i32
    %c0_i32_0 = arith.constant 0 : i32
    %c0_i32_1 = arith.constant 0 : i32
    return %c0_i32, %c0_i32_0 : i32, i32
  }
  func.func @transform_12(%arg0: i32) -> (i32, i32) {
    %c0_i32 = arith.constant 0 : i32
    %c0_i32_0 = arith.constant 0 : i32
    %c0_i32_1 = arith.constant 0 : i32
    return %c0_i32, %c0_i32_0 : i32, i32
  }
  func.func @transform_13(%arg0: i32) -> (i32, i32) {
    %c0_i32 = arith.constant 0 : i32
    %c0_i32_0 = arith.constant 0 : i32
    %c0_i32_1 = arith.constant 0 : i32
    return %c0_i32, %c0_i32_0 : i32, i32
  }
  func.func @transform_14(%arg0: i32) -> (i32, i32) {
    %c0_i32 = arith.constant 0 : i32
    %c0_i32_0 = arith.constant 0 : i32
    %c0_i32_1 = arith.constant 0 : i32
    return %c0_i32, %c0_i32_0 : i32, i32
  }
  func.func @transform_15(%arg0: i32) -> (i32, i32) {
    %c0_i32 = arith.constant 0 : i32
    %c0_i32_0 = arith.constant 0 : i32
    %c0_i32_1 = arith.constant 0 : i32
    return %c0_i32, %c0_i32_0 : i32, i32
  }
}

</mosaic_0001>

<bundles_post_ra>
// kernel: tpu_custom_call.1
= control target key start
LH: loop header
LB: loop body
LE: loop exit
PB: predicated region body
PF: predicated region fallthrough
CT: control target
= control target key end

     0   :  { %s3890_s0 = inlined_call_operand.vmem [shape: bf16[64,16], index: 0, kind: input, shape index: {}]   ;;  %s3891_s1 = inlined_call_operand.vmem [shape: bf16[16,256], index: 1, kind: input, shape index: {}]   ;;  %s3892_s2 = inlined_call_operand.hbm [shape: f32[1,256], index: 2, kind: input, shape index: {}]   ;;  %s3893_s3 = inlined_call_operand.hbm [shape: bf16[32,128], index: 3, kind: input, shape index: {}]   ;;  %s3894_s4 = inlined_call_operand.vmem [shape: bf16[32,192], index: 4, kind: input, shape index: {}]   ;;  %s3895_s5 = inlined_call_operand.hbm [shape: f32[1,192], index: 5, kind: input, shape index: {}]   ;;  %s3896_s6 = inlined_call_operand.hbm [shape: bf16[32,32], index: 6, kind: input, shape index: {}]   ;;  %s3897_s7 = inlined_call_operand.vmem [shape: f32[1,32], index: 7, kind: input, shape index: {}]   ;;  %s3898_s8 = inlined_call_operand.vmem [shape: bf16[32,32], index: 8, kind: input, shape index: {}]   ;;  %s3899_s9 = inlined_call_operand.hbm [shape: f32[1,32], index: 9, kind: input, shape index: {}]   ;;  %s3900_s10 = inlined_call_operand.hbm [shape: bf16[32,128], index: 10, kind: input, shape index: {}]   ;;  %s3901_s11 = inlined_call_operand.vmem [shape: bf16[32,128], index: 11, kind: input, shape index: {}]   ;;  %s3902_s12 = inlined_call_operand.hbm [shape: bf16[32,128], index: 12, kind: input, shape index: {}]   ;;  %s3903_s13 = inlined_call_operand.vmem [shape: f32[1,128], index: 13, kind: input, shape index: {}]   ;;  %s3904_s14 = inlined_call_operand.hbm [shape: f32[64,128], index: 14, kind: output, shape index: {0}]   ;;  %s3905_s15 = inlined_call_operand.hbm [shape: f32[64,128], index: 15, kind: output, shape index: {1}]  }
   0x1   :  { %3907 = sst [smem:[#allocation25_spill]] %s3905_s15 }
   0x2   :  { %21 = vsyncpa [#allocation5], 0 }
   0x3   :  { %22 = vsyncpa [#allocation8], 0 }
   0x4   :  { %23 = vsyncpa [#allocation11], 0 }
   0x5   :  { %24 = vsyncpa [#allocation14], 0 }
   0x6   :  { %25 = vsyncpa [#allocation6], 0 }
   0x7   :  { %26 = vsyncpa [#allocation18], 0  ;;  %s3031_s18 = smov [#allocation7]   ;;  %s2821_s22 = scalar_lea.hbm %s3893_s3, 256 }
   0x8   :  { %s46_s19 = sshll.u32 %s3031_s18, 4  ;;  %p2822_p0 = scmp.ne.s32.totalorder %s3893_s3, %s2821_s22  ;;  %s47_s19 = int_to_ptr.vmem [resolvable:$true] %s46_s19 }
   0x9   :  { %p2825_p1 = scmp.lt.u32.totalorder %s2821_s22, %s3893_s3 }
   0xb   :  { %p2827_p2 = pnand %p2825_p1, %p2822_p0 }
   0xd   :  { %2830 = shalt.err (!%p2827_p2)
}
   0xe   :  { %s2831_s27 = scalar_lea.vmem %s47_s19, 256  ;;  %p2836_p4 = scmp.lt.s32.totalorder %s47_s19, %s47_s19 }
   0xf   :  { %p2832_p3 = scmp.ne.s32.totalorder %s47_s19, %s2831_s27  ;;  %p2837_p5 = scmp.lt.s32.totalorder %s2831_s27, %s2831_s27 }
  0x11   :  { %p2838_p6 = por %p2837_p5, %p2836_p4 }
  0x13   :  { %p2839_p7 = pnand %p2838_p6, %p2832_p3 }
  0x15   :  { %2842 = shalt.err (!%p2839_p7)
}
  0x16   :  { %s3032_s28 = smov 64   ;;  %s3033_s29 = smov 4  }
  0x17   :  { %52 = dma.hbm_to_vmem [thread:$0]  %s3893_s3, 256, %s47_s19, [#allocation8], %s3032_s28, %s3032_s28, %s3033_s29  }
  0x18   :  { %s3034_s17 = smov [#allocation10]   ;;  %s3035_s20 = smov [#allocation13]  }
  0x19   :  { %s70_s18 = sshll.u32 %s3034_s17, 4  ;;  %s96_s21 = sshll.u32 %s3035_s20, 4  ;;  %s71_s18 = int_to_ptr.vmem [resolvable:$true] %s70_s18  ;;  %s97_s21 = int_to_ptr.vmem [resolvable:$true] %s96_s21 }
  0x1a   :  { %s2843_s24 = scalar_lea.hbm %s3896_s6, 256 }
  0x1b   :  { %p2844_p8 = scmp.ne.s32.totalorder %s3896_s6, %s2843_s24  ;;  %p2847_p9 = scmp.lt.u32.totalorder %s2843_s24, %s3896_s6 }
  0x1d   :  { %p2849_p10 = pnand %p2847_p9, %p2844_p8 }
  0x1f   :  { %2852 = shalt.err (!%p2849_p10)
}
  0x20   :  { %s2853_s3 = scalar_lea.vmem %s71_s18, 256  ;;  %p2858_p12 = scmp.lt.s32.totalorder %s71_s18, %s71_s18 }
  0x21   :  { %p2854_p11 = scmp.ne.s32.totalorder %s71_s18, %s2853_s3  ;;  %p2859_p13 = scmp.lt.s32.totalorder %s2853_s3, %s2853_s3 }
  0x23   :  { %p2860_p0 = por %p2859_p13, %p2858_p12 }
  0x25   :  { %p2861_p1 = pnand %p2860_p0, %p2854_p11 }
  0x27   :  { %2864 = shalt.err (!%p2861_p1)
}
  0x28   :  { %76 = dma.hbm_to_vmem [thread:$0]  %s3896_s6, 256, %s71_s18, [#allocation11], %s3032_s28, %s3032_s28, %s3033_s29  }
  0x29   :  { %s2865_s17 = scalar_lea.hbm %s3900_s10, 256 }
  0x2a   :  { %p2866_p2 = scmp.ne.s32.totalorder %s3900_s10, %s2865_s17  ;;  %p2869_p3 = scmp.lt.u32.totalorder %s2865_s17, %s3900_s10 }
  0x2c   :  { %p2871_p4 = pnand %p2869_p3, %p2866_p2 }
  0x2e   :  { %2874 = shalt.err (!%p2871_p4)
}
  0x2f   :  { %s2875_s25 = scalar_lea.vmem %s97_s21, 256  ;;  %p2880_p6 = scmp.lt.s32.totalorder %s97_s21, %s97_s21 }
  0x30   :  { %p2876_p5 = scmp.ne.s32.totalorder %s97_s21, %s2875_s25  ;;  %p2881_p7 = scmp.lt.s32.totalorder %s2875_s25, %s2875_s25 }
  0x32   :  { %p2882_p8 = por %p2881_p7, %p2880_p6 }
  0x34   :  { %p2883_p9 = pnand %p2882_p8, %p2876_p5 }
  0x36   :  { %2886 = shalt.err (!%p2883_p9)
}
  0x37   :  { %102 = dma.hbm_to_vmem [thread:$0]  %s3900_s10, 256, %s97_s21, [#allocation14], %s3032_s28, %s3032_s28, %s3033_s29  }
  0x38   :  { %s3036_s26 = smov [#allocation4]   ;;  %s3037_s3 = smov [#allocation9]  }
  0x39   :  { %s37_s27 = sshll.u32 %s3036_s26, 4  ;;  %s61_s19 = sshll.u32 %s3037_s3, 4  ;;  %s38_s27 = int_to_ptr.vmem [resolvable:$true] %s37_s27  ;;  %s62_s19 = int_to_ptr.vmem [resolvable:$true] %s61_s19 }
  0x3a   :  { %s2887_s15 = scalar_lea.hbm %s3892_s2, 32 }
  0x3b   :  { %p2888_p10 = scmp.ne.s32.totalorder %s3892_s2, %s2887_s15  ;;  %p2891_p11 = scmp.lt.u32.totalorder %s2887_s15, %s3892_s2 }
  0x3d   :  { %p2893_p12 = pnand %p2891_p11, %p2888_p10 }
  0x3f   :  { %2896 = shalt.err (!%p2893_p12)
}
  0x40   :  { %s2897_s10 = scalar_lea.vmem %s38_s27, 32  ;;  %p2902_p0 = scmp.lt.s32.totalorder %s38_s27, %s38_s27 }
  0x41   :  { %p2898_p13 = scmp.ne.s32.totalorder %s38_s27, %s2897_s10  ;;  %p2903_p1 = scmp.lt.s32.totalorder %s2897_s10, %s2897_s10 }
  0x43   :  { %p2904_p2 = por %p2903_p1, %p2902_p0 }
  0x45   :  { %p2905_p3 = pnand %p2904_p2, %p2898_p13 }
  0x47   :  { %2908 = shalt.err (!%p2905_p3)
}
  0x48   :  { %40 = dma.hbm_to_vmem [thread:$0]  %s3892_s2, 32, %s38_s27, [#allocation5]  }
  0x49   :  { %s2909_s18 = scalar_lea.hbm %s3895_s5, 32 }
  0x4a   :  { %p2910_p4 = scmp.ne.s32.totalorder %s3895_s5, %s2909_s18  ;;  %p2913_p5 = scmp.lt.u32.totalorder %s2909_s18, %s3895_s5 }
  0x4c   :  { %p2915_p6 = pnand %p2913_p5, %p2910_p4 }
  0x4e   :  { %2918 = shalt.err (!%p2915_p6)
}
  0x4f   :  { %s2919_s15 = scalar_lea.vmem %s62_s19, 32  ;;  %p2924_p8 = scmp.lt.s32.totalorder %s62_s19, %s62_s19 }
  0x50   :  { %p2920_p7 = scmp.ne.s32.totalorder %s62_s19, %s2919_s15  ;;  %p2925_p9 = scmp.lt.s32.totalorder %s2919_s15, %s2919_s15 }
  0x52   :  { %p2926_p10 = por %p2925_p9, %p2924_p8 }
  0x54   :  { %p2927_p11 = pnand %p2926_p10, %p2920_p7 }
  0x56   :  { %2930 = shalt.err (!%p2927_p11)
}
  0x57   :  { %64 = dma.hbm_to_vmem [thread:$0]  %s3895_s5, 32, %s62_s19, [#allocation8]  }
  0x58   :  { %s3038_s17 = smov [#allocation12]   ;;  %s3039_s22 = smov [#allocation15]  }
  0x59   :  { %s87_s20 = sshll.u32 %s3038_s17, 4  ;;  %s110_s23 = sshll.u32 %s3039_s22, 4  ;;  %s88_s20 = int_to_ptr.vmem [resolvable:$true] %s87_s20  ;;  %s111_s23 = int_to_ptr.vmem [resolvable:$true] %s110_s23 }
  0x5a   :  { %s2931_s24 = scalar_lea.hbm %s3899_s9, 16 }
  0x5b   :  { %p2932_p12 = scmp.ne.s32.totalorder %s3899_s9, %s2931_s24  ;;  %p2935_p13 = scmp.lt.u32.totalorder %s2931_s24, %s3899_s9 }
  0x5d   :  { %p2937_p0 = pnand %p2935_p13, %p2932_p12 }
  0x5f   :  { %2940 = shalt.err (!%p2937_p0)
}
  0x60   :  { %s2941_s5 = scalar_lea.vmem %s88_s20, 16  ;;  %s2945_s19 = scalar_lea.vmem %s88_s20, 32 }
  0x61   :  { %p2942_p1 = scmp.ne.s32.totalorder %s88_s20, %s2941_s5  ;;  %p2946_p2 = scmp.lt.s32.totalorder %s88_s20, %s88_s20 }
  0x62   :  { %p2947_p3 = scmp.lt.s32.totalorder %s2945_s19, %s2941_s5 }
  0x64   :  { %p2948_p4 = por %p2947_p3, %p2946_p2 }
  0x66   :  { %p2949_p5 = pnand %p2948_p4, %p2942_p1 }
  0x68   :  { %2952 = shalt.err (!%p2949_p5)
}
  0x69   :  { %90 = dma.hbm_to_vmem [thread:$0]  %s3899_s9, 16, %s88_s20, [#allocation11]  }
  0x6a   :  { %s2953_s2 = scalar_lea.hbm %s3902_s12, 256 }
  0x6b   :  { %p2954_p6 = scmp.ne.s32.totalorder %s3902_s12, %s2953_s2  ;;  %p2957_p7 = scmp.lt.u32.totalorder %s2953_s2, %s3902_s12 }
  0x6d   :  { %p2959_p8 = pnand %p2957_p7, %p2954_p6 }
  0x6f   :  { %2962 = shalt.err (!%p2959_p8)
}
  0x70   :  { %s2963_s21 = scalar_lea.vmem %s111_s23, 256  ;;  %p2968_p10 = scmp.lt.s32.totalorder %s111_s23, %s111_s23 }
  0x71   :  { %p2964_p9 = scmp.ne.s32.totalorder %s111_s23, %s2963_s21  ;;  %p2969_p11 = scmp.lt.s32.totalorder %s2963_s21, %s2963_s21 }
  0x73   :  { %p2970_p12 = por %p2969_p11, %p2968_p10 }
  0x75   :  { %p2971_p13 = pnand %p2970_p12, %p2964_p9 }
  0x77   :  { %2974 = shalt.err (!%p2971_p13)
}
  0x78   :  { %116 = dma.hbm_to_vmem [thread:$0]  %s3902_s12, 256, %s111_s23, [#allocation14], %s3032_s28, %s3032_s28, %s3033_s29  }
  0x79   :  { %3019 = dma.done.wait [#allocation5], 32  }
  0x7a   :  { %3020 = vsyncadd [#allocation5], 4294967264 }
  0x7b   :  { %3021 = dma.done.wait [#allocation8], 288  }
  0x7c   :  { %3022 = vsyncadd [#allocation8], 4294967008 }
  0x7d   :  { %3023 = dma.done.wait [#allocation11], 272  }
  0x7e   :  { %3024 = vsyncadd [#allocation11], 4294967024 }
  0x7f   :  { %3025 = dma.done.wait [#allocation14], 512  }
  0x80   :  { %3026 = vsyncadd [#allocation14], 4294966784  ;;  %v3040_v0 = vmov 0   ;;  %v3041_v1 = vmov 0.0   ;;  %vm3042_vm0 = vmmov 0   ;;  %v2621_v4 = vld [vmem:[%s3890_s0] sm:$0xff]   ;;  %v153_v10 = vlaneseq }
  0x81   :  { %238 = vmatprep.mubr.bf16.mxu0 %v3040_v0  ;;  %2444 = vmatprep.subr.bf16.mxu1 %v3041_v1  ;;  %v2618_v2 = vld [vmem:[%s3891_s1 + $0x4] ss:$8 sps:$4 sm:$0xff]   ;;  %v2620_v3 = vld [vmem:[%s3891_s1] ss:$8 sps:$4 sm:$0xff]   ;;  %vm193_vm1 = vcmask 130048   ;;  %v2624_v8 = vld [vmem:[%s3890_s0 + $0x10] sm:$0xff]  }
  0x82   :  { %2448 = vmatprep.mubr.msk.bf16.mxu1 %vm3042_vm0, %v3041_v1  ;;  %206 = vmatprep.subr.bf16.mxu0 %v2618_v2  ;;  %v3238_v5 = vld [vmem:[#allocation7] sm:$0xff]   ;;  %v3246_v6 = vld [vmem:[#allocation7 + $0x8] sm:$0xff]   ;;  %v2626_v9 = vld [vmem:[%s3890_s0 + $0x18] sm:$0xff]   ;;  %v3276_v11 = vshrl.u32 %v153_v10, 7  ;;  %vm312_vm2 = vcmask 261120   ;;  %vm1295_vm3 = vcmask 523520  }
  0x83   :  { %207 = vmatpush1.bf16.msra.mxu0 %v2620_v3  ;;  %2445 = vmatpush3.bf16.msra.mxu1 %v3238_v5  ;;  %v2623_v7 = vld [vmem:[%s3890_s0 + $0x8] sm:$0xff]   ;;  %v151_v13 = vld [vmem:[#allocation4] sm:$0x3]  ;;  %s3043_s0 = smov 32  }
  0x84   :  { %2436 = vmatprep.subr.bf16.mxu0 %v3041_v1  ;;  %2446 = vmatprep.subr.bf16.mxu1 %v3041_v1  ;;  %v155_v12 = vsub.s32 0, %v3276_v11  ;;  %v159_v14 = vsub.s32 1, %v3276_v11 }
  0x86   :  { %2324 = vmatmul.mubr.msk.bf16.vlgmr.msra.gmra.mrb[0].mxu0 %vm193_vm1, %v2621_v4  ;;  %v156_v16 = vrot.slane %v151_v13, %v155_v12  ;;  %v3286_v18 = vrot.slane %v151_v13, %v159_v14 }
  0x87   :  { %2437 = vmatpush3.bf16.msra.mxu0 %v3238_v5  ;;  %248 = vmatprep.mubr.bf16.mxu0 %v3040_v0 }
  0x88   :  { %2438 = vmatprep.subr.bf16.mxu0 %v3041_v1  ;;  %2447 = vmatpush3.bf16.msra.mxu1 %v3246_v6 }
  0x89   :  { %2452 = vmatprep.subr.bf16.mxu1 %v3041_v1 }
  0x8b   :  { %2439 = vmatpush3.bf16.msra.mxu0 %v3246_v6 }
  0x8c   :  { %2468 = vmatprep.subr.bf16.mxu0 %v3041_v1 }
  0x8e   :  { %2325 = vmatmul.mubr.msk.bf16.gmra.mrb[4].mxu0 %vm193_vm1, %v2623_v7 }
  0x8f   :  { %258 = vmatprep.mubr.bf16.mxu0 %v3040_v0 }
  0x96   :  { %2326 = vmatmul.mubr.msk.bf16.gmra.mrb[8].mxu0 %vm193_vm1, %v2624_v8 }
  0x97   :  { %268 = vmatprep.mubr.bf16.mxu0 %v3040_v0 }
  0x9e   :  { %2327 = vmatmul.mubr.msk.bf16.gmra.mrb[12].mxu0 %vm193_vm1, %v2626_v9 }
  0x9f   :  { %2440 = vmatprep.mubr.msk.bf16.mxu0 %vm3042_vm0, %v3041_v1 }
  0xa6   :  { %2441 = vmatmul.mubr.bf16.vlgmr.msra.gmra.mrb[16].mxu0 %v3040_v0 }
  0xa7   :  { %2469 = vmatpush3.bf16.msra.mxu0 %v3238_v5  ;;  %2472 = vmatprep.mubr.msk.bf16.mxu0 %vm3042_vm0, %v3041_v1 }
  0xa8   :  { %2470 = vmatprep.subr.bf16.mxu0 %v3041_v1 }
  0xab   :  { %2471 = vmatpush3.bf16.msra.mxu0 %v3246_v6 }
  0xac   :  { %2484 = vmatprep.subr.bf16.mxu0 %v3041_v1 }
 0x159   :  { %v240_v15 = vpop.f32.mrb[0].mxu0 }
 0x15a   :  { %v3282_v17 = vpop.f32.mrb[1].mxu0  ;;  %v241_v47 = vadd.f32 %v240_v15, %v156_v16 }
 0x15b   :  { %v244_v19 = vpop.f32.mrb[2].mxu0 }
 0x15c   :  { %v3288_v20 = vadd.f32 %v244_v19, %v156_v16  ;;  %v246_v21 = vpop.f32.mrb[3].mxu0 }
 0x15d   :  { %v3291_v22 = vadd.f32 %v246_v21, %v3286_v18 }
 0x161   :  { %v250_v23 = vpop.f32.mrb[4].mxu0 }
 0x162   :  { %v3293_v24 = vadd.f32 %v250_v23, %v156_v16  ;;  %v252_v25 = vpop.f32.mrb[5].mxu0 }
 0x163   :  { %v3296_v26 = vadd.f32 %v252_v25, %v3286_v18  ;;  %v254_v27 = vpop.f32.mrb[6].mxu0 }
 0x164   :  { %v3298_v28 = vadd.f32 %v254_v27, %v156_v16  ;;  %v256_v29 = vpop.f32.mrb[7].mxu0 }
 0x165   :  { %v3301_v30 = vadd.f32 %v256_v29, %v3286_v18 }
 0x169   :  { %v260_v31 = vpop.f32.mrb[8].mxu0 }
 0x16a   :  { %v3303_v32 = vadd.f32 %v260_v31, %v156_v16  ;;  %v262_v33 = vpop.f32.mrb[9].mxu0 }
 0x16b   :  { %v3306_v34 = vadd.f32 %v262_v33, %v3286_v18  ;;  %v264_v35 = vpop.f32.mrb[10].mxu0 }
 0x16c   :  { %v3308_v36 = vadd.f32 %v264_v35, %v156_v16  ;;  %v266_v37 = vpop.f32.mrb[11].mxu0 }
 0x16d   :  { %v3311_v38 = vadd.f32 %v266_v37, %v3286_v18 }
 0x171   :  { %v270_v39 = vpop.f32.mrb[12].mxu0 }
 0x172   :  { %v3313_v40 = vadd.f32 %v270_v39, %v156_v16  ;;  %v272_v41 = vpop.f32.mrb[13].mxu0 }
 0x173   :  { %v3316_v42 = vadd.f32 %v272_v41, %v3286_v18  ;;  %v274_v43 = vpop.f32.mrb[14].mxu0 }
 0x174   :  { %v3318_v44 = vadd.f32 %v274_v43, %v156_v16  ;;  %v276_v45 = vpop.f32.mrb[15].mxu0 }
 0x175   :  { %v3321_v46 = vadd.f32 %v276_v45, %v3286_v18 }
 0x179   :  { %v350_v48 = vpop.f32.mrb[16].mxu0 }
 0x17a   :  { %v356_v49 = vadd.f32 %v350_v48, %v241_v47  ;;  %v2442_v50 = vpop.f32.mrb[17].mxu0 }
 0x17b   :  { %v353_v51 = vpop.f32.mrb[18].mxu0 }
 0x17c   :  { %v2443_v52 = vpop.f32.mrb[19].mxu0  ;;  %2643 = vtanh.f32 %v356_v49  ;;  %v357_v54 = vmul.f32 0.5, %v356_v49 }
 0x17e   :  { %2645 = vtanh.f32 %v357_v54 }
 0x186   :  { %v2644_v53 = vpop.eup %2643 }
 0x187   :  { %364 = vrot.lane.b32.xlu0 %v2644_v53, %s3032_s28 }
 0x188   :  { %v2646_v55 = vpop.eup %2645 }
 0x189   :  { %v359_v56 = vmul.f32 0.5, %v2646_v55 }
 0x18b   :  { %v360_v57 = vadd.f32 0.5, %v359_v56 }
 0x18d   :  { %v362_v60 = vmul.f32 0.0, %v360_v57 }
 0x1f9   :  { %v365_v58 = vpop.permute.xlu0 %364 }
 0x1fa   :  { %v367_v59 = vmul.f32 %v365_v58, %v360_v57 }
 0x1fc   :  { %369 = vrot.lane.b32.xlu0 %v367_v59, %s3043_s0 }
 0x26e   :  { %v370_v61 = vpop.permute.xlu0 %369 }
 0x26f   :  { %v372_v62 = vadd.f32 %v370_v61, %v362_v60 }
 0x271   :  { %2647 = vtanh.f32 %v372_v62 }
 0x27b   :  { %v2648_v63 = vpop.eup %2647 }
 0x27c   :  { %375 = vrot.lane.b32.xlu1 %v2648_v63, %s3032_s28 }
 0x2ee   :  { %v376_v2 = vpop.permute.xlu1 %375 }
 0x2ef   :  { %v3326_v3 = vmul.f32 %v376_v2, %v360_v57 }
 0x2f1   :  { %v385_v4 = vpack.c.bf16 %v3326_v3, %v3326_v3 }
 0x2f3   :  { %387 = vrot.lane.b32.xlu1 %v385_v4, %s3043_s0 }
 0x365   :  { %v388_v7 = vpop.permute.xlu1 %387 }
 0x366   :  { %2449 = vmatmul.mubr.msk.bf16.vlgmr.msra.gmra.mrb[0].mxu1 %vm312_vm2, %v388_v7 }
 0x367   :  { %2453 = vmatpush3.bf16.msra.mxu1 %v3238_v5  ;;  %2456 = vmatprep.mubr.msk.bf16.mxu1 %vm3042_vm0, %v3041_v1 }
 0x368   :  { %2454 = vmatprep.subr.bf16.mxu1 %v3041_v1 }
 0x36b   :  { %2455 = vmatpush3.bf16.msra.mxu1 %v3246_v6 }
 0x36c   :  { %2460 = vmatprep.subr.bf16.mxu1 %v3041_v1 }
 0x439   :  { %v426_v8 = vpop.f32.mrb[0].mxu1 }
 0x43a   :  { %v432_v9 = vadd.f32 %v426_v8, %v3288_v20  ;;  %v2450_v10 = vpop.f32.mrb[1].mxu1 }
 0x43b   :  { %v429_v13 = vpop.f32.mrb[2].mxu1 }
 0x43c   :  { %2649 = vtanh.f32 %v432_v9  ;;  %v2451_v15 = vpop.f32.mrb[3].mxu1  ;;  %v433_v19 = vmul.f32 0.5, %v432_v9 }
 0x43e   :  { %2651 = vtanh.f32 %v433_v19 }
 0x446   :  { %v2650_v16 = vpop.eup %2649 }
 0x447   :  { %440 = vrot.lane.b32.xlu0 %v2650_v16, %s3032_s28 }
 0x448   :  { %v2652_v21 = vpop.eup %2651 }
 0x449   :  { %v435_v23 = vmul.f32 0.5, %v2652_v21 }
 0x44b   :  { %v436_v25 = vadd.f32 0.5, %v435_v23 }
 0x44d   :  { %v438_v31 = vmul.f32 %v436_v25, %v372_v62 }
 0x4b9   :  { %v441_v27 = vpop.permute.xlu0 %440 }
 0x4ba   :  { %v443_v29 = vmul.f32 %v441_v27, %v436_v25 }
 0x4bc   :  { %445 = vrot.lane.b32.xlu1 %v443_v29, %s3043_s0 }
 0x52e   :  { %v446_v33 = vpop.permute.xlu1 %445 }
 0x52f   :  { %v448_v35 = vadd.f32 %v446_v33, %v438_v31 }
 0x531   :  { %2653 = vtanh.f32 %v448_v35 }
 0x53b   :  { %v2654_v20 = vpop.eup %2653 }
 0x53c   :  { %451 = vrot.lane.b32.xlu0 %v2654_v20, %s3032_s28 }
 0x5ae   :  { %v452_v37 = vpop.permute.xlu0 %451 }
 0x5af   :  { %v3342_v39 = vmul.f32 %v452_v37, %v436_v25 }
 0x5b1   :  { %v461_v41 = vpack.c.bf16 %v3342_v39, %v3342_v39 }
 0x5b3   :  { %463 = vrot.lane.b32.xlu1 %v461_v41, %s3043_s0 }
 0x625   :  { %v464_v43 = vpop.permute.xlu1 %463 }
 0x626   :  { %2457 = vmatmul.mubr.msk.bf16.vlgmr.msra.gmra.mrb[4].mxu1 %vm312_vm2, %v464_v43 }
 0x627   :  { %2461 = vmatpush3.bf16.msra.mxu1 %v3238_v5  ;;  %2464 = vmatprep.mubr.msk.bf16.mxu1 %vm3042_vm0, %v3041_v1 }
 0x628   :  { %2462 = vmatprep.subr.bf16.mxu1 %v3041_v1 }
 0x62b   :  { %2463 = vmatpush3.bf16.msra.mxu1 %v3246_v6 }
 0x62c   :  { %2476 = vmatprep.subr.bf16.mxu1 %v3041_v1 }
 0x6f9   :  { %v502_v45 = vpop.f32.mrb[4].mxu1 }
 0x6fa   :  { %v508_v47 = vadd.f32 %v502_v45, %v3293_v24  ;;  %v2458_v48 = vpop.f32.mrb[5].mxu1 }
 0x6fb   :  { %v505_v49 = vpop.f32.mrb[6].mxu1 }
 0x6fc   :  { %2655 = vtanh.f32 %v508_v47  ;;  %v2459_v50 = vpop.f32.mrb[7].mxu1  ;;  %v509_v52 = vmul.f32 0.5, %v508_v47 }
 0x6fe   :  { %2657 = vtanh.f32 %v509_v52 }
 0x706   :  { %v2656_v51 = vpop.eup %2655 }
 0x707   :  { %516 = vrot.lane.b32.xlu0 %v2656_v51, %s3032_s28 }
 0x708   :  { %v2658_v53 = vpop.eup %2657 }
 0x709   :  { %v511_v54 = vmul.f32 0.5, %v2658_v53 }
 0x70b   :  { %v512_v55 = vadd.f32 0.5, %v511_v54 }
 0x70d   :  { %v514_v58 = vmul.f32 %v512_v55, %v448_v35 }
 0x779   :  { %v517_v56 = vpop.permute.xlu0 %516 }
 0x77a   :  { %v519_v57 = vmul.f32 %v517_v56, %v512_v55 }
 0x77c   :  { %521 = vrot.lane.b32.xlu1 %v519_v57, %s3043_s0 }
 0x7ee   :  { %v522_v59 = vpop.permute.xlu1 %521 }
 0x7ef   :  { %v524_v60 = vadd.f32 %v522_v59, %v514_v58 }
 0x7f1   :  { %2659 = vtanh.f32 %v524_v60 }
 0x7fb   :  { %v2660_v24 = vpop.eup %2659 }
 0x7fc   :  { %527 = vrot.lane.b32.xlu0 %v2660_v24, %s3032_s28 }
 0x86e   :  { %v528_v61 = vpop.permute.xlu0 %527 }
 0x86f   :  { %v3358_v62 = vmul.f32 %v528_v61, %v512_v55 }
 0x871   :  { %v537_v63 = vpack.c.bf16 %v3358_v62, %v3358_v62 }
 0x873   :  { %539 = vrot.lane.b32.xlu1 %v537_v63, %s3043_s0 }
 0x8e5   :  { %v540_v2 = vpop.permute.xlu1 %539 }
 0x8e6   :  { %2465 = vmatmul.mubr.msk.bf16.vlgmr.msra.gmra.mrb[8].mxu1 %vm312_vm2, %v540_v2 }
 0x8e7   :  { %2477 = vmatpush3.bf16.msra.mxu1 %v3238_v5  ;;  %2480 = vmatprep.mubr.msk.bf16.mxu1 %vm3042_vm0, %v3041_v1 }
 0x8e8   :  { %2478 = vmatprep.subr.bf16.mxu1 %v3041_v1 }
 0x8eb   :  { %2479 = vmatpush3.bf16.msra.mxu1 %v3246_v6 }
 0x8ec   :  { %2492 = vmatprep.subr.bf16.mxu1 %v3041_v1 }
 0x9b9   :  { %v578_v4 = vpop.f32.mrb[8].mxu1 }
 0x9ba   :  { %v584_v7 = vadd.f32 %v578_v4, %v3298_v28  ;;  %v2466_v8 = vpop.f32.mrb[9].mxu1 }
 0x9bb   :  { %v581_v9 = vpop.f32.mrb[10].mxu1 }
 0x9bc   :  { %2661 = vtanh.f32 %v584_v7  ;;  %v2467_v10 = vpop.f32.mrb[11].mxu1  ;;  %v585_v15 = vmul.f32 0.5, %v584_v7 }
 0x9be   :  { %2663 = vtanh.f32 %v585_v15 }
 0x9c6   :  { %v2662_v13 = vpop.eup %2661 }
 0x9c7   :  { %592 = vrot.lane.b32.xlu0 %v2662_v13, %s3032_s28 }
 0x9c8   :  { %v2664_v16 = vpop.eup %2663 }
 0x9c9   :  { %v587_v19 = vmul.f32 0.5, %v2664_v16 }
 0x9cb   :  { %v588_v21 = vadd.f32 0.5, %v587_v19 }
 0x9cd   :  { %v590_v27 = vmul.f32 %v588_v21, %v524_v60 }
 0xa39   :  { %v593_v23 = vpop.permute.xlu0 %592 }
 0xa3a   :  { %v595_v25 = vmul.f32 %v593_v23, %v588_v21 }
 0xa3c   :  { %597 = vrot.lane.b32.xlu1 %v595_v25, %s3043_s0 }
 0xaae   :  { %v598_v29 = vpop.permute.xlu1 %597 }
 0xaaf   :  { %v600_v31 = vadd.f32 %v598_v29, %v590_v27 }
 0xab1   :  { %2665 = vtanh.f32 %v600_v31 }
 0xabb   :  { %v2666_v28 = vpop.eup %2665 }
 0xabc   :  { %603 = vrot.lane.b32.xlu0 %v2666_v28, %s3032_s28 }
 0xb2e   :  { %v604_v33 = vpop.permute.xlu0 %603 }
 0xb2f   :  { %v3374_v35 = vmul.f32 %v604_v33, %v588_v21 }
 0xb31   :  { %v613_v20 = vpack.c.bf16 %v3374_v35, %v3374_v35 }
 0xb33   :  { %615 = vrot.lane.b32.xlu1 %v613_v20, %s3043_s0 }
 0xba5   :  { %v616_v37 = vpop.permute.xlu1 %615 }
 0xba6   :  { %2473 = vmatmul.mubr.msk.bf16.vlgmr.msra.gmra.mrb[20].mxu0 %vm312_vm2, %v616_v37 }
 0xba7   :  { %2485 = vmatpush3.bf16.msra.mxu0 %v3238_v5  ;;  %2488 = vmatprep.mubr.msk.bf16.mxu0 %vm3042_vm0, %v3041_v1 }
 0xba8   :  { %2486 = vmatprep.subr.bf16.mxu0 %v3041_v1 }
 0xbab   :  { %2487 = vmatpush3.bf16.msra.mxu0 %v3246_v6 }
 0xc79   :  { %v654_v41 = vpop.f32.mrb[20].mxu0 }
 0xc7a   :  { %v660_v43 = vadd.f32 %v654_v41, %v3303_v32  ;;  %v2474_v45 = vpop.f32.mrb[21].mxu0 }
 0xc7b   :  { %v657_v47 = vpop.f32.mrb[22].mxu0 }
 0xc7c   :  { %2667 = vtanh.f32 %v660_v43  ;;  %v2475_v48 = vpop.f32.mrb[23].mxu0  ;;  %v661_v50 = vmul.f32 0.5, %v660_v43 }
 0xc7e   :  { %2669 = vtanh.f32 %v661_v50 }
 0xc86   :  { %v2668_v49 = vpop.eup %2667 }
 0xc87   :  { %668 = vrot.lane.b32.xlu0 %v2668_v49, %s3032_s28 }
 0xc88   :  { %v2670_v51 = vpop.eup %2669 }
 0xc89   :  { %v663_v52 = vmul.f32 0.5, %v2670_v51 }
 0xc8b   :  { %v664_v53 = vadd.f32 0.5, %v663_v52 }
 0xc8d   :  { %v666_v56 = vmul.f32 %v664_v53, %v600_v31 }
 0xcf9   :  { %v669_v54 = vpop.permute.xlu0 %668 }
 0xcfa   :  { %v671_v55 = vmul.f32 %v669_v54, %v664_v53 }
 0xcfc   :  { %673 = vrot.lane.b32.xlu1 %v671_v55, %s3043_s0 }
 0xd6e   :  { %v674_v57 = vpop.permute.xlu1 %673 }
 0xd6f   :  { %v676_v58 = vadd.f32 %v674_v57, %v666_v56 }
 0xd71   :  { %2671 = vtanh.f32 %v676_v58 }
 0xd7b   :  { %v2672_v32 = vpop.eup %2671 }
 0xd7c   :  { %679 = vrot.lane.b32.xlu0 %v2672_v32, %s3032_s28 }
 0xdee   :  { %v680_v59 = vpop.permute.xlu0 %679 }
 0xdef   :  { %v3389_v60 = vmul.f32 %v680_v59, %v664_v53 }
 0xdf1   :  { %v689_v24 = vpack.c.bf16 %v3389_v60, %v3389_v60 }
 0xdf3   :  { %691 = vrot.lane.b32.xlu1 %v689_v24, %s3043_s0 }
 0xe65   :  { %v692_v61 = vpop.permute.xlu1 %691 }
 0xe66   :  { %2481 = vmatmul.mubr.msk.bf16.vlgmr.msra.gmra.mrb[12].mxu1 %vm312_vm2, %v692_v61 }
 0xe67   :  { %2493 = vmatpush3.bf16.msra.mxu1 %v3238_v5  ;;  %2496 = vmatprep.mubr.msk.bf16.mxu1 %vm3042_vm0, %v3041_v1 }
 0xe68   :  { %2494 = vmatprep.subr.bf16.mxu1 %v3041_v1 }
 0xe6b   :  { %2495 = vmatpush3.bf16.msra.mxu1 %v3246_v6 }
 0xe6c   :  { %2500 = vmatprep.subr.bf16.mxu1 %v3041_v1 }
 0xf39   :  { %v730_v63 = vpop.f32.mrb[12].mxu1 }
 0xf3a   :  { %v736_v2 = vadd.f32 %v730_v63, %v3308_v36  ;;  %v2482_v4 = vpop.f32.mrb[13].mxu1 }
 0xf3b   :  { %v733_v7 = vpop.f32.mrb[14].mxu1 }
 0xf3c   :  { %2673 = vtanh.f32 %v736_v2  ;;  %v2483_v8 = vpop.f32.mrb[15].mxu1  ;;  %v737_v5 = vmul.f32 0.5, %v736_v2 }
 0xf3e   :  { %2675 = vtanh.f32 %v737_v5 }
 0xf46   :  { %v2674_v9 = vpop.eup %2673 }
 0xf47   :  { %744 = vrot.lane.b32.xlu0 %v2674_v9, %s3032_s28 }
 0xf48   :  { %v2676_v10 = vpop.eup %2675 }
 0xf49   :  { %v739_v13 = vmul.f32 0.5, %v2676_v10 }
 0xf4b   :  { %v740_v15 = vadd.f32 0.5, %v739_v13 }
 0xf4d   :  { %v742_v6 = vmul.f32 %v740_v15, %v676_v58 }
 0xfb9   :  { %v745_v16 = vpop.permute.xlu0 %744 }
 0xfba   :  { %v747_v19 = vmul.f32 %v745_v16, %v740_v15 }
 0xfbc   :  { %749 = vrot.lane.b32.xlu1 %v747_v19, %s3043_s0  ;;  %v2630_v19 = vld [vmem:[%s3894_s4 + $0x10] ss:$8 sps:$4 sm:$0xff]  }
0x102e   :  { %v750_v21 = vpop.permute.xlu1 %749 }
0x102f   :  { %v752_v23 = vadd.f32 %v750_v21, %v742_v6  ;;  %v2632_v6 = vld [vmem:[%s3894_s4 + $0x14] ss:$8 sps:$4 sm:$0xff]  }
0x1031   :  { %2677 = vtanh.f32 %v752_v23 }
0x103b   :  { %v2678_v36 = vpop.eup %2677 }
0x103c   :  { %755 = vrot.lane.b32.xlu0 %v2678_v36, %s3032_s28 }
0x10ae   :  { %v756_v25 = vpop.permute.xlu0 %755 }
0x10af   :  { %v3405_v27 = vmul.f32 %v756_v25, %v740_v15  ;;  %v2633_v25 = vld [vmem:[#allocation10] sm:$0xff]  }
0x10b1   :  { %v765_v29 = vpack.c.bf16 %v3405_v27, %v3405_v27 }
0x10b3   :  { %767 = vrot.lane.b32.xlu1 %v765_v29, %s3043_s0  ;;  %v2634_v29 = vld [vmem:[#allocation10 + $0x8] sm:$0xff]  }
0x1125   :  { %v768_v31 = vpop.permute.xlu1 %767 }
0x1126   :  { %2489 = vmatmul.mubr.msk.bf16.vlgmr.msra.gmra.mrb[24].mxu0 %vm312_vm2, %v768_v31 }
0x1127   :  { %1008 = vmatprep.mubr.bf16.mxu0 %v3040_v0 }
0x11f9   :  { %v806_v28 = vpop.f32.mrb[24].mxu0 }
0x11fa   :  { %v812_v33 = vadd.f32 %v806_v28, %v3313_v40  ;;  %v2490_v20 = vpop.f32.mrb[25].mxu0 }
0x11fb   :  { %v809_v37 = vpop.f32.mrb[26].mxu0 }
0x11fc   :  { %2679 = vtanh.f32 %v812_v33  ;;  %v2491_v41 = vpop.f32.mrb[27].mxu0  ;;  %v813_v45 = vmul.f32 0.5, %v812_v33 }
0x11fe   :  { %2681 = vtanh.f32 %v813_v45 }
0x1206   :  { %v2680_v43 = vpop.eup %2679 }
0x1207   :  { %820 = vrot.lane.b32.xlu0 %v2680_v43, %s3032_s28 }
0x1208   :  { %v2682_v47 = vpop.eup %2681 }
0x1209   :  { %v815_v48 = vmul.f32 0.5, %v2682_v47 }
0x120b   :  { %v816_v49 = vadd.f32 0.5, %v815_v48 }
0x120d   :  { %v818_v52 = vmul.f32 %v816_v49, %v752_v23 }
0x1279   :  { %v821_v50 = vpop.permute.xlu0 %820 }
0x127a   :  { %v823_v51 = vmul.f32 %v821_v50, %v816_v49 }
0x127c   :  { %825 = vrot.lane.b32.xlu1 %v823_v51, %s3043_s0 }
0x12ee   :  { %v826_v53 = vpop.permute.xlu1 %825 }
0x12ef   :  { %v828_v54 = vadd.f32 %v826_v53, %v818_v52 }
0x12f1   :  { %2683 = vtanh.f32 %v828_v54 }
0x12fb   :  { %v2684_v40 = vpop.eup %2683 }
0x12fc   :  { %831 = vrot.lane.b32.xlu0 %v2684_v40, %s3032_s28 }
0x136e   :  { %v832_v55 = vpop.permute.xlu0 %831 }
0x136f   :  { %v834_v56 = vmul.f32 %v832_v55, %v816_v49 }
0x1371   :  { %v841_v57 = vpack.c.bf16 %v834_v56, %v834_v56 }
0x1373   :  { %843 = vrot.lane.b32.xlu1 %v841_v57, %s3043_s0 }
0x13e5   :  { %v844_v58 = vpop.permute.xlu1 %843 }
0x13e6   :  { %2497 = vmatmul.mubr.msk.bf16.vlgmr.msra.gmra.mrb[16].mxu1 %vm312_vm2, %v844_v58 }
0x13e7   :  { %2504 = vmatprep.mubr.msk.bf16.mxu1 %vm3042_vm0, %v3041_v1  ;;  %2501 = vmatpush3.bf16.msra.mxu1 %v2633_v25 }
0x13e8   :  { %2502 = vmatprep.subr.bf16.mxu1 %v3041_v1 }
0x13eb   :  { %2503 = vmatpush3.bf16.msra.mxu1 %v2634_v29 }
0x13ec   :  { %2508 = vmatprep.subr.bf16.mxu1 %v3041_v1 }
0x14b9   :  { %v882_v32 = vpop.f32.mrb[16].mxu1 }
0x14ba   :  { %v888_v59 = vadd.f32 %v882_v32, %v3318_v44  ;;  %v2498_v24 = vpop.f32.mrb[17].mxu1 }
0x14bb   :  { %v885_v61 = vpop.f32.mrb[18].mxu1 }
0x14bc   :  { %2685 = vtanh.f32 %v888_v59  ;;  %v2499_v63 = vpop.f32.mrb[19].mxu1  ;;  %v889_v4 = vmul.f32 0.5, %v888_v59 }
0x14be   :  { %2687 = vtanh.f32 %v889_v4 }
0x14c6   :  { %v2686_v2 = vpop.eup %2685 }
0x14c7   :  { %896 = vrot.lane.b32.xlu0 %v2686_v2, %s3032_s28 }
0x14c8   :  { %v2688_v7 = vpop.eup %2687 }
0x14c9   :  { %v891_v8 = vmul.f32 0.5, %v2688_v7  ;;  %v3492_v7 = vld [vmem:[#allocation9] sm:$0x3] }
0x14cb   :  { %v892_v9 = vadd.f32 0.5, %v891_v8  ;;  %v2345_v8 = vld [vmem:[%s3897_s7] ss:$0 sm:$0xff] }
0x14cd   :  { %v894_v44 = vmul.f32 %v892_v9, %v828_v54 }
0x1539   :  { %v897_v5 = vpop.permute.xlu0 %896 }
0x153a   :  { %v899_v10 = vmul.f32 %v897_v5, %v892_v9 }
0x153c   :  { %901 = vrot.lane.b32.xlu1 %v899_v10, %s3043_s0 }
0x1540   :  { %380 = vrot.lane.b32.xlu1 %v3326_v3, %s3043_s0  ;;  %v2627_v3 = vld [vmem:[%s3894_s4] ss:$8 sps:$4 sm:$0xff]  }
0x1544   :  { %532 = vrot.lane.b32.xlu1 %v3358_v62, %s3043_s0  ;;  %v2629_v62 = vld [vmem:[%s3894_s4 + $0x4] ss:$8 sps:$4 sm:$0xff]  }
0x1545   :  { %976 = vmatprep.subr.bf16.mxu0 %v2629_v62 }
0x1546   :  { %977 = vmatpush1.bf16.msra.mxu0 %v2627_v3 }
0x1547   :  { %978 = vmatprep.subr.bf16.mxu0 %v2632_v6 }
0x1548   :  { %684 = vrot.lane.b32.xlu1 %v3389_v60, %s3043_s0 }
0x154a   :  { %979 = vmatpush1.bf16.msra.mxu0 %v2630_v19 }
0x154b   :  { %2532 = vmatprep.subr.bf16.mxu0 %v3041_v1 }
0x154c   :  { %836 = vrot.lane.b32.xlu1 %v834_v56, %s3043_s0 }
0x15ae   :  { %v902_v13 = vpop.permute.xlu1 %901 }
0x15af   :  { %v3430_v15 = vadd.f32 %v902_v13, %v894_v44 }
0x15b1   :  { %2689 = vtanh.f32 %v3430_v15 }
0x15b2   :  { %v381_v16 = vpop.permute.xlu1 %380 }
0x15b3   :  { %383 = vst.msk [vmem:[#allocation2] sm:$0xff] %vm312_vm2, %v381_v16 }
0x15b6   :  { %v533_v60 = vpop.permute.xlu1 %532 }
0x15b7   :  { %535 = vst.msk [vmem:[#allocation2 + $0x10] sm:$0xff] %vm312_vm2, %v533_v60 }
0x15ba   :  { %v685_v21 = vpop.permute.xlu1 %684  ;;  %v916_v20 = vld [vmem:[#allocation2] sm:$0xff] }
0x15bb   :  { %v2690_v23 = vpop.eup %2689  ;;  %687 = vst.msk [vmem:[#allocation2 + $0x20] sm:$0xff] %vm312_vm2, %v685_v21 }
0x15bc   :  { %907 = vrot.lane.b32.xlu0 %v2690_v23, %s3032_s28 }
0x15be   :  { %v837_v36 = vpop.permute.xlu1 %836  ;;  %v918_v45 = vld [vmem:[#allocation2 + $0x10] sm:$0xff] }
0x15bf   :  { %839 = vst.msk [vmem:[#allocation2 + $0x30] sm:$0xff] %vm312_vm2, %v837_v36 }
0x15c0   :  { %456 = vrot.lane.b32.xlu0 %v3342_v39, %s3043_s0 }
0x15c2   :  { %v920_v49 = vld [vmem:[#allocation2 + $0x20] sm:$0xff] }
0x15c4   :  { %608 = vrot.lane.b32.xlu0 %v3374_v35, %s3043_s0 }
0x15c6   :  { %v922_v53 = vld [vmem:[#allocation2 + $0x30] sm:$0xff] }
0x15c8   :  { %760 = vrot.lane.b32.xlu0 %v3405_v27, %s3043_s0 }
0x162e   :  { %v908_v31 = vpop.permute.xlu0 %907 }
0x162f   :  { %v910_v28 = vmul.f32 %v908_v31, %v892_v9  ;;  %v941_v9 = vrot.slane %v3492_v7, %v159_v14 }
0x1631   :  { %v1137_v33 = vpack.c.bf16 %v910_v28, %v910_v28  ;;  %912 = vrot.lane.b32.xlu0 %v910_v28, %s3043_s0 }
0x1632   :  { %v457_v39 = vpop.permute.xlu0 %456 }
0x1633   :  { %459 = vst.msk [vmem:[#allocation2 + $0x8] sm:$0xff] %vm312_vm2, %v457_v39  ;;  %1150 = vrot.lane.b32.xlu1 %v1137_v33, %s3043_s0 }
0x1636   :  { %v609_v35 = vpop.permute.xlu0 %608 }
0x1637   :  { %611 = vst.msk [vmem:[#allocation2 + $0x18] sm:$0xff] %vm312_vm2, %v609_v35 }
0x163a   :  { %v761_v27 = vpop.permute.xlu0 %760  ;;  %v917_v37 = vld [vmem:[#allocation2 + $0x8] sm:$0xff] }
0x163b   :  { %763 = vst.msk [vmem:[#allocation2 + $0x28] sm:$0xff] %vm312_vm2, %v761_v27  ;;  %v924_v41 = vpack.c.bf16 %v917_v37, %v916_v20 }
0x163d   :  { %2341 = vmatmul.mubr.msk.bf16.vlgmr.msra.gmra.mrb[28].mxu0 %vm312_vm2, %v924_v41 }
0x163e   :  { %1018 = vmatprep.mubr.bf16.mxu0 %v3040_v0  ;;  %v919_v43 = vld [vmem:[#allocation2 + $0x18] sm:$0xff] }
0x163f   :  { %v925_v47 = vpack.c.bf16 %v919_v43, %v918_v45 }
0x1642   :  { %v921_v48 = vld [vmem:[#allocation2 + $0x28] sm:$0xff] }
0x1643   :  { %v926_v50 = vpack.c.bf16 %v921_v48, %v920_v49 }
0x1645   :  { %2342 = vmatmul.mubr.msk.bf16.gmra.mrb[32].mxu0 %vm312_vm2, %v925_v47 }
0x1646   :  { %1028 = vmatprep.mubr.bf16.mxu0 %v3040_v0 }
0x164d   :  { %2343 = vmatmul.mubr.msk.bf16.gmra.mrb[36].mxu0 %vm312_vm2, %v926_v50 }
0x164e   :  { %1038 = vmatprep.mubr.bf16.mxu0 %v3040_v0 }
0x16a3   :  { %v913_v51 = vpop.permute.xlu0 %912 }
0x16a4   :  { %915 = vst.msk [vmem:[#allocation2 + $0x38] sm:$0xff] %vm312_vm2, %v913_v51 }
0x16a5   :  { %v3471_v52 = vpop.permute.xlu1 %1150 }
0x16a6   :  { %2505 = vmatmul.mubr.msk.bf16.vlgmr.msra.gmra.mrb[20].mxu1 %vm312_vm2, %v3471_v52 }
0x16a7   :  { %2512 = vmatprep.mubr.msk.bf16.mxu1 %vm3042_vm0, %v3041_v1 }
0x16ab   :  { %v923_v54 = vld [vmem:[#allocation2 + $0x38] sm:$0xff] }
0x16ac   :  { %v927_v40 = vpack.c.bf16 %v923_v54, %v922_v53 }
0x16ae   :  { %2344 = vmatmul.mubr.msk.bf16.gmra.mrb[40].mxu0 %vm312_vm2, %v927_v40  ;;  %v2635_v40 = vld [vmem:[%s3898_s8] sm:$0xff]  }
0x16af   :  { %2536 = vmatprep.mubr.msk.bf16.mxu0 %vm3042_vm0, %v3041_v1  ;;  %2509 = vmatpush3.bf16.msra.mxu1 %v2635_v40 }
0x16b0   :  { %2510 = vmatprep.subr.bf16.mxu1 %v3041_v1 }
0x1710   :  { %v3480_v0 = vpop.f32.mrb[28].mxu0 }
0x1711   :  { %v1012_v55 = vpop.f32.mrb[29].mxu0 }
0x1712   :  { %v3482_v56 = vpop.f32.mrb[30].mxu0  ;;  %v3500_v16 = vadd.f32 %v1012_v55, %v941_v9  ;;  %v2636_v55 = vld [vmem:[%s3898_s8 + $0x8] sm:$0xff]   ;;  %s3044_s8 = smov 96  }
0x1713   :  { %v1016_v57 = vpop.f32.mrb[31].mxu0  ;;  %2511 = vmatpush3.bf16.msra.mxu1 %v2636_v55 }
0x1714   :  { %v3502_v3 = vadd.f32 %v1016_v57, %v941_v9  ;;  %2516 = vmatprep.subr.bf16.mxu1 %v3041_v1 }
0x1718   :  { %v3484_v58 = vpop.f32.mrb[32].mxu0 }
0x1719   :  { %v1022_v32 = vpop.f32.mrb[33].mxu0 }
0x171a   :  { %v3486_v59 = vpop.f32.mrb[34].mxu0  ;;  %v3504_v19 = vadd.f32 %v1022_v32, %v941_v9 }
0x171b   :  { %v1026_v24 = vpop.f32.mrb[35].mxu0 }
0x171c   :  { %v3516_v28 = vadd.f32 %v1026_v24, %v941_v9 }
0x1720   :  { %v3488_v61 = vpop.f32.mrb[36].mxu0 }
0x1721   :  { %v1032_v63 = vpop.f32.mrb[37].mxu0 }
0x1722   :  { %v3490_v2 = vpop.f32.mrb[38].mxu0  ;;  %v3506_v6 = vadd.f32 %v1032_v63, %v941_v9 }
0x1723   :  { %v1036_v4 = vpop.f32.mrb[39].mxu0 }
0x1724   :  { %v3526_v45 = vadd.f32 %v1036_v4, %v941_v9 }
0x1779   :  { %v1201_v5 = vpop.f32.mrb[20].mxu1 }
0x177a   :  { %v1202_v10 = vadd.f32 %v2345_v8, %v1201_v5  ;;  %v2506_v44 = vpop.f32.mrb[21].mxu1 }
0x177b   :  { %v1204_v13 = vpop.f32.mrb[22].mxu1 }
0x177c   :  { %v1207_v62 = vmul.f32 0.17677669, %v1202_v10  ;;  %v2507_v60 = vpop.f32.mrb[23].mxu1 }
0x177e   :  { %v1209_v21 = vmul.f32 %v1207_v62, %v3502_v3  ;;  %v1208_v23 = vmul.f32 %v1207_v62, %v3500_v16  ;;  %v1212_v25 = vmul.f32 %v1207_v62, %v3506_v6  ;;  %v1210_v29 = vmul.f32 %v1207_v62, %v3504_v19 }
0x177f   :  { %v1211_v41 = vmul.f32 %v1207_v62, %v3516_v28  ;;  %v1213_v50 = vmul.f32 %v1207_v62, %v3526_v45 }
0x1780   :  { %v1219_v14 = vsel %vm312_vm2, %v1209_v21, 0.0  ;;  %v1216_v36 = vsel %vm312_vm2, %v1208_v23, 0.0  ;;  %v1228_v20 = vsel %vm312_vm2, %v1212_v25, 0.0  ;;  %v1222_v37 = vsel %vm312_vm2, %v1210_v29, 0.0 }
0x1781   :  { %v3514_v31 = vpop.f32.mrb[40].mxu0  ;;  %1220 = vadd.xlane.f32.xlu1 %v1219_v14  ;;  %1217 = vadd.xlane.f32.xlu0 %v1216_v36  ;;  %v1225_v49 = vsel %vm312_vm2, %v1211_v41, 0.0  ;;  %v1231_v51 = vsel %vm312_vm2, %v1213_v50, 0.0 }
0x1782   :  { %v1042_v33 = vpop.f32.mrb[41].mxu0 }
0x1783   :  { %v3518_v39 = vadd.f32 %v1042_v33, %v941_v9  ;;  %v3520_v35 = vpop.f32.mrb[42].mxu0 }
0x1784   :  { %v1046_v27 = vpop.f32.mrb[43].mxu0 }
0x1785   :  { %1229 = vadd.xlane.f32.xlu1 %v1228_v20  ;;  %1223 = vadd.xlane.f32.xlu0 %v1222_v37  ;;  %v1214_v43 = vmul.f32 %v1207_v62, %v3518_v39  ;;  %v3529_v48 = vadd.f32 %v1046_v27, %v941_v9 }
0x1787   :  { %v1234_v47 = vsel %vm312_vm2, %v1214_v43, 0.0  ;;  %v1215_v53 = vmul.f32 %v1207_v62, %v3529_v48 }
0x1789   :  { %1235 = vadd.xlane.f32.xlu1 %v1234_v47  ;;  %1226 = vadd.xlane.f32.xlu0 %v1225_v49  ;;  %v1237_v54 = vsel %vm312_vm2, %v1215_v53, 0.0 }
0x178d   :  { %1232 = vadd.xlane.f32.xlu0 %v1231_v51 }
0x1791   :  { %1238 = vadd.xlane.f32.xlu0 %v1237_v54 }
0x180e   :  { %v1218_v57 = vpop.xlane.xlu0 %1217  ;;  %v1221_v32 = vpop.xlane.xlu1 %1220 }
0x1812   :  { %v1224_v24 = vpop.xlane.xlu0 %1223  ;;  %v1230_v63 = vpop.xlane.xlu1 %1229 }
0x1813   :  { %v1240_v44 = vmax.f32 %v1218_v57, %v1230_v63 }
0x1816   :  { %v1227_v4 = vpop.xlane.xlu0 %1226  ;;  %v1236_v9 = vpop.xlane.xlu1 %1235 }
0x1817   :  { %v1242_v13 = vmax.f32 %v1224_v24, %v1236_v9 }
0x181a   :  { %v1233_v8 = vpop.xlane.xlu0 %1232 }
0x181b   :  { %v1241_v5 = vmax.f32 %v1221_v32, %v1233_v8 }
0x181d   :  { %v1244_v60 = vmax.f32 %v1240_v44, %v1241_v5 }
0x181e   :  { %v1239_v10 = vpop.xlane.xlu0 %1238 }
0x181f   :  { %v1243_v62 = vmax.f32 %v1227_v4, %v1239_v10 }
0x1821   :  { %v1245_v21 = vmax.f32 %v1242_v13, %v1243_v62 }
0x1823   :  { %v1246_v23 = vmax.f32 %v1244_v60, %v1245_v21 }
0x1825   :  { %v1247_v14 = vsub.f32 %v1218_v57, %v1246_v23  ;;  %v1248_v36 = vsub.f32 %v1221_v32, %v1246_v23  ;;  %v1249_v25 = vsub.f32 %v1224_v24, %v1246_v23  ;;  %v1250_v29 = vsub.f32 %v1227_v4, %v1246_v23 }
0x1826   :  { %v1251_v20 = vsub.f32 %v1230_v63, %v1246_v23  ;;  %v1252_v41 = vsub.f32 %v1233_v8, %v1246_v23  ;;  %v1253_v47 = vsub.f32 %v1236_v9, %v1246_v23  ;;  %v1254_v50 = vsub.f32 %v1239_v10, %v1246_v23 }
0x1827   :  { %v1255_v33 = vmul.f32 1.442695, %v1247_v14  ;;  %v1257_v27 = vmul.f32 1.442695, %v1248_v36  ;;  %v1259_v37 = vmul.f32 1.442695, %v1249_v25 }
0x1828   :  { %v1261_v43 = vmul.f32 1.442695, %v1250_v29  ;;  %v1263_v49 = vmul.f32 1.442695, %v1251_v20  ;;  %v1265_v51 = vmul.f32 1.442695, %v1252_v41 }
0x1829   :  { %2691 = vpow2.f32 %v1255_v33  ;;  %v1267_v53 = vmul.f32 1.442695, %v1253_v47  ;;  %v1269_v54 = vmul.f32 1.442695, %v1254_v50 }
0x182a   :  { %2693 = vpow2.f32 %v1257_v27 }
0x182b   :  { %2695 = vpow2.f32 %v1259_v37 }
0x182c   :  { %2697 = vpow2.f32 %v1261_v43 }
0x182d   :  { %2699 = vpow2.f32 %v1263_v49 }
0x182e   :  { %2701 = vpow2.f32 %v1265_v51 }
0x182f   :  { %2703 = vpow2.f32 %v1267_v53 }
0x1830   :  { %2705 = vpow2.f32 %v1269_v54 }
0x1833   :  { %v2692_v40 = vpop.eup %2691 }
0x1834   :  { %v2694_v55 = vpop.eup %2693 }
0x1835   :  { %v1271_v57 = vadd.f32 %v2694_v55, %v2692_v40  ;;  %v2696_v32 = vpop.eup %2695 }
0x1836   :  { %v2698_v63 = vpop.eup %2697 }
0x1837   :  { %v1272_v24 = vadd.f32 %v2696_v32, %v1271_v57  ;;  %v2700_v8 = vpop.eup %2699 }
0x1838   :  { %v2702_v5 = vpop.eup %2701 }
0x1839   :  { %v1273_v4 = vadd.f32 %v2698_v63, %v1272_v24  ;;  %v2704_v10 = vpop.eup %2703 }
0x183a   :  { %v2706_v62 = vpop.eup %2705 }
0x183b   :  { %v1274_v9 = vadd.f32 %v2700_v8, %v1273_v4 }
0x183d   :  { %v1275_v44 = vadd.f32 %v2702_v5, %v1274_v9 }
0x183f   :  { %v1276_v13 = vadd.f32 %v2704_v10, %v1275_v44 }
0x1841   :  { %v1277_v60 = vadd.f32 %v2706_v62, %v1276_v13  ;;  %v2349_v13 = vld [vmem:[#allocation12] ss:$0 sm:$0xff] }
0x1843   :  { %2707 = vrcp.f32 %v1277_v60 }
0x184d   :  { %v2708_v21 = vpop.eup %2707 }
0x184e   :  { %v1279_v23 = vmul.f32 %v2708_v21, %v2692_v40  ;;  %v1280_v14 = vmul.f32 %v2708_v21, %v2694_v55  ;;  %v1281_v36 = vmul.f32 %v2708_v21, %v2696_v32  ;;  %v1282_v25 = vmul.f32 %v2708_v21, %v2698_v63 }
0x184f   :  { %v1283_v29 = vmul.f32 %v2708_v21, %v2700_v8  ;;  %v1284_v37 = vmul.f32 %v2708_v21, %v2702_v5  ;;  %v1285_v50 = vmul.f32 %v2708_v21, %v2704_v10  ;;  %v1286_v40 = vmul.f32 %v2708_v21, %v2706_v62  ;;  %v2637_v5 = vld [vmem:[#allocation13] sm:$0xff]  }
0x1850   :  { %v1287_v33 = vmul.f32 %v1279_v23, %v3500_v16  ;;  %v1288_v27 = vmul.f32 %v1280_v14, %v3502_v3  ;;  %v1289_v20 = vmul.f32 %v1281_v36, %v3504_v19  ;;  %v1290_v41 = vmul.f32 %v1282_v25, %v3516_v28  ;;  %v3575_v10 = vld [vmem:[%s3901_s11 + $0x8] sm:$0xff]  }
0x1851   :  { %v1291_v51 = vmul.f32 %v1283_v29, %v3506_v6  ;;  %v1292_v16 = vmul.f32 %v1284_v37, %v3526_v45  ;;  %v1293_v55 = vmul.f32 %v1285_v50, %v3518_v39  ;;  %v1294_v32 = vmul.f32 %v1286_v40, %v3529_v48  ;;  %v2638_v39 = vld [vmem:[#allocation13 + $0x8] sm:$0xff]   ;;  %v3567_v48 = vld [vmem:[%s3901_s11] sm:$0xff]  }
0x1852   :  { %v1296_v43 = vsel %vm1295_vm3, %v1287_v33, 0.0  ;;  %v1297_v47 = vsel %vm1295_vm3, %v1288_v27, 0.0  ;;  %v1299_v53 = vsel %vm1295_vm3, %v1289_v20, 0.0  ;;  %v1301_v3 = vsel %vm1295_vm3, %v1290_v41, 0.0  ;;  %2533 = vmatpush3.bf16.msra.mxu0 %v3567_v48 }
0x1853   :  { %v1298_v49 = vadd.f32 %v1297_v47, %v1296_v43  ;;  %v1303_v28 = vsel %vm1295_vm3, %v1291_v51, 0.0  ;;  %v1305_v24 = vsel %vm1295_vm3, %v1292_v16, 0.0  ;;  %v1307_v6 = vsel %vm1295_vm3, %v1293_v55, 0.0  ;;  %2534 = vmatprep.subr.bf16.mxu0 %v3041_v1 }
0x1854   :  { %v1309_v8 = vsel %vm1295_vm3, %v1294_v32, 0.0  ;;  %v243_v25 = vadd.f32 %v3282_v17, %v3286_v18 }
0x1855   :  { %v1300_v54 = vadd.f32 %v1299_v53, %v1298_v49 }
0x1856   :  { %2535 = vmatpush3.bf16.msra.mxu0 %v3575_v10 }
0x1857   :  { %v1302_v19 = vadd.f32 %v1301_v3, %v1300_v54  ;;  %2548 = vmatprep.subr.bf16.mxu0 %v3041_v1 }
0x1859   :  { %v1304_v57 = vadd.f32 %v1303_v28, %v1302_v19 }
0x185b   :  { %v1306_v63 = vadd.f32 %v1305_v24, %v1304_v57 }
0x185d   :  { %v1308_v4 = vadd.f32 %v1307_v6, %v1306_v63 }
0x185f   :  { %v1310_v9 = vadd.f32 %v1309_v8, %v1308_v4 }
0x1861   :  { %v1311_v45 = vpack.c.bf16 %v1310_v9, %v1310_v9 }
0x1863   :  { %1324 = vrot.lane.b32.xlu1 %v1311_v45, %s3044_s8 }
0x18d5   :  { %v1325_v44 = vpop.permute.xlu1 %1324 }
0x18d6   :  { %2513 = vmatmul.mubr.msk.bf16.vlgmr.msra.gmra.mrb[24].mxu1 %vm312_vm2, %v1325_v44 }
0x18d7   :  { %2517 = vmatpush3.bf16.msra.mxu1 %v2637_v5  ;;  %2520 = vmatprep.mubr.msk.bf16.mxu1 %vm3042_vm0, %v3041_v1 }
0x18d8   :  { %2518 = vmatprep.subr.bf16.mxu1 %v3041_v1 }
0x18db   :  { %2519 = vmatpush3.bf16.msra.mxu1 %v2638_v39 }
0x18dc   :  { %2524 = vmatprep.subr.bf16.mxu1 %v3041_v1 }
0x19a9   :  { %v1375_v62 = vpop.f32.mrb[24].mxu1 }
0x19aa   :  { %v1376_v60 = vadd.f32 %v2349_v13, %v1375_v62  ;;  %v2514_v21 = vpop.f32.mrb[25].mxu1 }
0x19ab   :  { %v1378_v23 = vpop.f32.mrb[26].mxu1 }
0x19ac   :  { %v1381_v14 = vpack.c.bf16 %v1376_v60, %v1376_v60  ;;  %v2515_v36 = vpop.f32.mrb[27].mxu1 }
0x19ae   :  { %2521 = vmatmul.mubr.msk.bf16.vlgmr.msra.gmra.mrb[28].mxu1 %vm312_vm2, %v1381_v14 }
0x19af   :  { %2525 = vmatpush3.bf16.msra.mxu1 %v3567_v48  ;;  %2528 = vmatprep.mubr.msk.bf16.mxu1 %vm3042_vm0, %v3041_v1 }
0x19b0   :  { %2526 = vmatprep.subr.bf16.mxu1 %v3041_v1 }
0x19b3   :  { %2527 = vmatpush3.bf16.msra.mxu1 %v3575_v10 }
0x19b4   :  { %2540 = vmatprep.subr.bf16.mxu1 %v3041_v1 }
0x19b6   :  { %2529 = vmatmul.mubr.msk.bf16.vlgmr.msra.gmra.mrb[32].mxu1 %vm312_vm2, %v3471_v52 }
0x19b7   :  { %2541 = vmatpush3.bf16.msra.mxu1 %v3567_v48  ;;  %2544 = vmatprep.mubr.msk.bf16.mxu1 %vm3042_vm0, %v3041_v1 }
0x19b8   :  { %2542 = vmatprep.subr.bf16.mxu1 %v3041_v1 }
0x19bb   :  { %2543 = vmatpush3.bf16.msra.mxu1 %v3575_v10 }
0x19bc   :  { %2556 = vmatprep.subr.bf16.mxu1 %v3041_v1 }
0x1a81   :  { %v1435_v29 = vpop.f32.mrb[28].mxu1 }
0x1a82   :  { %v2522_v33 = vpop.f32.mrb[29].mxu1  ;;  %v1449_v27 = vadd.f32 %v1435_v29, %v243_v25  ;;  %v1450_v20 = vadd.f32 %v1435_v29, %v3291_v22  ;;  %v3598_v52 = vadd.f32 %v1435_v29, %v3296_v26  ;;  %v3601_v37 = vadd.f32 %v1435_v29, %v3301_v30 }
0x1a83   :  { %v1438_v41 = vpop.f32.mrb[30].mxu1  ;;  %v3604_v43 = vadd.f32 %v1435_v29, %v3306_v34  ;;  %v3607_v47 = vadd.f32 %v1435_v29, %v3311_v38  ;;  %v3610_v17 = vadd.f32 %v1435_v29, %v3316_v42  ;;  %v3613_v18 = vadd.f32 %v1435_v29, %v3321_v46 }
0x1a84   :  { %v2523_v22 = vpop.f32.mrb[31].mxu1 }
0x1a89   :  { %v1516_v49 = vpop.f32.mrb[32].mxu1 }
0x1a8a   :  { %v1522_v26 = vadd.f32 %v1516_v49, %v1449_v27  ;;  %v2530_v50 = vpop.f32.mrb[33].mxu1 }
0x1a8b   :  { %v1519_v51 = vpop.f32.mrb[34].mxu1 }
0x1a8c   :  { %2709 = vtanh.f32 %v1522_v26  ;;  %v2531_v30 = vpop.f32.mrb[35].mxu1  ;;  %v1523_v34 = vmul.f32 0.5, %v1522_v26 }
0x1a8e   :  { %2711 = vtanh.f32 %v1523_v34 }
0x1a96   :  { %v2710_v53 = vpop.eup %2709 }
0x1a97   :  { %1530 = vrot.lane.b32.xlu0 %v2710_v53, %s3032_s28 }
0x1a98   :  { %v2712_v38 = vpop.eup %2711 }
0x1a99   :  { %v1525_v54 = vmul.f32 0.5, %v2712_v38 }
0x1a9b   :  { %v1526_v40 = vadd.f32 0.5, %v1525_v54 }
0x1a9d   :  { %v1528_v46 = vmul.f32 %v1526_v40, %v3430_v15 }
0x1b09   :  { %v1531_v42 = vpop.permute.xlu0 %1530 }
0x1b0a   :  { %v1533_v16 = vmul.f32 %v1531_v42, %v1526_v40 }
0x1b0c   :  { %1535 = vrot.lane.b32.xlu1 %v1533_v16, %s3043_s0 }
0x1b7e   :  { %v1536_v3 = vpop.permute.xlu1 %1535 }
0x1b7f   :  { %v1538_v19 = vadd.f32 %v1536_v3, %v1528_v46 }
0x1b81   :  { %2713 = vtanh.f32 %v1538_v19 }
0x1b8b   :  { %v2714_v55 = vpop.eup %2713 }
0x1b8c   :  { %1541 = vrot.lane.b32.xlu1 %v2714_v55, %s3032_s28 }
0x1bfe   :  { %v1542_v28 = vpop.permute.xlu1 %1541 }
0x1bff   :  { %v3619_v57 = vmul.f32 %v1542_v28, %v1526_v40 }
0x1c01   :  { %v1551_v32 = vpack.c.bf16 %v3619_v57, %v3619_v57 }
0x1c03   :  { %1553 = vrot.lane.b32.xlu0 %v1551_v32, %s3043_s0 }
0x1c75   :  { %v1554_v24 = vpop.permute.xlu0 %1553 }
0x1c76   :  { %2537 = vmatmul.mubr.msk.bf16.vlgmr.msra.gmra.mrb[44].mxu0 %vm312_vm2, %v1554_v24 }
0x1c77   :  { %2549 = vmatpush3.bf16.msra.mxu0 %v3567_v48  ;;  %2552 = vmatprep.mubr.msk.bf16.mxu0 %vm3042_vm0, %v3041_v1 }
0x1c78   :  { %2550 = vmatprep.subr.bf16.mxu0 %v3041_v1 }
0x1c7b   :  { %2551 = vmatpush3.bf16.msra.mxu0 %v3575_v10 }
0x1c7c   :  { %2564 = vmatprep.subr.bf16.mxu0 %v3041_v1 }
0x1d49   :  { %v1592_v15 = vpop.f32.mrb[44].mxu0 }
0x1d4a   :  { %v1598_v63 = vadd.f32 %v1592_v15, %v1450_v20  ;;  %v2538_v6 = vpop.f32.mrb[45].mxu0 }
0x1d4b   :  { %v1595_v4 = vpop.f32.mrb[46].mxu0 }
0x1d4c   :  { %2715 = vtanh.f32 %v1598_v63  ;;  %v2539_v8 = vpop.f32.mrb[47].mxu0  ;;  %v1599_v45 = vmul.f32 0.5, %v1598_v63 }
0x1d4e   :  { %2717 = vtanh.f32 %v1599_v45 }
0x1d56   :  { %v2716_v9 = vpop.eup %2715 }
0x1d57   :  { %1606 = vrot.lane.b32.xlu1 %v2716_v9, %s3032_s28 }
0x1d58   :  { %v2718_v5 = vpop.eup %2717 }
0x1d59   :  { %v1601_v44 = vmul.f32 0.5, %v2718_v5 }
0x1d5b   :  { %v1602_v39 = vadd.f32 0.5, %v1601_v44 }
0x1d5d   :  { %v1604_v60 = vmul.f32 %v1602_v39, %v1538_v19 }
0x1dc9   :  { %v1607_v13 = vpop.permute.xlu1 %1606 }
0x1dca   :  { %v1609_v62 = vmul.f32 %v1607_v13, %v1602_v39 }
0x1dcc   :  { %1611 = vrot.lane.b32.xlu0 %v1609_v62, %s3043_s0 }
0x1e3e   :  { %v1612_v21 = vpop.permute.xlu0 %1611 }
0x1e3f   :  { %v1614_v23 = vadd.f32 %v1612_v21, %v1604_v60 }
0x1e41   :  { %2719 = vtanh.f32 %v1614_v23 }
0x1e4b   :  { %v2720_v14 = vpop.eup %2719 }
0x1e4c   :  { %1617 = vrot.lane.b32.xlu1 %v2720_v14, %s3032_s28 }
0x1ebe   :  { %v1618_v36 = vpop.permute.xlu1 %1617 }
0x1ebf   :  { %v3634_v25 = vmul.f32 %v1618_v36, %v1602_v39 }
0x1ec1   :  { %v1627_v29 = vpack.c.bf16 %v3634_v25, %v3634_v25 }
0x1ec3   :  { %1629 = vrot.lane.b32.xlu0 %v1627_v29, %s3043_s0 }
0x1f35   :  { %v1630_v33 = vpop.permute.xlu0 %1629 }
0x1f36   :  { %2545 = vmatmul.mubr.msk.bf16.vlgmr.msra.gmra.mrb[36].mxu1 %vm312_vm2, %v1630_v33 }
0x1f37   :  { %2557 = vmatpush3.bf16.msra.mxu1 %v3567_v48  ;;  %2560 = vmatprep.mubr.msk.bf16.mxu1 %vm3042_vm0, %v3041_v1 }
0x1f38   :  { %2558 = vmatprep.subr.bf16.mxu1 %v3041_v1 }
0x1f3b   :  { %2559 = vmatpush3.bf16.msra.mxu1 %v3575_v10 }
0x1f3c   :  { %2572 = vmatprep.subr.bf16.mxu1 %v3041_v1 }
0x2009   :  { %v1668_v27 = vpop.f32.mrb[36].mxu1 }
0x200a   :  { %v1674_v20 = vadd.f32 %v1668_v27, %v3598_v52  ;;  %v2546_v41 = vpop.f32.mrb[37].mxu1 }
0x200b   :  { %v1671_v22 = vpop.f32.mrb[38].mxu1 }
0x200c   :  { %2721 = vtanh.f32 %v1674_v20  ;;  %v2547_v49 = vpop.f32.mrb[39].mxu1  ;;  %v1675_v50 = vmul.f32 0.5, %v1674_v20 }
0x200e   :  { %2723 = vtanh.f32 %v1675_v50 }
0x2016   :  { %v2722_v26 = vpop.eup %2721 }
0x2017   :  { %1682 = vrot.lane.b32.xlu1 %v2722_v26, %s3032_s28 }
0x2018   :  { %v2724_v51 = vpop.eup %2723 }
0x2019   :  { %v1677_v30 = vmul.f32 0.5, %v2724_v51 }
0x201b   :  { %v1678_v53 = vadd.f32 0.5, %v1677_v30 }
0x201d   :  { %v1680_v54 = vmul.f32 %v1678_v53, %v1614_v23 }
0x2089   :  { %v1683_v34 = vpop.permute.xlu1 %1682 }
0x208a   :  { %v1685_v38 = vmul.f32 %v1683_v34, %v1678_v53 }
0x208c   :  { %1687 = vrot.lane.b32.xlu0 %v1685_v38, %s3043_s0 }
0x20fe   :  { %v1688_v40 = vpop.permute.xlu0 %1687 }
0x20ff   :  { %v1690_v42 = vadd.f32 %v1688_v40, %v1680_v54 }
0x2101   :  { %2725 = vtanh.f32 %v1690_v42 }
0x210b   :  { %v2726_v52 = vpop.eup %2725 }
0x210c   :  { %1693 = vrot.lane.b32.xlu1 %v2726_v52, %s3032_s28 }
0x217e   :  { %v1694_v16 = vpop.permute.xlu1 %1693 }
0x217f   :  { %v3650_v46 = vmul.f32 %v1694_v16, %v1678_v53 }
0x2181   :  { %v1703_v3 = vpack.c.bf16 %v3650_v46, %v3650_v46 }
0x2183   :  { %1705 = vrot.lane.b32.xlu0 %v1703_v3, %s3043_s0 }
0x21f5   :  { %v1706_v19 = vpop.permute.xlu0 %1705 }
0x21f6   :  { %2553 = vmatmul.mubr.msk.bf16.vlgmr.msra.gmra.mrb[48].mxu0 %vm312_vm2, %v1706_v19 }
0x21f7   :  { %2565 = vmatpush3.bf16.msra.mxu0 %v3567_v48  ;;  %2568 = vmatprep.mubr.msk.bf16.mxu0 %vm3042_vm0, %v3041_v1 }
0x21f8   :  { %2566 = vmatprep.subr.bf16.mxu0 %v3041_v1 }
0x21fb   :  { %2567 = vmatpush3.bf16.msra.mxu0 %v3575_v10 }
0x21fc   :  { %2580 = vmatprep.subr.bf16.mxu0 %v3041_v1 }
0x22c9   :  { %v1744_v55 = vpop.f32.mrb[48].mxu0 }
0x22ca   :  { %v1750_v28 = vadd.f32 %v1744_v55, %v3601_v37  ;;  %v2554_v32 = vpop.f32.mrb[49].mxu0 }
0x22cb   :  { %v1747_v24 = vpop.f32.mrb[50].mxu0 }
0x22cc   :  { %2727 = vtanh.f32 %v1750_v28  ;;  %v2555_v15 = vpop.f32.mrb[51].mxu0  ;;  %v1751_v6 = vmul.f32 0.5, %v1750_v28 }
0x22ce   :  { %2729 = vtanh.f32 %v1751_v6 }
0x22d6   :  { %v2728_v63 = vpop.eup %2727 }
0x22d7   :  { %1758 = vrot.lane.b32.xlu1 %v2728_v63, %s3032_s28 }
0x22d8   :  { %v2730_v4 = vpop.eup %2729 }
0x22d9   :  { %v1753_v8 = vmul.f32 0.5, %v2730_v4 }
0x22db   :  { %v1754_v9 = vadd.f32 0.5, %v1753_v8 }
0x22dd   :  { %v1756_v44 = vmul.f32 %v1754_v9, %v1690_v42 }
0x2349   :  { %v1759_v45 = vpop.permute.xlu1 %1758 }
0x234a   :  { %v1761_v5 = vmul.f32 %v1759_v45, %v1754_v9 }
0x234c   :  { %1763 = vrot.lane.b32.xlu0 %v1761_v5, %s3043_s0 }
0x23be   :  { %v1764_v39 = vpop.permute.xlu0 %1763 }
0x23bf   :  { %v1766_v13 = vadd.f32 %v1764_v39, %v1756_v44 }
0x23c1   :  { %2731 = vtanh.f32 %v1766_v13 }
0x23cb   :  { %v2732_v37 = vpop.eup %2731 }
0x23cc   :  { %1769 = vrot.lane.b32.xlu1 %v2732_v37, %s3032_s28 }
0x243e   :  { %v1770_v62 = vpop.permute.xlu1 %1769 }
0x243f   :  { %v3666_v60 = vmul.f32 %v1770_v62, %v1754_v9 }
0x2441   :  { %v1779_v21 = vpack.c.bf16 %v3666_v60, %v3666_v60 }
0x2443   :  { %1781 = vrot.lane.b32.xlu0 %v1779_v21, %s3043_s0 }
0x24b5   :  { %v1782_v23 = vpop.permute.xlu0 %1781 }
0x24b6   :  { %2561 = vmatmul.mubr.msk.bf16.vlgmr.msra.gmra.mrb[40].mxu1 %vm312_vm2, %v1782_v23 }
0x24b7   :  { %2573 = vmatpush3.bf16.msra.mxu1 %v3567_v48  ;;  %2576 = vmatprep.mubr.msk.bf16.mxu1 %vm3042_vm0, %v3041_v1 }
0x24b8   :  { %2574 = vmatprep.subr.bf16.mxu1 %v3041_v1 }
0x24bb   :  { %2575 = vmatpush3.bf16.msra.mxu1 %v3575_v10 }
0x2589   :  { %v1820_v14 = vpop.f32.mrb[40].mxu1 }
0x258a   :  { %v1826_v36 = vadd.f32 %v1820_v14, %v3604_v43  ;;  %v2562_v29 = vpop.f32.mrb[41].mxu1 }
0x258b   :  { %v1823_v33 = vpop.f32.mrb[42].mxu1 }
0x258c   :  { %2733 = vtanh.f32 %v1826_v36  ;;  %v2563_v27 = vpop.f32.mrb[43].mxu1  ;;  %v1827_v41 = vmul.f32 0.5, %v1826_v36 }
0x258e   :  { %2735 = vtanh.f32 %v1827_v41 }
0x2596   :  { %v2734_v20 = vpop.eup %2733 }
0x2597   :  { %1834 = vrot.lane.b32.xlu1 %v2734_v20, %s3032_s28 }
0x2598   :  { %v2736_v22 = vpop.eup %2735 }
0x2599   :  { %v1829_v49 = vmul.f32 0.5, %v2736_v22 }
0x259b   :  { %v1830_v26 = vadd.f32 0.5, %v1829_v49 }
0x259d   :  { %v1832_v30 = vmul.f32 %v1830_v26, %v1766_v13 }
0x2609   :  { %v1835_v50 = vpop.permute.xlu1 %1834 }
0x260a   :  { %v1837_v51 = vmul.f32 %v1835_v50, %v1830_v26 }
0x260c   :  { %1839 = vrot.lane.b32.xlu0 %v1837_v51, %s3043_s0 }
0x267e   :  { %v1840_v53 = vpop.permute.xlu0 %1839 }
0x267f   :  { %v1842_v34 = vadd.f32 %v1840_v53, %v1832_v30 }
0x2681   :  { %2737 = vtanh.f32 %v1842_v34 }
0x268b   :  { %v2738_v43 = vpop.eup %2737 }
0x268c   :  { %1845 = vrot.lane.b32.xlu1 %v2738_v43, %s3032_s28 }
0x26fe   :  { %v1846_v38 = vpop.permute.xlu1 %1845 }
0x26ff   :  { %v3681_v54 = vmul.f32 %v1846_v38, %v1830_v26 }
0x2701   :  { %v1855_v40 = vpack.c.bf16 %v3681_v54, %v3681_v54 }
0x2703   :  { %1857 = vrot.lane.b32.xlu0 %v1855_v40, %s3043_s0 }
0x2775   :  { %v1858_v42 = vpop.permute.xlu0 %1857 }
0x2776   :  { %2569 = vmatmul.mubr.msk.bf16.vlgmr.msra.gmra.mrb[52].mxu0 %vm312_vm2, %v1858_v42 }
0x2777   :  { %2581 = vmatpush3.bf16.msra.mxu0 %v3567_v48  ;;  %2584 = vmatprep.mubr.msk.bf16.mxu0 %vm3042_vm0, %v3041_v1 }
0x2778   :  { %2582 = vmatprep.subr.bf16.mxu0 %v3041_v1 }
0x277b   :  { %2583 = vmatpush3.bf16.msra.mxu0 %v3575_v10 }
0x2849   :  { %v1896_v52 = vpop.f32.mrb[52].mxu0 }
0x284a   :  { %v1902_v16 = vadd.f32 %v1896_v52, %v3607_v47  ;;  %v2570_v3 = vpop.f32.mrb[53].mxu0 }
0x284b   :  { %v1899_v19 = vpop.f32.mrb[54].mxu0 }
0x284c   :  { %2739 = vtanh.f32 %v1902_v16  ;;  %v2571_v55 = vpop.f32.mrb[55].mxu0  ;;  %v1903_v32 = vmul.f32 0.5, %v1902_v16 }
0x284e   :  { %2741 = vtanh.f32 %v1903_v32 }
0x2856   :  { %v2740_v28 = vpop.eup %2739 }
0x2857   :  { %1910 = vrot.lane.b32.xlu1 %v2740_v28, %s3032_s28 }
0x2858   :  { %v2742_v48 = vpop.eup %2741 }
0x2859   :  { %v1905_v24 = vmul.f32 0.5, %v2742_v48 }
0x285b   :  { %v1906_v15 = vadd.f32 0.5, %v1905_v24 }
0x285d   :  { %v1908_v1 = vmul.f32 %v1906_v15, %v1842_v34 }
0x28c9   :  { %v1911_v63 = vpop.permute.xlu1 %1910 }
0x28ca   :  { %v1913_v6 = vmul.f32 %v1911_v63, %v1906_v15 }
0x28cc   :  { %1915 = vrot.lane.b32.xlu0 %v1913_v6, %s3043_s0 }
0x293e   :  { %v1916_v10 = vpop.permute.xlu0 %1915 }
0x293f   :  { %v1918_v4 = vadd.f32 %v1916_v10, %v1908_v1 }
0x2941   :  { %2743 = vtanh.f32 %v1918_v4 }
0x294b   :  { %v2744_v47 = vpop.eup %2743 }
0x294c   :  { %1921 = vrot.lane.b32.xlu1 %v2744_v47, %s3032_s28 }
0x29be   :  { %v1922_v8 = vpop.permute.xlu1 %1921 }
0x29bf   :  { %v3696_v9 = vmul.f32 %v1922_v8, %v1906_v15 }
0x29c1   :  { %v1931_v45 = vpack.c.bf16 %v3696_v9, %v3696_v9 }
0x29c3   :  { %1933 = vrot.lane.b32.xlu0 %v1931_v45, %s3043_s0 }
0x2a35   :  { %v1934_v5 = vpop.permute.xlu0 %1933 }
0x2a36   :  { %2577 = vmatmul.mubr.msk.bf16.vlgmr.msra.gmra.mrb[44].mxu1 %vm312_vm2, %v1934_v5 }
0x2b09   :  { %v1972_v44 = vpop.f32.mrb[44].mxu1 }
0x2b0a   :  { %v1978_v39 = vadd.f32 %v1972_v44, %v3610_v17  ;;  %v2578_v13 = vpop.f32.mrb[45].mxu1 }
0x2b0b   :  { %v1975_v37 = vpop.f32.mrb[46].mxu1 }
0x2b0c   :  { %2745 = vtanh.f32 %v1978_v39  ;;  %v2579_v62 = vpop.f32.mrb[47].mxu1  ;;  %v1979_v23 = vmul.f32 0.5, %v1978_v39 }
0x2b0e   :  { %2747 = vtanh.f32 %v1979_v23 }
0x2b16   :  { %v2746_v21 = vpop.eup %2745 }
0x2b17   :  { %1986 = vrot.lane.b32.xlu1 %v2746_v21, %s3032_s28 }
0x2b18   :  { %v2748_v14 = vpop.eup %2747 }
0x2b19   :  { %v1981_v36 = vmul.f32 0.5, %v2748_v14 }
0x2b1b   :  { %v1982_v29 = vadd.f32 0.5, %v1981_v36  ;;  %v2366_v36 = vld [vmem:[%s3903_s13] ss:$0 sm:$0xff]  ;;  %s3045_s13 = smov [#allocation16]  }
0x2b1c   :  { %s2287_s6 = sshll.u32 %s3045_s13, 4  ;;  %s2288_s6 = int_to_ptr.vmem [resolvable:$true] %s2287_s6 }
0x2b1d   :  { %v1984_v20 = vmul.f32 %v1982_v29, %v1918_v4  ;;  %s2975_s1 = scalar_lea.vmem %s2288_s6, 1024  ;;  %p2980_p1 = scmp.lt.s32.totalorder %s2288_s6, %s2288_s6 }
0x2b1e   :  { %p2976_p0 = scmp.ne.s32.totalorder %s2288_s6, %s2975_s1  ;;  %p2981_p2 = scmp.lt.s32.totalorder %s2975_s1, %s2975_s1 }
0x2b20   :  { %p2982_p3 = por %p2981_p2, %p2980_p1 }
0x2b22   :  { %p2983_p4 = pnand %p2982_p3, %p2976_p0 }
0x2b89   :  { %v1987_v33 = vpop.permute.xlu1 %1986 }
0x2b8a   :  { %v1989_v27 = vmul.f32 %v1987_v33, %v1982_v29 }
0x2b8c   :  { %1991 = vrot.lane.b32.xlu0 %v1989_v27, %s3043_s0 }
0x2bfe   :  { %v1992_v41 = vpop.permute.xlu0 %1991 }
0x2bff   :  { %v1994_v22 = vadd.f32 %v1992_v41, %v1984_v20 }
0x2c01   :  { %2749 = vtanh.f32 %v1994_v22 }
0x2c0b   :  { %v2750_v17 = vpop.eup %2749 }
0x2c0c   :  { %1997 = vrot.lane.b32.xlu1 %v2750_v17, %s3032_s28 }
0x2c7e   :  { %v1998_v49 = vpop.permute.xlu1 %1997 }
0x2c7f   :  { %v2000_v26 = vmul.f32 %v1998_v49, %v1982_v29 }
0x2c81   :  { %v2007_v50 = vpack.c.bf16 %v2000_v26, %v2000_v26 }
0x2c83   :  { %2009 = vrot.lane.b32.xlu0 %v2007_v50, %s3043_s0 }
0x2cf5   :  { %v2010_v51 = vpop.permute.xlu0 %2009 }
0x2cf6   :  { %2585 = vmatmul.mubr.msk.bf16.vlgmr.msra.gmra.mrb[56].mxu0 %vm312_vm2, %v2010_v51 }
0x2dc9   :  { %v2048_v30 = vpop.f32.mrb[56].mxu0 }
0x2dca   :  { %v2054_v53 = vadd.f32 %v2048_v30, %v3613_v18  ;;  %v2586_v34 = vpop.f32.mrb[57].mxu0  ;;  %v937_v18 = vrot.slane %v3492_v7, %v155_v12 }
0x2dcb   :  { %v2051_v43 = vpop.f32.mrb[58].mxu0 }
0x2dcc   :  { %2751 = vtanh.f32 %v2054_v53  ;;  %v2587_v38 = vpop.f32.mrb[59].mxu0  ;;  %v2055_v42 = vmul.f32 0.5, %v2054_v53  ;;  %v3722_v28 = vadd.f32 %v3480_v0, %v937_v18  ;;  %v3726_v32 = vadd.f32 %v3484_v58, %v937_v18 }
0x2dcd   :  { %v3738_v11 = vadd.f32 %v3520_v35, %v937_v18  ;;  %v2642_v35 = vld [vmem:[#allocation15 + $0x8] sm:$0xff]   ;;  %v1015_v39 = vadd.f32 %v3482_v56, %v937_v18  ;;  %v1031_v13 = vadd.f32 %v3488_v61, %v937_v18  ;;  %v1041_v37 = vadd.f32 %v3514_v31, %v937_v18 }
0x2dce   :  { %2753 = vtanh.f32 %v2055_v42 }
0x2dd6   :  { %v2752_v40 = vpop.eup %2751 }
0x2dd7   :  { %2062 = vrot.lane.b32.xlu1 %v2752_v40, %s3032_s28 }
0x2dd8   :  { %v2754_v52 = vpop.eup %2753 }
0x2dd9   :  { %v2057_v16 = vmul.f32 0.5, %v2754_v52 }
0x2ddb   :  { %v2058_v3 = vadd.f32 0.5, %v2057_v16 }
0x2ddd   :  { %v2060_v12 = vmul.f32 %v2058_v3, %v1994_v22 }
0x2e49   :  { %v2063_v19 = vpop.permute.xlu1 %2062 }
0x2e4a   :  { %v2065_v55 = vmul.f32 %v2063_v19, %v2058_v3 }
0x2e4c   :  { %2067 = vrot.lane.b32.xlu0 %v2065_v55, %s3043_s0 }
0x2e50   :  { %1546 = vrot.lane.b32.xlu0 %v3619_v57, %s3043_s0  ;;  %v3730_v57 = vadd.f32 %v3486_v59, %v937_v18 }
0x2e54   :  { %1698 = vrot.lane.b32.xlu0 %v3650_v46, %s3043_s0  ;;  %v3734_v46 = vadd.f32 %v3490_v2, %v937_v18 }
0x2e58   :  { %1850 = vrot.lane.b32.xlu0 %v3681_v54, %s3043_s0  ;;  %v2641_v54 = vld [vmem:[#allocation15] sm:$0xff]  }
0x2e59   :  { %2588 = vmatprep.subr.bf16.mxu1 %v2641_v54 }
0x2e5a   :  { %2589 = vmatpush3.bf16.msra.mxu1 %v2641_v54 }
0x2e5b   :  { %2590 = vmatprep.subr.bf16.mxu1 %v2642_v35 }
0x2e5c   :  { %2002 = vrot.lane.b32.xlu0 %v2000_v26, %s3043_s0 }
0x2e5e   :  { %2591 = vmatpush3.bf16.msra.mxu1 %v2642_v35 }
0x2e7b   :  { %1049 = vmax.xlane.f32.xlu0 %v3722_v28 }
0x2e7f   :  { %1053 = vmax.xlane.f32.xlu0 %v3726_v32 }
0x2e83   :  { %1055 = vmax.xlane.f32.xlu0 %v3730_v57 }
0x2e87   :  { %1059 = vmax.xlane.f32.xlu0 %v3734_v46 }
0x2e8b   :  { %1063 = vmax.xlane.f32.xlu0 %v3738_v11 }
0x2ebe   :  { %v2068_v0 = vpop.permute.xlu0 %2067 }
0x2ebf   :  { %v2070_v58 = vadd.f32 %v2068_v0, %v2060_v12 }
0x2ec1   :  { %2755 = vtanh.f32 %v2070_v58 }
0x2ec2   :  { %v1547_v7 = vpop.permute.xlu0 %1546 }
0x2ec3   :  { %1549 = vst.msk [vmem:[#allocation2] sm:$0xff] %vm312_vm2, %v1547_v7 }
0x2ec6   :  { %v1699_v59 = vpop.permute.xlu0 %1698 }
0x2ec7   :  { %1701 = vst.msk [vmem:[#allocation2 + $0x10] sm:$0xff] %vm312_vm2, %v1699_v59 }
0x2eca   :  { %v1851_v2 = vpop.permute.xlu0 %1850  ;;  %v2082_v4 = vld [vmem:[#allocation2] sm:$0xff] }
0x2ecb   :  { %v2756_v48 = vpop.eup %2755  ;;  %1853 = vst.msk [vmem:[#allocation2 + $0x20] sm:$0xff] %vm312_vm2, %v1851_v2 }
0x2ecc   :  { %2073 = vrot.lane.b32.xlu1 %v2756_v48, %s3032_s28 }
0x2ece   :  { %v2003_v24 = vpop.permute.xlu0 %2002 }
0x2ecf   :  { %2005 = vst.msk [vmem:[#allocation2 + $0x30] sm:$0xff] %vm312_vm2, %v2003_v24 }
0x2ed0   :  { %1622 = vrot.lane.b32.xlu1 %v3634_v25, %s3043_s0 }
0x2ed2   :  { %v2086_v45 = vld [vmem:[#allocation2 + $0x20] sm:$0xff] }
0x2ed4   :  { %1774 = vrot.lane.b32.xlu1 %v3666_v60, %s3043_s0  ;;  %v2084_v60 = vld [vmem:[#allocation2 + $0x10] sm:$0xff] }
0x2ed6   :  { %v2088_v21 = vld [vmem:[#allocation2 + $0x30] sm:$0xff] }
0x2ed8   :  { %1926 = vrot.lane.b32.xlu1 %v3696_v9, %s3043_s0 }
0x2f08   :  { %v1050_v22 = vpop.xlane.xlu0 %1049 }
0x2f09   :  { %v3780_v50 = vsub.f32 %v3722_v28, %v1050_v22 }
0x2f0b   :  { %v1073_v53 = vmul.f32 1.442695, %v3780_v50 }
0x2f0c   :  { %v1054_v17 = vpop.xlane.xlu0 %1053 }
0x2f0d   :  { %v3786_v34 = vsub.f32 %v3726_v32, %v1054_v17  ;;  %2757 = vpow2.f32 %v1073_v53 }
0x2f0f   :  { %v1077_v52 = vmul.f32 1.442695, %v3786_v34 }
0x2f10   :  { %v1056_v26 = vpop.xlane.xlu0 %1055 }
0x2f11   :  { %v3789_v38 = vsub.f32 %v3730_v57, %v1056_v26 }
0x2f13   :  { %v1079_v28 = vmul.f32 1.442695, %v3789_v38 }
0x2f14   :  { %v1060_v43 = vpop.xlane.xlu0 %1059 }
0x2f15   :  { %v3799_v32 = vsub.f32 %v3734_v46, %v1060_v43 }
0x2f17   :  { %v1083_v54 = vmul.f32 1.442695, %v3799_v32  ;;  %v2758_v35 = vpop.eup %2757 }
0x2f18   :  { %v1064_v12 = vpop.xlane.xlu0 %1063 }
0x2f19   :  { %v3810_v46 = vsub.f32 %v3738_v11, %v1064_v12 }
0x2f1b   :  { %v1087_v24 = vmul.f32 1.442695, %v3810_v46 }
0x2f3e   :  { %v2074_v15 = vpop.permute.xlu1 %2073 }
0x2f3f   :  { %v2076_v63 = vmul.f32 %v2074_v15, %v2058_v3 }
0x2f41   :  { %2078 = vrot.lane.b32.xlu1 %v2076_v63, %s3043_s0 }
0x2f42   :  { %v1623_v6 = vpop.permute.xlu1 %1622 }
0x2f43   :  { %1625 = vst.msk [vmem:[#allocation2 + $0x8] sm:$0xff] %vm312_vm2, %v1623_v6 }
0x2f46   :  { %v1775_v1 = vpop.permute.xlu1 %1774 }
0x2f47   :  { %1777 = vst.msk [vmem:[#allocation2 + $0x18] sm:$0xff] %vm312_vm2, %v1775_v1 }
0x2f4a   :  { %v1927_v10 = vpop.permute.xlu1 %1926  ;;  %v2083_v47 = vld [vmem:[#allocation2 + $0x8] sm:$0xff] }
0x2f4b   :  { %1929 = vst.msk [vmem:[#allocation2 + $0x28] sm:$0xff] %vm312_vm2, %v1927_v10  ;;  %v2090_v25 = vpack.c.bf16 %v2083_v47, %v2082_v4 }
0x2f4d   :  { %2592 = vmatprep.mubr.msk.bf16.mxu1 %vm312_vm2, %v2090_v25 }
0x2f4e   :  { %v2085_v8 = vld [vmem:[#allocation2 + $0x18] sm:$0xff] }
0x2f4f   :  { %v2091_v9 = vpack.c.bf16 %v2085_v8, %v2084_v60 }
0x2f51   :  { %2593 = vmatmul.mubr.msk.bf16.vlgmr.msra.gmra.mrb[48].mxu1 %vm312_vm2, %v2091_v9 }
0x2f52   :  { %v2087_v5 = vld [vmem:[#allocation2 + $0x28] sm:$0xff] }
0x2f53   :  { %v2092_v44 = vpack.c.bf16 %v2087_v5, %v2086_v45 }
0x2f55   :  { %2596 = vmatprep.mubr.msk.bf16.mxu1 %vm312_vm2, %v2092_v44 }
0x2f65   :  { %1051 = vmax.xlane.f32.xlu1 %v1015_v39 }
0x2f69   :  { %1057 = vmax.xlane.f32.xlu1 %v1031_v13 }
0x2f6d   :  { %1061 = vmax.xlane.f32.xlu1 %v1041_v37 }
0x2fb3   :  { %v2079_v62 = vpop.permute.xlu1 %2078 }
0x2fb4   :  { %2081 = vst.msk [vmem:[#allocation2 + $0x38] sm:$0xff] %vm312_vm2, %v2079_v62 }
0x2fbb   :  { %v2089_v23 = vld [vmem:[#allocation2 + $0x38] sm:$0xff] }
0x2fbc   :  { %v2093_v14 = vpack.c.bf16 %v2089_v23, %v2088_v21 }
0x2fbe   :  { %2597 = vmatmul.mubr.msk.bf16.gmra.mrb[52].mxu1 %vm312_vm2, %v2093_v14 }
0x2ff2   :  { %v1052_v49 = vpop.xlane.xlu1 %1051 }
0x2ff3   :  { %v3782_v51 = vsub.f32 %v1015_v39, %v1052_v49 }
0x2ff5   :  { %v1075_v40 = vmul.f32 1.442695, %v3782_v51 }
0x2ff6   :  { %v1058_v30 = vpop.xlane.xlu1 %1057 }
0x2ff7   :  { %v3793_v16 = vsub.f32 %v1031_v13, %v1058_v30  ;;  %2759 = vpow2.f32 %v1075_v40 }
0x2ff8   :  { %2761 = vpow2.f32 %v1077_v52 }
0x2ff9   :  { %v1081_v58 = vmul.f32 1.442695, %v3793_v16  ;;  %2763 = vpow2.f32 %v1079_v28 }
0x2ffa   :  { %v1062_v19 = vpop.xlane.xlu1 %1061 }
0x2ffb   :  { %v3805_v7 = vsub.f32 %v1041_v37, %v1062_v19  ;;  %2765 = vpow2.f32 %v1081_v58 }
0x2ffc   :  { %2767 = vpow2.f32 %v1083_v54 }
0x2ffd   :  { %v1085_v48 = vmul.f32 1.442695, %v3805_v7 }
0x2fff   :  { %2769 = vpow2.f32 %v1085_v48 }
0x3000   :  { %2771 = vpow2.f32 %v1087_v24 }
0x3001   :  { %v2760_v15 = vpop.eup %2759 }
0x3002   :  { %v2762_v63 = vpop.eup %2761 }
0x3003   :  { %v2764_v6 = vpop.eup %2763 }
0x3005   :  { %v2766_v11 = vpop.eup %2765 }
0x3006   :  { %v2768_v1 = vpop.eup %2767 }
0x3009   :  { %v2770_v10 = vpop.eup %2769 }
0x300a   :  { %v2772_v4 = vpop.eup %2771 }
0x3024   :  { %v2594_v56 = vpop.f32.mrb[48].mxu1 }
0x3025   :  { %v2163_v29 = vpop.f32.mrb[49].mxu1  ;;  %v3772_v20 = vadd.f32 %v2594_v56, %v2366_v36 }
0x3026   :  { %v3767_v33 = vadd.f32 %v2366_v36, %v2163_v29  ;;  %v2595_v61 = vpop.f32.mrb[50].mxu1 }
0x3027   :  { %v2166_v27 = vpop.f32.mrb[51].mxu1  ;;  %v3775_v41 = vadd.f32 %v2595_v61, %v2366_v36 }
0x3028   :  { %v3769_v31 = vadd.f32 %v2366_v36, %v2166_v27  ;;  %2194 = vmax.xlane.f32.xlu1 %v3767_v33 }
0x302a   :  { %2196 = vmax.xlane.f32.xlu0 %v3769_v31 }
0x302c   :  { %2198 = vmax.xlane.f32.xlu1 %v3772_v20 }
0x302e   :  { %2200 = vmax.xlane.f32.xlu0 %v3775_v41 }
0x3091   :  { %v2598_v42 = vpop.f32.mrb[52].mxu1 }
0x3092   :  { %v2179_v3 = vpop.f32.mrb[53].mxu1  ;;  %v2188_v59 = vadd.f32 %v2598_v42, %v2366_v36 }
0x3093   :  { %v3795_v55 = vadd.f32 %v2366_v36, %v2179_v3  ;;  %v2599_v18 = vpop.f32.mrb[54].mxu1 }
0x3094   :  { %v2182_v57 = vpop.f32.mrb[55].mxu1  ;;  %v2191_v2 = vadd.f32 %v2599_v18, %v2366_v36 }
0x3095   :  { %v3801_v0 = vadd.f32 %v2366_v36, %v2182_v57  ;;  %2202 = vmax.xlane.f32.xlu1 %v3795_v55 }
0x3097   :  { %2204 = vmax.xlane.f32.xlu0 %v3801_v0 }
0x3099   :  { %2206 = vmax.xlane.f32.xlu1 %v2188_v59 }
0x309b   :  { %2208 = vmax.xlane.f32.xlu0 %v2191_v2 }
0x309d   :  { %1089 = vadd.xlane.f32.xlu1 %v2758_v35 }
0x309f   :  { %1091 = vadd.xlane.f32.xlu0 %v2760_v15 }
0x30a1   :  { %1093 = vadd.xlane.f32.xlu1 %v2762_v63 }
0x30a3   :  { %1095 = vadd.xlane.f32.xlu0 %v2764_v6 }
0x30a5   :  { %1097 = vadd.xlane.f32.xlu1 %v2766_v11 }
0x30a7   :  { %1099 = vadd.xlane.f32.xlu0 %v2768_v1 }
0x30a9   :  { %1101 = vadd.xlane.f32.xlu1 %v2770_v10 }
0x30ab   :  { %1103 = vadd.xlane.f32.xlu0 %v2772_v4 }
0x30b5   :  { %v2195_v47 = vpop.xlane.xlu1 %2194 }
0x30b6   :  { %v3815_v25 = vsub.f32 %v3767_v33, %v2195_v47 }
0x30b7   :  { %v2197_v60 = vpop.xlane.xlu0 %2196 }
0x30b8   :  { %v2218_v8 = vmul.f32 1.442695, %v3815_v25  ;;  %v3819_v9 = vsub.f32 %v3769_v31, %v2197_v60 }
0x30b9   :  { %v2199_v45 = vpop.xlane.xlu1 %2198 }
0x30ba   :  { %2773 = vpow2.f32 %v2218_v8  ;;  %v2220_v5 = vmul.f32 1.442695, %v3819_v9  ;;  %v3823_v44 = vsub.f32 %v3772_v20, %v2199_v45 }
0x30bb   :  { %v2201_v39 = vpop.xlane.xlu0 %2200 }
0x30bc   :  { %2775 = vpow2.f32 %v2220_v5  ;;  %v2222_v13 = vmul.f32 1.442695, %v3823_v44  ;;  %v3827_v37 = vsub.f32 %v3775_v41, %v2201_v39 }
0x30be   :  { %2777 = vpow2.f32 %v2222_v13  ;;  %v2224_v62 = vmul.f32 1.442695, %v3827_v37 }
0x30c0   :  { %2779 = vpow2.f32 %v2224_v62 }
0x30c4   :  { %v2774_v21 = vpop.eup %2773 }
0x30c5   :  { %2234 = vadd.xlane.f32.xlu1 %v2774_v21 }
0x30c6   :  { %v2776_v23 = vpop.eup %2775 }
0x30c7   :  { %2236 = vadd.xlane.f32.xlu0 %v2776_v23 }
0x30c8   :  { %v2778_v14 = vpop.eup %2777 }
0x30c9   :  { %2238 = vadd.xlane.f32.xlu1 %v2778_v14 }
0x30ca   :  { %v2780_v36 = vpop.eup %2779 }
0x30cb   :  { %2240 = vadd.xlane.f32.xlu0 %v2780_v36 }
0x3122   :  { %v2203_v56 = vpop.xlane.xlu1 %2202 }
0x3123   :  { %v3831_v29 = vsub.f32 %v3795_v55, %v2203_v56 }
0x3124   :  { %v2205_v33 = vpop.xlane.xlu0 %2204 }
0x3125   :  { %v2226_v61 = vmul.f32 1.442695, %v3831_v29  ;;  %v3835_v27 = vsub.f32 %v3801_v0, %v2205_v33 }
0x3126   :  { %v2207_v31 = vpop.xlane.xlu1 %2206 }
0x3127   :  { %2781 = vpow2.f32 %v2226_v61  ;;  %v2228_v20 = vmul.f32 1.442695, %v3835_v27  ;;  %v3838_v41 = vsub.f32 %v2188_v59, %v2207_v31 }
0x3128   :  { %v2209_v22 = vpop.xlane.xlu0 %2208 }
0x3129   :  { %2783 = vpow2.f32 %v2228_v20  ;;  %v2230_v17 = vmul.f32 1.442695, %v3838_v41  ;;  %v3841_v49 = vsub.f32 %v2191_v2, %v2209_v22 }
0x312a   :  { %v1090_v26 = vpop.xlane.xlu1 %1089 }
0x312b   :  { %2785 = vpow2.f32 %v2230_v17  ;;  %v2232_v30 = vmul.f32 1.442695, %v3841_v49 }
0x312c   :  { %2787 = vlog2.f32 %v1090_v26  ;;  %v1092_v53 = vpop.xlane.xlu0 %1091 }
0x312d   :  { %2789 = vpow2.f32 %v2232_v30 }
0x312e   :  { %2791 = vlog2.f32 %v1092_v53  ;;  %v1094_v43 = vpop.xlane.xlu1 %1093 }
0x312f   :  { %2793 = vlog2.f32 %v1094_v43 }
0x3130   :  { %v1096_v40 = vpop.xlane.xlu0 %1095 }
0x3131   :  { %v2782_v42 = vpop.eup %2781  ;;  %2795 = vlog2.f32 %v1096_v40 }
0x3132   :  { %2242 = vadd.xlane.f32.xlu1 %v2782_v42  ;;  %v1098_v52 = vpop.xlane.xlu1 %1097 }
0x3133   :  { %v2784_v3 = vpop.eup %2783  ;;  %2797 = vlog2.f32 %v1098_v52 }
0x3134   :  { %2244 = vadd.xlane.f32.xlu0 %v2784_v3  ;;  %v1100_v19 = vpop.xlane.xlu0 %1099 }
0x3135   :  { %v2786_v55 = vpop.eup %2785  ;;  %2799 = vlog2.f32 %v1100_v19 }
0x3136   :  { %v2788_v18 = vpop.eup %2787  ;;  %2246 = vadd.xlane.f32.xlu1 %v2786_v55  ;;  %v1102_v28 = vpop.xlane.xlu1 %1101 }
0x3137   :  { %v2790_v57 = vpop.eup %2789  ;;  %v1106_v12 = vmul.f32 0.6931472, %v2788_v18  ;;  %2801 = vlog2.f32 %v1102_v28 }
0x3138   :  { %v2792_v0 = vpop.eup %2791  ;;  %2248 = vadd.xlane.f32.xlu0 %v2790_v57  ;;  %v1104_v58 = vpop.xlane.xlu0 %1103 }
0x3139   :  { %v2794_v59 = vpop.eup %2793  ;;  %v1121_v54 = vsub.f32 %v3780_v50, %v1106_v12  ;;  %v1108_v2 = vmul.f32 0.6931472, %v2792_v0  ;;  %2803 = vlog2.f32 %v1104_v58 }
0x313a   :  { %v1110_v48 = vmul.f32 0.6931472, %v2794_v59 }
0x313b   :  { %v2796_v35 = vpop.eup %2795  ;;  %1129 = vst [vmem:[#allocation16] sm:$0xff] %v1121_v54  ;;  %v1122_v24 = vsub.f32 %v3782_v51, %v1108_v2 }
0x313c   :  { %v1123_v15 = vsub.f32 %v3786_v34, %v1110_v48  ;;  %v1112_v63 = vmul.f32 0.6931472, %v2796_v35 }
0x313d   :  { %v2798_v6 = vpop.eup %2797  ;;  %1130 = vst [vmem:[#allocation16 + $0x8] sm:$0xff] %v1122_v24 }
0x313e   :  { %1131 = vst [vmem:[#allocation16 + $0x10] sm:$0xff] %v1123_v15  ;;  %v1124_v11 = vsub.f32 %v3789_v38, %v1112_v63  ;;  %v1114_v1 = vmul.f32 0.6931472, %v2798_v6 }
0x313f   :  { %v2800_v10 = vpop.eup %2799 }
0x3140   :  { %1132 = vst [vmem:[#allocation16 + $0x18] sm:$0xff] %v1124_v11  ;;  %v1125_v50 = vsub.f32 %v3793_v16, %v1114_v1  ;;  %v1116_v4 = vmul.f32 0.6931472, %v2800_v10 }
0x3141   :  { %v2802_v47 = vpop.eup %2801 }
0x3142   :  { %1133 = vst [vmem:[#allocation16 + $0x20] sm:$0xff] %v1125_v50  ;;  %v1126_v60 = vsub.f32 %v3799_v32, %v1116_v4  ;;  %v1118_v8 = vmul.f32 0.6931472, %v2802_v47 }
0x3143   :  { %v2804_v51 = vpop.eup %2803 }
0x3144   :  { %1134 = vst [vmem:[#allocation16 + $0x28] sm:$0xff] %v1126_v60  ;;  %v1127_v34 = vsub.f32 %v3805_v7, %v1118_v8  ;;  %v1120_v45 = vmul.f32 0.6931472, %v2804_v51 }
0x3146   :  { %1135 = vst [vmem:[#allocation16 + $0x30] sm:$0xff] %v1127_v34  ;;  %v1128_v5 = vsub.f32 %v3810_v46, %v1120_v45 }
0x3148   :  { %1136 = vst [vmem:[#allocation16 + $0x38] sm:$0xff] %v1128_v5 }
0x3152   :  { %v2235_v38 = vpop.xlane.xlu1 %2234 }
0x3153   :  { %2805 = vlog2.f32 %v2235_v38 }
0x3154   :  { %v2237_v39 = vpop.xlane.xlu0 %2236 }
0x3155   :  { %2807 = vlog2.f32 %v2237_v39 }
0x3156   :  { %v2239_v16 = vpop.xlane.xlu1 %2238 }
0x3157   :  { %2809 = vlog2.f32 %v2239_v16 }
0x3158   :  { %v2241_v32 = vpop.xlane.xlu0 %2240 }
0x3159   :  { %2986 = shalt.err (!%p2983_p4)
}
0x315a   :  { %s2987_s5 = scalar_lea.hbm %s3904_s14, 1024 }
0x315b   :  { %p2988_p5 = scmp.ne.s32.totalorder %s3904_s14, %s2987_s5  ;;  %p2991_p6 = scmp.lt.u32.totalorder %s2987_s5, %s3904_s14 }
0x315d   :  { %p2993_p7 = pnand %p2991_p6, %p2988_p5 }
0x315f   :  { %2996 = shalt.err (!%p2993_p7)
}
0x3160   :  { %s3046_s16 = smov 128   ;;  %s3047_s15 = smov 8   ;;  %2811 = vlog2.f32 %v2241_v32  ;;  %v2806_v7 = vpop.eup %2805 }
0x3161   :  { %2293 = dma.vmem_to_hbm [thread:$0]  %s2288_s6, 1024, %s3904_s14, [#allocation6], %s3046_s16, %s3046_s16, %s3047_s15   ;;  %v2251_v46 = vmul.f32 0.6931472, %v2806_v7  ;;  %v2808_v13 = vpop.eup %2807 }
0x3162   :  { %v2253_v21 = vmul.f32 0.6931472, %v2808_v13  ;;  %v2810_v23 = vpop.eup %2809  ;;  %s3048_s14 = smov [#allocation17]  }
0x3163   :  { %v2266_v62 = vsub.f32 %v3815_v25, %v2251_v46  ;;  %v2255_v36 = vmul.f32 0.6931472, %v2810_v23  ;;  %s2299_s17 = sshll.u32 %s3048_s14, 4  ;;  %s2300_s17 = int_to_ptr.vmem [resolvable:$true] %s2299_s17 }
0x3164   :  { %v2267_v14 = vsub.f32 %v3819_v9, %v2253_v21  ;;  %s2997_s22 = scalar_lea.vmem %s2300_s17, 1024  ;;  %p3002_p9 = scmp.lt.s32.totalorder %s2300_s17, %s2300_s17 }
0x3165   :  { %2274 = vst [vmem:[#allocation17] sm:$0xff] %v2266_v62  ;;  %v2268_v33 = vsub.f32 %v3823_v44, %v2255_v36  ;;  %p2998_p8 = scmp.ne.s32.totalorder %s2300_s17, %s2997_s22  ;;  %p3003_p10 = scmp.lt.s32.totalorder %s2997_s22, %s2997_s22 }
0x3166   :  { %2275 = vst [vmem:[#allocation17 + $0x8] sm:$0xff] %v2267_v14 }
0x3167   :  { %2276 = vst [vmem:[#allocation17 + $0x10] sm:$0xff] %v2268_v33  ;;  %p3004_p11 = por %p3003_p10, %p3002_p9 }
0x3169   :  { %p3005_p12 = pnand %p3004_p11, %p2998_p8 }
0x316a   :  { %v2812_v56 = vpop.eup %2811 }
0x316b   :  { %v2257_v61 = vmul.f32 0.6931472, %v2812_v56 }
0x316d   :  { %v2269_v31 = vsub.f32 %v3827_v37, %v2257_v61 }
0x316f   :  { %2277 = vst [vmem:[#allocation17 + $0x18] sm:$0xff] %v2269_v31 }
0x31bf   :  { %v2243_v20 = vpop.xlane.xlu1 %2242 }
0x31c0   :  { %2813 = vlog2.f32 %v2243_v20 }
0x31c1   :  { %v2245_v22 = vpop.xlane.xlu0 %2244 }
0x31c2   :  { %2815 = vlog2.f32 %v2245_v22 }
0x31c3   :  { %v2247_v25 = vpop.xlane.xlu1 %2246 }
0x31c4   :  { %2817 = vlog2.f32 %v2247_v25 }
0x31c5   :  { %v2249_v17 = vpop.xlane.xlu0 %2248 }
0x31c6   :  { %2819 = vlog2.f32 %v2249_v17 }
0x31ca   :  { %v2814_v26 = vpop.eup %2813 }
0x31cb   :  { %v2259_v9 = vmul.f32 0.6931472, %v2814_v26 }
0x31cc   :  { %v2816_v30 = vpop.eup %2815 }
0x31cd   :  { %v2270_v53 = vsub.f32 %v3831_v29, %v2259_v9  ;;  %v2261_v43 = vmul.f32 0.6931472, %v2816_v30 }
0x31ce   :  { %v2818_v44 = vpop.eup %2817 }
0x31cf   :  { %2278 = vst [vmem:[#allocation17 + $0x20] sm:$0xff] %v2270_v53  ;;  %v2271_v40 = vsub.f32 %v3835_v27, %v2261_v43  ;;  %v2263_v37 = vmul.f32 0.6931472, %v2818_v44 }
0x31d0   :  { %v2820_v42 = vpop.eup %2819 }
0x31d1   :  { %2279 = vst [vmem:[#allocation17 + $0x28] sm:$0xff] %v2271_v40  ;;  %v2272_v52 = vsub.f32 %v3838_v41, %v2263_v37  ;;  %v2265_v3 = vmul.f32 0.6931472, %v2820_v42 }
0x31d3   :  { %2280 = vst [vmem:[#allocation17 + $0x30] sm:$0xff] %v2272_v52  ;;  %v2273_v19 = vsub.f32 %v3841_v49, %v2265_v3 }
0x31d5   :  { %2281 = vst [vmem:[#allocation17 + $0x38] sm:$0xff] %v2273_v19 }
0x31d6   :  { %3008 = shalt.err (!%p3005_p12)
}
0x31d7   :  { %s3908_s21 = sld [smem:[#allocation25_spill]] }
0x31dd   :  { %s3009_s7 = scalar_lea.hbm %s3908_s21, 1024 }
0x31de   :  { %p3010_p13 = scmp.ne.s32.totalorder %s3908_s21, %s3009_s7  ;;  %p3013_p0 = scmp.lt.u32.totalorder %s3009_s7, %s3908_s21 }
0x31e0   :  { %p3015_p1 = pnand %p3013_p0, %p3010_p13 }
0x31e2   :  { %3018 = shalt.err (!%p3015_p1)
}
0x31e3   :  { %2305 = dma.vmem_to_hbm [thread:$0]  %s2300_s17, 1024, %s3908_s21, [#allocation18], %s3046_s16, %s3046_s16, %s3047_s15  }
0x31e4   :  { %3027 = dma.done.wait [#allocation6], 1024  }
0x31e5   :  { %3028 = vsyncadd [#allocation6], 4294966272 }
0x31e6   :  { %3029 = dma.done.wait [#allocation18], 1024  }
0x31e7   :  { %3030 = vsyncadd [#allocation18], 4294966272 }
0x31e8   :  { %2312 = vsyncpa [#allocation5], 1 }
0x31e9   :  { %2313 = vsyncpa [#allocation8], 1 }
0x31ea   :  { %2314 = vsyncpa [#allocation11], 1 }
0x31eb   :  { %2315 = vsyncpa [#allocation14], 1 }
0x31ec   :  { %2316 = vsyncpa [#allocation6], 1 }
0x31ed   :  { %2317 = vsyncpa [#allocation18], 1 }

</bundles_post_ra>
